<compile_context>
chip_gen: v6e
topology: v6e:2x2x1
jax: 0.10.0
libtpu: 0.0.40
codegen_flags: <defaults>
</compile_context>

<pallas_src>
import numpy as np
import jax
import jax.numpy as jnp
from jax.experimental import pallas as pl
from jax.experimental.pallas import tpu as pltpu

# ---------------- small synthetic Vocos config ----------------
BANDWIDTHS = [1.5, 3.0, 6.0, 12.0]
BANDWIDTH = 1.5
B, T, NQ = 2, 8, 2          # batch, tokens, quantizers
BINS = 64                   # codebook size per quantizer
CIN = 32                    # codebook (feature) dim  -> backbone input channels
DIM = 64                    # backbone dim
IDIM = 128                  # ConvNeXt intermediate dim
NLAYERS = 2                 # ConvNeXt blocks
K = 7                       # conv kernel size
PADC = (K - 1) // 2
NFFT = 16                   # head n_fft
HOP = 4                     # head hop_length
NFREQ = NFFT // 2 + 1
PAD_ISTFT = (NFFT - HOP) // 2
LOUT = T * HOP              # output waveform length (padding="same")
OUT_SIZE = (T - 1) * HOP + NFFT  # un-trimmed OLA length

ROWS = B * T                # batch folded into sublanes: activation rows per grid step
XP_OFF = 8                  # 8-aligned left halo of the padded-activation scratch
XP_ROWS = 32                # XP_OFF + ROWS + right halo (rounded up to a multiple of 8)


# ---------------- fused Pallas kernel (whole network, one grid step) ----------------
def vocos_fused_kernel(
        nvalid_ref,                                   # SMEM (B,) int32 scalar prefetch
        im2col_ref,                                   # (B*T, K*CIN) bf16
        embw_ref, embb_ref,                           # (K*CIN, DIM) bf16, (1, DIM) f32
        nsc_ref, nsh_ref,                             # embed AdaLayerNorm scale/shift
        dww_ref, dwb_ref, asc_ref, ash_ref,           # stacked per-layer dwconv / AdaLN
        w1_ref, b1_ref, w2_ref, b2_ref, gamma_ref,    # stacked per-layer MLP / layer-scale
        flnw_ref, flnb_ref,                           # final LayerNorm
        whead_ref, bhead_ref,                         # fused head linear [mag | phase]
        cosb_ref, sinb_ref,                           # hann-windowed irfft basis (F, NFFT)
        invenv_ref,                                   # (1, LOUT) 1/OLA-envelope
        out_ref,                                      # (B, LOUT)
        xpad_s, ola_s):                               # VMEM scratch
    f32 = jnp.float32
    bf16 = jnp.bfloat16

    def layer_norm(v, scale, shift):
        m = jnp.mean(v, axis=-1, keepdims=True)
        var = jnp.mean(jnp.square(v - m), axis=-1, keepdims=True)
        return (v - m) * jax.lax.rsqrt(var + 1e-6) * scale + shift

    # ---- embed Conv1d(k=7, pad=3) as ONE im2col matmul over all B*T rows
    #      (bf16 operands, f32 accumulate) + AdaLayerNorm ----
    x = jnp.dot(im2col_ref[...], embw_ref[...],
                preferred_element_type=f32) + embb_ref[...]
    x = layer_norm(x, nsc_ref[...], nsh_ref[...])

    # ---- per-tap validity masks (layer-invariant, hoisted): a tap at offset
    #      off = k - PADC must not cross a batch boundary of the folded (B*T, DIM)
    #      activation; the same mask also makes the scratch halo rows don't-cares,
    #      so the scratch never needs zeroing. ----
    row = jax.lax.broadcasted_iota(jnp.int32, (ROWS, DIM), 0)
    srow = row & (T - 1)                              # row index within its batch (T = 2^n here)
    tap_valid = [None if k == PADC else
                 ((srow >= PADC - k) & (srow < T + PADC - k)) for k in range(K)]

    # TODO(synk): at production dim/idim/NLAYERS, stream per-layer weights (layer as an
    # "arbitrary" grid axis / pltpu.emit_pipeline) instead of keeping all stacks resident.
    for l in range(NLAYERS):
        # depthwise conv k=7: one aligned center store + 7 shifted sublane reads.
        # TODO(synk): a pltpu.roll(+mask) variant would keep x entirely in vregs (XLU slot).
        xpad_s[XP_OFF:XP_OFF + ROWS, :] = x
        dww = dww_ref[l]                              # (K, DIM) f32
        dw = jnp.zeros((ROWS, DIM), f32)
        for k in range(K):
            lo = XP_OFF - PADC + k
            xs = xpad_s[lo:lo + ROWS, :]
            if tap_valid[k] is not None:
                xs = jnp.where(tap_valid[k], xs, 0.0)
            dw = dw + xs * dww[k:k + 1, :]
        dw = dw + dwb_ref[l]
        h = layer_norm(dw, asc_ref[l], ash_ref[l])
        h = jnp.dot(h.astype(bf16), w1_ref[l], preferred_element_type=f32) + b1_ref[l]
        # TODO(synk): torch nn.GELU() is exact (erf-based); tanh approximation used here.
        h = jax.nn.gelu(h, approximate=True)
        y = jnp.dot(h.astype(bf16), w2_ref[l], preferred_element_type=f32) + b2_ref[l]
        x = x + y * gamma_ref[l]                      # layer-scale + residual (x reused)

    # ---- ISTFT head: final LayerNorm + ONE fused (DIM, 2F) linear at natural width ----
    xn = layer_norm(x, flnw_ref[...], flnb_ref[...])
    yh = jnp.dot(xn.astype(bf16), whead_ref[...],
                 preferred_element_type=f32) + bhead_ref[...]        # (B*T, 2F)
    mag = jnp.minimum(jnp.exp(yh[:, :NFREQ]), 100.0)                 # exp + clip(max=1e2)
    ph = yh[:, NFREQ:]
    re = mag * jnp.cos(ph)
    im = mag * jnp.cos(ph - (np.pi / 2.0))            # sin(x) = cos(x - pi/2)
    # irfft with the hann window folded into the basis: two tiny (F, NFFT) matmuls.
    frames = (jnp.dot(re.astype(bf16), cosb_ref[...], preferred_element_type=f32) +
              jnp.dot(im.astype(bf16), sinb_ref[...], preferred_element_type=f32))

    # ---- banded overlap-add (no dense (T*2F, LOUT) fold), trim + 1/envelope + mask ----
    # TODO(synk): at production frame counts, make this a sliding per-time-tile
    # accumulator with phase-vectorized shifted adds instead of per-frame RMWs.
    ola_s[...] = jnp.zeros_like(ola_s)
    for b in range(B):
        for t in range(T):
            s0 = t * HOP
            r = b * T + t
            ola_s[b:b + 1, s0:s0 + NFFT] = (ola_s[b:b + 1, s0:s0 + NFFT]
                                            + frames[r:r + 1, :])

    # length mask built in-kernel from the prefetched scalar (no mask DMA).
    pos = jax.lax.broadcasted_iota(jnp.int32, (1, LOUT), 1)
    for b in range(B):
        wav = ola_s[b:b + 1, PAD_ISTFT:PAD_ISTFT + LOUT] * invenv_ref[...]
        out_ref[b:b + 1, :] = jnp.where(pos < nvalid_ref[b], wav, 0.0).astype(out_ref.dtype)


# ---------------- pallas_call wrapper ----------------
def _rep(shape):
    # Replicated (constant block index) weight spec.
    # TODO(synk): at production (time-tiled grid) add pipeline_mode=pl.Buffered(1) here --
    # constant-index weights don't need a second pipeline buffer.
    nd = len(shape)
    return pl.BlockSpec(shape, lambda *_, _nd=nd: (0,) * _nd)


def vocos_fused(n_valid, im2col, kp):
    return pl.pallas_call(
        vocos_fused_kernel,
        out_shape=jax.ShapeDtypeStruct((B, LOUT), jnp.float32),
        grid_spec=pltpu.PrefetchScalarGridSpec(
            num_scalar_prefetch=1,
            grid=(1,),        # batch folded into sublanes; production: time-tile + batch grid
            in_specs=[
                _rep((ROWS, K * CIN)),
                _rep((K * CIN, DIM)), _rep((1, DIM)),
                _rep((1, DIM)), _rep((1, DIM)),
                _rep((NLAYERS, K, DIM)), _rep((NLAYERS, 1, DIM)),
                _rep((NLAYERS, 1, DIM)), _rep((NLAYERS, 1, DIM)),
                _rep((NLAYERS, DIM, IDIM)), _rep((NLAYERS, 1, IDIM)),
                _rep((NLAYERS, IDIM, DIM)), _rep((NLAYERS, 1, DIM)),
                _rep((NLAYERS, 1, DIM)),
                _rep((1, DIM)), _rep((1, DIM)),
                _rep((DIM, 2 * NFREQ)), _rep((1, 2 * NFREQ)),
                _rep((NFREQ, NFFT)), _rep((NFREQ, NFFT)),
                _rep((1, LOUT)),
            ],
            out_specs=pl.BlockSpec((B, LOUT), lambda *_: (0, 0)),
            scratch_shapes=[pltpu.VMEM((XP_ROWS, DIM), jnp.float32),
                            pltpu.VMEM((B, OUT_SIZE), jnp.float32)],
        ),
        compiler_params=pltpu.CompilerParams(
            dimension_semantics=("arbitrary",),
            vmem_limit_bytes=48 * 1024 * 1024),
    )(n_valid, im2col,
      kp["embw"], kp["embb"], kp["nsc"], kp["nsh"],
      kp["dww"], kp["dwb"], kp["asc"], kp["ash"],
      kp["w1"], kp["b1"], kp["w2"], kp["b2"], kp["gamma"],
      kp["flnw"], kp["flnb"],
      kp["whead"], kp["bhead"], kp["cosb"], kp["sinb"], kp["invenv"])


# ---------------- parameter / constant setup (glue) ----------------
def init_params():
    ks = jax.random.split(jax.random.PRNGKey(42), 4 + NLAYERS)

    def nrm(key, shape, scale=0.02):
        return (scale * jax.random.normal(key, shape)).astype(jnp.float32)

    def bf16_round(a):
        # matmul weights are deployed in bf16; keep the f32 reference on the same values
        return jnp.asarray(a, jnp.float32).astype(jnp.bfloat16).astype(jnp.float32)

    bandwidth_id = int(np.argmin(np.abs(np.asarray(BANDWIDTHS) - BANDWIDTH)))

    # AdaLayerNorm embedding tables (scale init ones, shift zeros) -> row lookup is glue
    ada_scale_emb = jnp.ones((len(BANDWIDTHS), DIM), jnp.float32)
    ada_shift_emb = jnp.zeros((len(BANDWIDTHS), DIM), jnp.float32)
    norm_scale = ada_scale_emb[bandwidth_id][None, :]
    norm_shift = ada_shift_emb[bandwidth_id][None, :]

    blocks = []
    for l in range(NLAYERS):
        kk = jax.random.split(ks[3 + l], 6)
        blocks.append(dict(
            dww=nrm(kk[0], (K, DIM), 0.1),            # depthwise conv weight (k, C)
            dwb=nrm(kk[1], (1, DIM)),
            scale=ada_scale_emb[bandwidth_id][None, :],
            shift=ada_shift_emb[bandwidth_id][None, :],
            w1=bf16_round(nrm(kk[2], (DIM, IDIM))), b1=nrm(kk[3], (1, IDIM)),
            w2=bf16_round(nrm(kk[4], (IDIM, DIM))), b2=nrm(kk[5], (1, DIM)),
            gamma=jnp.full((1, DIM), 1.0 / NLAYERS, jnp.float32),  # layer-scale init
        ))

    # ISTFT constants: real-DFT basis (irfft, norm="backward") with hann window folded in
    n = np.arange(NFFT)
    kf = np.arange(NFREQ)
    ang = 2.0 * np.pi * np.outer(kf, n) / NFFT
    ck = np.where((kf == 0) | (kf == NFFT // 2), 1.0, 2.0)
    window = np.sin(np.pi * n / NFFT) ** 2              # torch.hann_window (periodic)
    cosb = (ck[:, None] * np.cos(ang) / NFFT) * window[None, :]
    sinb = (-ck[:, None] * np.sin(ang) / NFFT) * window[None, :]

    ola = np.zeros((T, NFFT, LOUT), np.float32)          # overlap-add + trim (reference only)
    for t in range(T):
        for j in range(NFFT):
            s = t * HOP + j - PAD_ISTFT
            if 0 <= s < LOUT:
                ola[t, j, s] = 1.0
    env_full = np.zeros(OUT_SIZE)
    for t in range(T):
        env_full[t * HOP:t * HOP + NFFT] += window ** 2
    env = env_full[PAD_ISTFT:OUT_SIZE - PAD_ISTFT]
    assert (env > 1e-11).all()
    inv_env = (1.0 / env)[None, :].astype(np.float32)

    return dict(
        codebook=nrm(ks[0], (NQ * BINS, CIN), 0.1),
        embed_w=bf16_round(nrm(ks[1], (K, CIN, DIM))),   # conv weight as (k, Cin, Cout)
        embed_b=nrm(ks[2], (1, DIM)),
        norm_scale=norm_scale, norm_shift=norm_shift,
        blocks=blocks,
        final_lnw=jnp.ones((1, DIM), jnp.float32),
        final_lnb=jnp.zeros((1, DIM), jnp.float32),
        out_w=bf16_round(nrm(ks[3 + NLAYERS], (DIM, NFFT + 2))),
        out_b=jnp.zeros((1, NFFT + 2), jnp.float32),
        cosb=bf16_round(cosb),
        sinb=bf16_round(sinb),
        ola=jnp.asarray(ola),
        inv_env=jnp.asarray(inv_env),
    )


def pack_kernel_params(p):
    """Repack the reference parameters into the fused-kernel layout (host-side, once)."""
    def stack(key, dtype=jnp.float32):
        return jnp.stack([blk[key] for blk in p["blocks"]], axis=0).astype(dtype)

    return dict(
        codebook=p["codebook"],
        # matmul weights shipped from HBM as bf16 (f32 accumulate in-kernel)
        embw=jnp.reshape(p["embed_w"], (K * CIN, DIM)).astype(jnp.bfloat16),
        embb=p["embed_b"], nsc=p["norm_scale"], nsh=p["norm_shift"],
        dww=stack("dww"), dwb=stack("dwb"), asc=stack("scale"), ash=stack("shift"),
        w1=stack("w1", jnp.bfloat16), b1=stack("b1"),
        w2=stack("w2", jnp.bfloat16), b2=stack("b2"),
        gamma=stack("gamma"),
        flnw=p["final_lnw"], flnb=p["final_lnb"],
        # fused head linear [mag | phase] at natural width (no T-fold replication)
        whead=p["out_w"].astype(jnp.bfloat16), bhead=p["out_b"],
        # hann-windowed irfft basis; OLA / trim / 1/envelope stay banded in-kernel
        cosb=p["cosb"].astype(jnp.bfloat16), sinb=p["sinb"].astype(jnp.bfloat16),
        invenv=p["inv_env"],
    )


# ---------------- forward (Pallas) ----------------
def vocos_forward(tokens, length, kp):
    # codes_to_features: (B, T, NQ) -> permute(2,0,1) -> embedding sum over quantizers
    codes = jnp.transpose(tokens, (2, 0, 1))                                # (NQ, B, T)
    offsets = (jnp.arange(NQ) * BINS)[:, None, None]
    feats = jnp.take(kp["codebook"], codes + offsets, axis=0).sum(axis=0)   # (B, T, CIN)

    # one-time halo pad + im2col so the embed conv is a single MXU dot in-kernel.
    # TODO(synk): at production T, use a haloed (Ttile+K-1, CIN) BlockSpec instead of
    # host im2col (7x input HBM inflation once the kernel is time-tiled).
    xpad = jnp.pad(feats, ((0, 0), (PADC, PADC), (0, 0)))
    im2col = jnp.concatenate([xpad[:, k:k + T, :] for k in range(K)], axis=-1)
    im2col = im2col.reshape(ROWS, K * CIN).astype(jnp.bfloat16)

    # number of valid output samples; ceil matches `idx < length * LOUT`
    n_valid = jnp.ceil(length * LOUT).astype(jnp.int32)

    wavs = vocos_fused(n_valid, im2col, kp)
    return wavs, length


# ---------------- pure-JAX reference (same math, f32, no Pallas) ----------------
def vocos_reference(tokens, length, params):
    codes = jnp.transpose(tokens, (2, 0, 1))
    offsets = (jnp.arange(NQ) * BINS)[:, None, None]
    feats = jnp.take(params["codebook"], codes + offsets, axis=0).sum(axis=0)

    def ln(v, scale, shift, eps=1e-6):
        m = v.mean(-1, keepdims=True)
        va = jnp.square(v - m).mean(-1, keepdims=True)
        return (v - m) * jax.lax.rsqrt(va + eps) * scale + shift

    xpad = jnp.pad(feats, ((0, 0), (PADC, PADC), (0, 0)))
    acc = sum(jnp.einsum("btc,cd->btd", xpad[:, k:k + T, :], params["embed_w"][k])
              for k in range(K)) + params["embed_b"][None]
    x = ln(acc, params["norm_scale"], params["norm_shift"])
    for p in params["blocks"]:
        xpad = jnp.pad(x, ((0, 0), (PADC, PADC), (0, 0)))
        dw = sum(xpad[:, k:k + T, :] * p["dww"][k][None, None, :]
                 for k in range(K)) + p["dwb"][None]
        h = ln(dw, p["scale"], p["shift"])
        h = jax.nn.gelu(h @ p["w1"] + p["b1"][None], approximate=True)
        y = (h @ p["w2"] + p["b2"][None]) * p["gamma"][None]
        x = x + y
    x = ln(x, params["final_lnw"], params["final_lnb"])
    y = x @ params["out_w"] + params["out_b"][None]
    mag = jnp.minimum(jnp.exp(y[..., :NFREQ]), 100.0)
    ph = y[..., NFREQ:]
    frames = (mag * jnp.cos(ph)) @ params["cosb"] + (mag * jnp.sin(ph)) @ params["sinb"]
    wav = jnp.einsum("btn,tns->bs", frames, params["ola"]) * params["inv_env"]
    mask = (jnp.arange(LOUT, dtype=jnp.float32)[None, :] <
            (length * LOUT)[:, None]).astype(jnp.float32)
    return wav * mask, length


# ---------------- main ----------------
if __name__ == "__main__":
    params = init_params()
    kparams = pack_kernel_params(params)

    key = jax.random.PRNGKey(0)
    tokens = jax.random.randint(key, (B, T, NQ), 0, BINS, dtype=jnp.int32)
    length = jnp.array([1.0, 0.5], jnp.float32)

    fwd = jax.jit(lambda t, l: vocos_forward(t, l, kparams))
    wavs, out_len = fwd(tokens, length)
    wavs = jax.block_until_ready(wavs)

    assert wavs.shape == (B, LOUT), wavs.shape
    ref_wavs, _ = vocos_reference(tokens, length, params)
    np.testing.assert_allclose(np.asarray(wavs), np.asarray(ref_wavs),
                               rtol=2e-2, atol=2e-2)
    print("KERNEL_OK")
</pallas_src>

<mosaic_0001>
module attributes {stable_mosaic.version = 11 : i64} {
  func.func @vocos_fused_kernel(%arg0: i32, %arg1: memref<2xi32, #tpu.memory_space<smem>>, %arg2: memref<16x224xbf16, #tpu.memory_space<vmem>>, %arg3: memref<224x64xbf16, #tpu.memory_space<vmem>>, %arg4: memref<1x64xf32, #tpu.memory_space<vmem>>, %arg5: memref<1x64xf32, #tpu.memory_space<vmem>>, %arg6: memref<1x64xf32, #tpu.memory_space<vmem>>, %arg7: memref<2x7x64xf32, #tpu.memory_space<vmem>>, %arg8: memref<2x1x64xf32, #tpu.memory_space<vmem>>, %arg9: memref<2x1x64xf32, #tpu.memory_space<vmem>>, %arg10: memref<2x1x64xf32, #tpu.memory_space<vmem>>, %arg11: memref<2x64x128xbf16, #tpu.memory_space<vmem>>, %arg12: memref<2x1x128xf32, #tpu.memory_space<vmem>>, %arg13: memref<2x128x64xbf16, #tpu.memory_space<vmem>>, %arg14: memref<2x1x64xf32, #tpu.memory_space<vmem>>, %arg15: memref<2x1x64xf32, #tpu.memory_space<vmem>>, %arg16: memref<1x64xf32, #tpu.memory_space<vmem>>, %arg17: memref<1x64xf32, #tpu.memory_space<vmem>>, %arg18: memref<64x18xbf16, #tpu.memory_space<vmem>>, %arg19: memref<1x18xf32, #tpu.memory_space<vmem>>, %arg20: memref<9x16xbf16, #tpu.memory_space<vmem>>, %arg21: memref<9x16xbf16, #tpu.memory_space<vmem>>, %arg22: memref<1x32xf32, #tpu.memory_space<vmem>>, %arg23: memref<2x32xf32, #tpu.memory_space<vmem>>, %arg24: memref<32x64xf32, #tpu.memory_space<vmem>>, %arg25: memref<2x44xf32, #tpu.memory_space<vmem>>) attributes {dimension_semantics = [#tpu.dimension_semantics<arbitrary>], iteration_bounds = array<i64: 1>, scalar_prefetch = 1 : i64, scratch_operands = 2 : i64, tpu.core_type = #tpu.core_type<tc>, window_params = [{pipeline_mode = #tpu.pipeline_mode<synchronous>, transform_indices = @transform_0, window_bounds = array<i64: 16, 224>}, {pipeline_mode = #tpu.pipeline_mode<synchronous>, transform_indices = @transform_1, window_bounds = array<i64: 224, 64>}, {pipeline_mode = #tpu.pipeline_mode<synchronous>, transform_indices = @transform_2, window_bounds = array<i64: 1, 64>}, {pipeline_mode = #tpu.pipeline_mode<synchronous>, transform_indices = @transform_3, window_bounds = array<i64: 1, 64>}, {pipeline_mode = #tpu.pipeline_mode<synchronous>, transform_indices = @transform_4, window_bounds = array<i64: 1, 64>}, {pipeline_mode = #tpu.pipeline_mode<synchronous>, transform_indices = @transform_5, window_bounds = array<i64: 2, 7, 64>}, {pipeline_mode = #tpu.pipeline_mode<synchronous>, transform_indices = @transform_6, window_bounds = array<i64: 2, 1, 64>}, {pipeline_mode = #tpu.pipeline_mode<synchronous>, transform_indices = @transform_7, window_bounds = array<i64: 2, 1, 64>}, {pipeline_mode = #tpu.pipeline_mode<synchronous>, transform_indices = @transform_8, window_bounds = array<i64: 2, 1, 64>}, {pipeline_mode = #tpu.pipeline_mode<synchronous>, transform_indices = @transform_9, window_bounds = array<i64: 2, 64, 128>}, {pipeline_mode = #tpu.pipeline_mode<synchronous>, transform_indices = @transform_10, window_bounds = array<i64: 2, 1, 128>}, {pipeline_mode = #tpu.pipeline_mode<synchronous>, transform_indices = @transform_11, window_bounds = array<i64: 2, 128, 64>}, {pipeline_mode = #tpu.pipeline_mode<synchronous>, transform_indices = @transform_12, window_bounds = array<i64: 2, 1, 64>}, {pipeline_mode = #tpu.pipeline_mode<synchronous>, transform_indices = @transform_13, window_bounds = array<i64: 2, 1, 64>}, {pipeline_mode = #tpu.pipeline_mode<synchronous>, transform_indices = @transform_14, window_bounds = array<i64: 1, 64>}, {pipeline_mode = #tpu.pipeline_mode<synchronous>, transform_indices = @transform_15, window_bounds = array<i64: 1, 64>}, {pipeline_mode = #tpu.pipeline_mode<synchronous>, transform_indices = @transform_16, window_bounds = array<i64: 64, 18>}, {pipeline_mode = #tpu.pipeline_mode<synchronous>, transform_indices = @transform_17, window_bounds = array<i64: 1, 18>}, {pipeline_mode = #tpu.pipeline_mode<synchronous>, transform_indices = @transform_18, window_bounds = array<i64: 9, 16>}, {pipeline_mode = #tpu.pipeline_mode<synchronous>, transform_indices = @transform_19, window_bounds = array<i64: 9, 16>}, {pipeline_mode = #tpu.pipeline_mode<synchronous>, transform_indices = @transform_20, window_bounds = array<i64: 1, 32>}, {pipeline_mode = #tpu.pipeline_mode<synchronous>, transform_indices = @transform_21, window_bounds = array<i64: 2, 32>}]} {
    %c0 = arith.constant 0 : index
    %c0_0 = arith.constant 0 : index
    %0 = vector.load %arg2[%c0, %c0_0] : memref<16x224xbf16, #tpu.memory_space<vmem>>, vector<16x224xbf16>
    %c0_1 = arith.constant 0 : index
    %c0_2 = arith.constant 0 : index
    %1 = vector.load %arg3[%c0_1, %c0_2] : memref<224x64xbf16, #tpu.memory_space<vmem>>, vector<224x64xbf16>
    %cst = arith.constant dense<0.000000e+00> : vector<16x64xf32>
    %2 = tpu.matmul %0, %1, %cst {dimension_numbers = #tpu.dot_dimension_numbers<[1], [0], [0], [1], [0, 0, 1, 1], [], []>} : vector<16x224xbf16>, vector<224x64xbf16>, vector<16x64xf32> -> vector<16x64xf32>
    %c0_3 = arith.constant 0 : index
    %c0_4 = arith.constant 0 : index
    %3 = vector.load %arg4[%c0_3, %c0_4] : memref<1x64xf32, #tpu.memory_space<vmem>>, vector<1x64xf32>
    %4 = vector.broadcast %3 : vector<1x64xf32> to vector<16x64xf32>
    %5 = arith.addf %2, %4 : vector<16x64xf32>
    %c0_5 = arith.constant 0 : index
    %c0_6 = arith.constant 0 : index
    %6 = vector.load %arg5[%c0_5, %c0_6] : memref<1x64xf32, #tpu.memory_space<vmem>>, vector<1x64xf32>
    %c0_7 = arith.constant 0 : index
    %c0_8 = arith.constant 0 : index
    %7 = vector.load %arg6[%c0_7, %c0_8] : memref<1x64xf32, #tpu.memory_space<vmem>>, vector<1x64xf32>
    %cst_9 = arith.constant dense<0.000000e+00> : vector<16xf32>
    %8 = vector.multi_reduction <add>, %5, %cst_9 [1] : vector<16x64xf32> to vector<16xf32>
    %9 = vector.shape_cast %8 : vector<16xf32> to vector<16x1xf32>
    %cst_10 = arith.constant 6.400000e+01 : f32
    %10 = vector.broadcast %cst_10 : f32 to vector<16x1xf32>
    %11 = arith.divf %9, %10 : vector<16x1xf32>
    %12 = vector.broadcast %11 : vector<16x1xf32> to vector<16x64xf32>
    %13 = arith.subf %5, %12 : vector<16x64xf32>
    %14 = arith.mulf %13, %13 : vector<16x64xf32>
    %cst_11 = arith.constant dense<0.000000e+00> : vector<16xf32>
    %15 = vector.multi_reduction <add>, %14, %cst_11 [1] : vector<16x64xf32> to vector<16xf32>
    %16 = vector.shape_cast %15 : vector<16xf32> to vector<16x1xf32>
    %cst_12 = arith.constant 6.400000e+01 : f32
    %17 = vector.broadcast %cst_12 : f32 to vector<16x1xf32>
    %18 = arith.divf %16, %17 : vector<16x1xf32>
    %19 = vector.broadcast %11 : vector<16x1xf32> to vector<16x64xf32>
    %20 = arith.subf %5, %19 : vector<16x64xf32>
    %cst_13 = arith.constant 9.99999997E-7 : f32
    %21 = vector.broadcast %cst_13 : f32 to vector<16x1xf32>
    %22 = arith.addf %18, %21 : vector<16x1xf32>
    %23 = math.rsqrt %22 : vector<16x1xf32>
    %24 = vector.broadcast %23 : vector<16x1xf32> to vector<16x64xf32>
    %25 = arith.mulf %20, %24 : vector<16x64xf32>
    %26 = vector.broadcast %6 : vector<1x64xf32> to vector<16x64xf32>
    %27 = arith.mulf %25, %26 : vector<16x64xf32>
    %28 = vector.broadcast %7 : vector<1x64xf32> to vector<16x64xf32>
    %29 = arith.addf %27, %28 : vector<16x64xf32>
    %30 = tpu.iota {dimensions = array<i32: 0>} : vector<16x64xi32>
    %c7_i32 = arith.constant 7 : i32
    %31 = vector.broadcast %c7_i32 : i32 to vector<16x64xi32>
    %32 = arith.andi %30, %31 : vector<16x64xi32>
    %c3_i32 = arith.constant 3 : i32
    %33 = vector.broadcast %c3_i32 : i32 to vector<16x64xi32>
    %34 = arith.cmpi sge, %32, %33 : vector<16x64xi32>
    %c11_i32 = arith.constant 11 : i32
    %35 = vector.broadcast %c11_i32 : i32 to vector<16x64xi32>
    %36 = arith.cmpi slt, %32, %35 : vector<16x64xi32>
    %37 = arith.andi %34, %36 : vector<16x64xi1>
    %c2_i32 = arith.constant 2 : i32
    %38 = vector.broadcast %c2_i32 : i32 to vector<16x64xi32>
    %39 = arith.cmpi sge, %32, %38 : vector<16x64xi32>
    %c10_i32 = arith.constant 10 : i32
    %40 = vector.broadcast %c10_i32 : i32 to vector<16x64xi32>
    %41 = arith.cmpi slt, %32, %40 : vector<16x64xi32>
    %42 = arith.andi %39, %41 : vector<16x64xi1>
    %c1_i32 = arith.constant 1 : i32
    %43 = vector.broadcast %c1_i32 : i32 to vector<16x64xi32>
    %44 = arith.cmpi sge, %32, %43 : vector<16x64xi32>
    %c9_i32 = arith.constant 9 : i32
    %45 = vector.broadcast %c9_i32 : i32 to vector<16x64xi32>
    %46 = arith.cmpi slt, %32, %45 : vector<16x64xi32>
    %47 = arith.andi %44, %46 : vector<16x64xi1>
    %c-1_i32 = arith.constant -1 : i32
    %48 = vector.broadcast %c-1_i32 : i32 to vector<16x64xi32>
    %49 = arith.cmpi sge, %32, %48 : vector<16x64xi32>
    %c7_i32_14 = arith.constant 7 : i32
    %50 = vector.broadcast %c7_i32_14 : i32 to vector<16x64xi32>
    %51 = arith.cmpi slt, %32, %50 : vector<16x64xi32>
    %52 = arith.andi %49, %51 : vector<16x64xi1>
    %c-2_i32 = arith.constant -2 : i32
    %53 = vector.broadcast %c-2_i32 : i32 to vector<16x64xi32>
    %54 = arith.cmpi sge, %32, %53 : vector<16x64xi32>
    %c6_i32 = arith.constant 6 : i32
    %55 = vector.broadcast %c6_i32 : i32 to vector<16x64xi32>
    %56 = arith.cmpi slt, %32, %55 : vector<16x64xi32>
    %57 = arith.andi %54, %56 : vector<16x64xi1>
    %c-3_i32 = arith.constant -3 : i32
    %58 = vector.broadcast %c-3_i32 : i32 to vector<16x64xi32>
    %59 = arith.cmpi sge, %32, %58 : vector<16x64xi32>
    %c5_i32 = arith.constant 5 : i32
    %60 = vector.broadcast %c5_i32 : i32 to vector<16x64xi32>
    %61 = arith.cmpi slt, %32, %60 : vector<16x64xi32>
    %62 = arith.andi %59, %61 : vector<16x64xi1>
    %c8 = arith.constant 8 : index
    %c0_15 = arith.constant 0 : index
    %63 = vector.load %arg24[%c8, %c0_15] : memref<32x64xf32, #tpu.memory_space<vmem>>, vector<16x64xf32>
    tpu.vector_store %arg24[%c8, %c0_15], %29 {strides = array<i32>} : memref<32x64xf32, #tpu.memory_space<vmem>>, vector<16x64xf32>,
    %c0_16 = arith.constant 0 : index
    %c0_17 = arith.constant 0 : index
    %c0_18 = arith.constant 0 : index
    %64 = vector.load %arg7[%c0_16, %c0_17, %c0_18] : memref<2x7x64xf32, #tpu.memory_space<vmem>>, vector<1x7x64xf32>
    %65 = vector.shape_cast %64 : vector<1x7x64xf32> to vector<7x64xf32>
    %cst_19 = arith.constant 0.000000e+00 : f32
    %66 = vector.broadcast %cst_19 : f32 to vector<16x64xf32>
    %c5 = arith.constant 5 : index
    %c0_20 = arith.constant 0 : index
    %67 = vector.load %arg24[%c5, %c0_20] : memref<32x64xf32, #tpu.memory_space<vmem>>, vector<16x64xf32>
    %cst_21 = arith.constant 0.000000e+00 : f32
    %68 = vector.broadcast %cst_21 : f32 to vector<16x64xf32>
    %69 = arith.select %37, %67, %68 : vector<16x64xi1>, vector<16x64xf32>
    %70 = vector.extract_strided_slice %65 {offsets = [0, 0], sizes = [1, 64], strides = [1, 1]} : vector<7x64xf32> to vector<1x64xf32>
    %71 = vector.broadcast %70 : vector<1x64xf32> to vector<16x64xf32>
    %72 = arith.mulf %69, %71 : vector<16x64xf32>
    %73 = arith.addf %66, %72 : vector<16x64xf32>
    %c6 = arith.constant 6 : index
    %c0_22 = arith.constant 0 : index
    %74 = vector.load %arg24[%c6, %c0_22] : memref<32x64xf32, #tpu.memory_space<vmem>>, vector<16x64xf32>
    %cst_23 = arith.constant 0.000000e+00 : f32
    %75 = vector.broadcast %cst_23 : f32 to vector<16x64xf32>
    %76 = arith.select %42, %74, %75 : vector<16x64xi1>, vector<16x64xf32>
    %77 = vector.extract_strided_slice %65 {offsets = [1, 0], sizes = [1, 64], strides = [1, 1]} : vector<7x64xf32> to vector<1x64xf32>
    %78 = vector.broadcast %77 : vector<1x64xf32> to vector<16x64xf32>
    %79 = arith.mulf %76, %78 : vector<16x64xf32>
    %80 = arith.addf %73, %79 : vector<16x64xf32>
    %c7 = arith.constant 7 : index
    %c0_24 = arith.constant 0 : index
    %81 = vector.load %arg24[%c7, %c0_24] : memref<32x64xf32, #tpu.memory_space<vmem>>, vector<16x64xf32>
    %cst_25 = arith.constant 0.000000e+00 : f32
    %82 = vector.broadcast %cst_25 : f32 to vector<16x64xf32>
    %83 = arith.select %47, %81, %82 : vector<16x64xi1>, vector<16x64xf32>
    %84 = vector.extract_strided_slice %65 {offsets = [2, 0], sizes = [1, 64], strides = [1, 1]} : vector<7x64xf32> to vector<1x64xf32>
    %85 = vector.broadcast %84 : vector<1x64xf32> to vector<16x64xf32>
    %86 = arith.mulf %83, %85 : vector<16x64xf32>
    %87 = arith.addf %80, %86 : vector<16x64xf32>
    %c8_26 = arith.constant 8 : index
    %c0_27 = arith.constant 0 : index
    %88 = vector.load %arg24[%c8_26, %c0_27] : memref<32x64xf32, #tpu.memory_space<vmem>>, vector<16x64xf32>
    %89 = vector.extract_strided_slice %65 {offsets = [3, 0], sizes = [1, 64], strides = [1, 1]} : vector<7x64xf32> to vector<1x64xf32>
    %90 = vector.broadcast %89 : vector<1x64xf32> to vector<16x64xf32>
    %91 = arith.mulf %88, %90 : vector<16x64xf32>
    %92 = arith.addf %87, %91 : vector<16x64xf32>
    %c9 = arith.constant 9 : index
    %c0_28 = arith.constant 0 : index
    %93 = vector.load %arg24[%c9, %c0_28] : memref<32x64xf32, #tpu.memory_space<vmem>>, vector<16x64xf32>
    %cst_29 = arith.constant 0.000000e+00 : f32
    %94 = vector.broadcast %cst_29 : f32 to vector<16x64xf32>
    %95 = arith.select %52, %93, %94 : vector<16x64xi1>, vector<16x64xf32>
    %96 = vector.extract_strided_slice %65 {offsets = [4, 0], sizes = [1, 64], strides = [1, 1]} : vector<7x64xf32> to vector<1x64xf32>
    %97 = vector.broadcast %96 : vector<1x64xf32> to vector<16x64xf32>
    %98 = arith.mulf %95, %97 : vector<16x64xf32>
    %99 = arith.addf %92, %98 : vector<16x64xf32>
    %c10 = arith.constant 10 : index
    %c0_30 = arith.constant 0 : index
    %100 = vector.load %arg24[%c10, %c0_30] : memref<32x64xf32, #tpu.memory_space<vmem>>, vector<16x64xf32>
    %cst_31 = arith.constant 0.000000e+00 : f32
    %101 = vector.broadcast %cst_31 : f32 to vector<16x64xf32>
    %102 = arith.select %57, %100, %101 : vector<16x64xi1>, vector<16x64xf32>
    %103 = vector.extract_strided_slice %65 {offsets = [5, 0], sizes = [1, 64], strides = [1, 1]} : vector<7x64xf32> to vector<1x64xf32>
    %104 = vector.broadcast %103 : vector<1x64xf32> to vector<16x64xf32>
    %105 = arith.mulf %102, %104 : vector<16x64xf32>
    %106 = arith.addf %99, %105 : vector<16x64xf32>
    %c11 = arith.constant 11 : index
    %c0_32 = arith.constant 0 : index
    %107 = vector.load %arg24[%c11, %c0_32] : memref<32x64xf32, #tpu.memory_space<vmem>>, vector<16x64xf32>
    %cst_33 = arith.constant 0.000000e+00 : f32
    %108 = vector.broadcast %cst_33 : f32 to vector<16x64xf32>
    %109 = arith.select %62, %107, %108 : vector<16x64xi1>, vector<16x64xf32>
    %110 = vector.extract_strided_slice %65 {offsets = [6, 0], sizes = [1, 64], strides = [1, 1]} : vector<7x64xf32> to vector<1x64xf32>
    %111 = vector.broadcast %110 : vector<1x64xf32> to vector<16x64xf32>
    %112 = arith.mulf %109, %111 : vector<16x64xf32>
    %113 = arith.addf %106, %112 : vector<16x64xf32>
    %c0_34 = arith.constant 0 : index
    %c0_35 = arith.constant 0 : index
    %c0_36 = arith.constant 0 : index
    %114 = vector.load %arg8[%c0_34, %c0_35, %c0_36] : memref<2x1x64xf32, #tpu.memory_space<vmem>>, vector<1x1x64xf32>
    %115 = vector.shape_cast %114 : vector<1x1x64xf32> to vector<1x64xf32>
    %116 = vector.broadcast %115 : vector<1x64xf32> to vector<16x64xf32>
    %117 = arith.addf %113, %116 : vector<16x64xf32>
    %c0_37 = arith.constant 0 : index
    %c0_38 = arith.constant 0 : index
    %c0_39 = arith.constant 0 : index
    %118 = vector.load %arg9[%c0_37, %c0_38, %c0_39] : memref<2x1x64xf32, #tpu.memory_space<vmem>>, vector<1x1x64xf32>
    %119 = vector.shape_cast %118 : vector<1x1x64xf32> to vector<1x64xf32>
    %c0_40 = arith.constant 0 : index
    %c0_41 = arith.constant 0 : index
    %c0_42 = arith.constant 0 : index
    %120 = vector.load %arg10[%c0_40, %c0_41, %c0_42] : memref<2x1x64xf32, #tpu.memory_space<vmem>>, vector<1x1x64xf32>
    %121 = vector.shape_cast %120 : vector<1x1x64xf32> to vector<1x64xf32>
    %cst_43 = arith.constant dense<0.000000e+00> : vector<16xf32>
    %122 = vector.multi_reduction <add>, %117, %cst_43 [1] : vector<16x64xf32> to vector<16xf32>
    %123 = vector.shape_cast %122 : vector<16xf32> to vector<16x1xf32>
    %cst_44 = arith.constant 6.400000e+01 : f32
    %124 = vector.broadcast %cst_44 : f32 to vector<16x1xf32>
    %125 = arith.divf %123, %124 : vector<16x1xf32>
    %126 = vector.broadcast %125 : vector<16x1xf32> to vector<16x64xf32>
    %127 = arith.subf %117, %126 : vector<16x64xf32>
    %128 = arith.mulf %127, %127 : vector<16x64xf32>
    %cst_45 = arith.constant dense<0.000000e+00> : vector<16xf32>
    %129 = vector.multi_reduction <add>, %128, %cst_45 [1] : vector<16x64xf32> to vector<16xf32>
    %130 = vector.shape_cast %129 : vector<16xf32> to vector<16x1xf32>
    %cst_46 = arith.constant 6.400000e+01 : f32
    %131 = vector.broadcast %cst_46 : f32 to vector<16x1xf32>
    %132 = arith.divf %130, %131 : vector<16x1xf32>
    %133 = vector.broadcast %125 : vector<16x1xf32> to vector<16x64xf32>
    %134 = arith.subf %117, %133 : vector<16x64xf32>
    %cst_47 = arith.constant 9.99999997E-7 : f32
    %135 = vector.broadcast %cst_47 : f32 to vector<16x1xf32>
    %136 = arith.addf %132, %135 : vector<16x1xf32>
    %137 = math.rsqrt %136 : vector<16x1xf32>
    %138 = vector.broadcast %137 : vector<16x1xf32> to vector<16x64xf32>
    %139 = arith.mulf %134, %138 : vector<16x64xf32>
    %140 = vector.broadcast %119 : vector<1x64xf32> to vector<16x64xf32>
    %141 = arith.mulf %139, %140 : vector<16x64xf32>
    %142 = vector.broadcast %121 : vector<1x64xf32> to vector<16x64xf32>
    %143 = arith.addf %141, %142 : vector<16x64xf32>
    %144 = arith.truncf %143 : vector<16x64xf32> to vector<16x64xbf16>
    %c0_48 = arith.constant 0 : index
    %c0_49 = arith.constant 0 : index
    %c0_50 = arith.constant 0 : index
    %145 = vector.load %arg11[%c0_48, %c0_49, %c0_50] : memref<2x64x128xbf16, #tpu.memory_space<vmem>>, vector<1x64x128xbf16>
    %146 = vector.shape_cast %145 : vector<1x64x128xbf16> to vector<64x128xbf16>
    %cst_51 = arith.constant dense<0.000000e+00> : vector<16x128xf32>
    %147 = tpu.matmul %144, %146, %cst_51 {dimension_numbers = #tpu.dot_dimension_numbers<[1], [0], [0], [1], [0, 0, 1, 1], [], []>} : vector<16x64xbf16>, vector<64x128xbf16>, vector<16x128xf32> -> vector<16x128xf32>
    %c0_52 = arith.constant 0 : index
    %c0_53 = arith.constant 0 : index
    %c0_54 = arith.constant 0 : index
    %148 = vector.load %arg12[%c0_52, %c0_53, %c0_54] : memref<2x1x128xf32, #tpu.memory_space<vmem>>, vector<1x1x128xf32>
    %149 = vector.shape_cast %148 : vector<1x1x128xf32> to vector<1x128xf32>
    %150 = vector.broadcast %149 : vector<1x128xf32> to vector<16x128xf32>
    %151 = arith.addf %147, %150 : vector<16x128xf32>
    %152 = arith.mulf %151, %151 : vector<16x128xf32>
    %153 = arith.mulf %151, %152 : vector<16x128xf32>
    %cst_55 = arith.constant 4.471500e-02 : f32
    %154 = vector.broadcast %cst_55 : f32 to vector<16x128xf32>
    %155 = arith.mulf %154, %153 : vector<16x128xf32>
    %156 = arith.addf %151, %155 : vector<16x128xf32>
    %cst_56 = arith.constant 0.797884583 : f32
    %157 = vector.broadcast %cst_56 : f32 to vector<16x128xf32>
    %158 = arith.mulf %157, %156 : vector<16x128xf32>
    %159 = math.tanh %158 : vector<16x128xf32>
    %cst_57 = arith.constant 1.000000e+00 : f32
    %160 = vector.broadcast %cst_57 : f32 to vector<16x128xf32>
    %161 = arith.addf %160, %159 : vector<16x128xf32>
    %cst_58 = arith.constant 5.000000e-01 : f32
    %162 = vector.broadcast %cst_58 : f32 to vector<16x128xf32>
    %163 = arith.mulf %162, %161 : vector<16x128xf32>
    %164 = arith.mulf %151, %163 : vector<16x128xf32>
    %165 = arith.truncf %164 : vector<16x128xf32> to vector<16x128xbf16>
    %c0_59 = arith.constant 0 : index
    %c0_60 = arith.constant 0 : index
    %c0_61 = arith.constant 0 : index
    %166 = vector.load %arg13[%c0_59, %c0_60, %c0_61] : memref<2x128x64xbf16, #tpu.memory_space<vmem>>, vector<1x128x64xbf16>
    %167 = vector.shape_cast %166 : vector<1x128x64xbf16> to vector<128x64xbf16>
    %cst_62 = arith.constant dense<0.000000e+00> : vector<16x64xf32>
    %168 = tpu.matmul %165, %167, %cst_62 {dimension_numbers = #tpu.dot_dimension_numbers<[1], [0], [0], [1], [0, 0, 1, 1], [], []>} : vector<16x128xbf16>, vector<128x64xbf16>, vector<16x64xf32> -> vector<16x64xf32>
    %c0_63 = arith.constant 0 : index
    %c0_64 = arith.constant 0 : index
    %c0_65 = arith.constant 0 : index
    %169 = vector.load %arg14[%c0_63, %c0_64, %c0_65] : memref<2x1x64xf32, #tpu.memory_space<vmem>>, vector<1x1x64xf32>
    %170 = vector.shape_cast %169 : vector<1x1x64xf32> to vector<1x64xf32>
    %171 = vector.broadcast %170 : vector<1x64xf32> to vector<16x64xf32>
    %172 = arith.addf %168, %171 : vector<16x64xf32>
    %c0_66 = arith.constant 0 : index
    %c0_67 = arith.constant 0 : index
    %c0_68 = arith.constant 0 : index
    %173 = vector.load %arg15[%c0_66, %c0_67, %c0_68] : memref<2x1x64xf32, #tpu.memory_space<vmem>>, vector<1x1x64xf32>
    %174 = vector.shape_cast %173 : vector<1x1x64xf32> to vector<1x64xf32>
    %175 = vector.broadcast %174 : vector<1x64xf32> to vector<16x64xf32>
    %176 = arith.mulf %172, %175 : vector<16x64xf32>
    %177 = arith.addf %29, %176 : vector<16x64xf32>
    %c8_69 = arith.constant 8 : index
    %c0_70 = arith.constant 0 : index
    %178 = vector.load %arg24[%c8_69, %c0_70] : memref<32x64xf32, #tpu.memory_space<vmem>>, vector<16x64xf32>
    tpu.vector_store %arg24[%c8_69, %c0_70], %177 {strides = array<i32>} : memref<32x64xf32, #tpu.memory_space<vmem>>, vector<16x64xf32>,
    %c1 = arith.constant 1 : index
    %c0_71 = arith.constant 0 : index
    %c0_72 = arith.constant 0 : index
    %179 = vector.load %arg7[%c1, %c0_71, %c0_72] : memref<2x7x64xf32, #tpu.memory_space<vmem>>, vector<1x7x64xf32>
    %180 = vector.shape_cast %179 : vector<1x7x64xf32> to vector<7x64xf32>
    %cst_73 = arith.constant 0.000000e+00 : f32
    %181 = vector.broadcast %cst_73 : f32 to vector<16x64xf32>
    %c5_74 = arith.constant 5 : index
    %c0_75 = arith.constant 0 : index
    %182 = vector.load %arg24[%c5_74, %c0_75] : memref<32x64xf32, #tpu.memory_space<vmem>>, vector<16x64xf32>
    %cst_76 = arith.constant 0.000000e+00 : f32
    %183 = vector.broadcast %cst_76 : f32 to vector<16x64xf32>
    %184 = arith.select %37, %182, %183 : vector<16x64xi1>, vector<16x64xf32>
    %185 = vector.extract_strided_slice %180 {offsets = [0, 0], sizes = [1, 64], strides = [1, 1]} : vector<7x64xf32> to vector<1x64xf32>
    %186 = vector.broadcast %185 : vector<1x64xf32> to vector<16x64xf32>
    %187 = arith.mulf %184, %186 : vector<16x64xf32>
    %188 = arith.addf %181, %187 : vector<16x64xf32>
    %c6_77 = arith.constant 6 : index
    %c0_78 = arith.constant 0 : index
    %189 = vector.load %arg24[%c6_77, %c0_78] : memref<32x64xf32, #tpu.memory_space<vmem>>, vector<16x64xf32>
    %cst_79 = arith.constant 0.000000e+00 : f32
    %190 = vector.broadcast %cst_79 : f32 to vector<16x64xf32>
    %191 = arith.select %42, %189, %190 : vector<16x64xi1>, vector<16x64xf32>
    %192 = vector.extract_strided_slice %180 {offsets = [1, 0], sizes = [1, 64], strides = [1, 1]} : vector<7x64xf32> to vector<1x64xf32>
    %193 = vector.broadcast %192 : vector<1x64xf32> to vector<16x64xf32>
    %194 = arith.mulf %191, %193 : vector<16x64xf32>
    %195 = arith.addf %188, %194 : vector<16x64xf32>
    %c7_80 = arith.constant 7 : index
    %c0_81 = arith.constant 0 : index
    %196 = vector.load %arg24[%c7_80, %c0_81] : memref<32x64xf32, #tpu.memory_space<vmem>>, vector<16x64xf32>
    %cst_82 = arith.constant 0.000000e+00 : f32
    %197 = vector.broadcast %cst_82 : f32 to vector<16x64xf32>
    %198 = arith.select %47, %196, %197 : vector<16x64xi1>, vector<16x64xf32>
    %199 = vector.extract_strided_slice %180 {offsets = [2, 0], sizes = [1, 64], strides = [1, 1]} : vector<7x64xf32> to vector<1x64xf32>
    %200 = vector.broadcast %199 : vector<1x64xf32> to vector<16x64xf32>
    %201 = arith.mulf %198, %200 : vector<16x64xf32>
    %202 = arith.addf %195, %201 : vector<16x64xf32>
    %c8_83 = arith.constant 8 : index
    %c0_84 = arith.constant 0 : index
    %203 = vector.load %arg24[%c8_83, %c0_84] : memref<32x64xf32, #tpu.memory_space<vmem>>, vector<16x64xf32>
    %204 = vector.extract_strided_slice %180 {offsets = [3, 0], sizes = [1, 64], strides = [1, 1]} : vector<7x64xf32> to vector<1x64xf32>
    %205 = vector.broadcast %204 : vector<1x64xf32> to vector<16x64xf32>
    %206 = arith.mulf %203, %205 : vector<16x64xf32>
    %207 = arith.addf %202, %206 : vector<16x64xf32>
    %c9_85 = arith.constant 9 : index
    %c0_86 = arith.constant 0 : index
    %208 = vector.load %arg24[%c9_85, %c0_86] : memref<32x64xf32, #tpu.memory_space<vmem>>, vector<16x64xf32>
    %cst_87 = arith.constant 0.000000e+00 : f32
    %209 = vector.broadcast %cst_87 : f32 to vector<16x64xf32>
    %210 = arith.select %52, %208, %209 : vector<16x64xi1>, vector<16x64xf32>
    %211 = vector.extract_strided_slice %180 {offsets = [4, 0], sizes = [1, 64], strides = [1, 1]} : vector<7x64xf32> to vector<1x64xf32>
    %212 = vector.broadcast %211 : vector<1x64xf32> to vector<16x64xf32>
    %213 = arith.mulf %210, %212 : vector<16x64xf32>
    %214 = arith.addf %207, %213 : vector<16x64xf32>
    %c10_88 = arith.constant 10 : index
    %c0_89 = arith.constant 0 : index
    %215 = vector.load %arg24[%c10_88, %c0_89] : memref<32x64xf32, #tpu.memory_space<vmem>>, vector<16x64xf32>
    %cst_90 = arith.constant 0.000000e+00 : f32
    %216 = vector.broadcast %cst_90 : f32 to vector<16x64xf32>
    %217 = arith.select %57, %215, %216 : vector<16x64xi1>, vector<16x64xf32>
    %218 = vector.extract_strided_slice %180 {offsets = [5, 0], sizes = [1, 64], strides = [1, 1]} : vector<7x64xf32> to vector<1x64xf32>
    %219 = vector.broadcast %218 : vector<1x64xf32> to vector<16x64xf32>
    %220 = arith.mulf %217, %219 : vector<16x64xf32>
    %221 = arith.addf %214, %220 : vector<16x64xf32>
    %c11_91 = arith.constant 11 : index
    %c0_92 = arith.constant 0 : index
    %222 = vector.load %arg24[%c11_91, %c0_92] : memref<32x64xf32, #tpu.memory_space<vmem>>, vector<16x64xf32>
    %cst_93 = arith.constant 0.000000e+00 : f32
    %223 = vector.broadcast %cst_93 : f32 to vector<16x64xf32>
    %224 = arith.select %62, %222, %223 : vector<16x64xi1>, vector<16x64xf32>
    %225 = vector.extract_strided_slice %180 {offsets = [6, 0], sizes = [1, 64], strides = [1, 1]} : vector<7x64xf32> to vector<1x64xf32>
    %226 = vector.broadcast %225 : vector<1x64xf32> to vector<16x64xf32>
    %227 = arith.mulf %224, %226 : vector<16x64xf32>
    %228 = arith.addf %221, %227 : vector<16x64xf32>
    %c1_94 = arith.constant 1 : index
    %c0_95 = arith.constant 0 : index
    %c0_96 = arith.constant 0 : index
    %229 = vector.load %arg8[%c1_94, %c0_95, %c0_96] : memref<2x1x64xf32, #tpu.memory_space<vmem>>, vector<1x1x64xf32>
    %230 = vector.shape_cast %229 : vector<1x1x64xf32> to vector<1x64xf32>
    %231 = vector.broadcast %230 : vector<1x64xf32> to vector<16x64xf32>
    %232 = arith.addf %228, %231 : vector<16x64xf32>
    %c1_97 = arith.constant 1 : index
    %c0_98 = arith.constant 0 : index
    %c0_99 = arith.constant 0 : index
    %233 = vector.load %arg9[%c1_97, %c0_98, %c0_99] : memref<2x1x64xf32, #tpu.memory_space<vmem>>, vector<1x1x64xf32>
    %234 = vector.shape_cast %233 : vector<1x1x64xf32> to vector<1x64xf32>
    %c1_100 = arith.constant 1 : index
    %c0_101 = arith.constant 0 : index
    %c0_102 = arith.constant 0 : index
    %235 = vector.load %arg10[%c1_100, %c0_101, %c0_102] : memref<2x1x64xf32, #tpu.memory_space<vmem>>, vector<1x1x64xf32>
    %236 = vector.shape_cast %235 : vector<1x1x64xf32> to vector<1x64xf32>
    %cst_103 = arith.constant dense<0.000000e+00> : vector<16xf32>
    %237 = vector.multi_reduction <add>, %232, %cst_103 [1] : vector<16x64xf32> to vector<16xf32>
    %238 = vector.shape_cast %237 : vector<16xf32> to vector<16x1xf32>
    %cst_104 = arith.constant 6.400000e+01 : f32
    %239 = vector.broadcast %cst_104 : f32 to vector<16x1xf32>
    %240 = arith.divf %238, %239 : vector<16x1xf32>
    %241 = vector.broadcast %240 : vector<16x1xf32> to vector<16x64xf32>
    %242 = arith.subf %232, %241 : vector<16x64xf32>
    %243 = arith.mulf %242, %242 : vector<16x64xf32>
    %cst_105 = arith.constant dense<0.000000e+00> : vector<16xf32>
    %244 = vector.multi_reduction <add>, %243, %cst_105 [1] : vector<16x64xf32> to vector<16xf32>
    %245 = vector.shape_cast %244 : vector<16xf32> to vector<16x1xf32>
    %cst_106 = arith.constant 6.400000e+01 : f32
    %246 = vector.broadcast %cst_106 : f32 to vector<16x1xf32>
    %247 = arith.divf %245, %246 : vector<16x1xf32>
    %248 = vector.broadcast %240 : vector<16x1xf32> to vector<16x64xf32>
    %249 = arith.subf %232, %248 : vector<16x64xf32>
    %cst_107 = arith.constant 9.99999997E-7 : f32
    %250 = vector.broadcast %cst_107 : f32 to vector<16x1xf32>
    %251 = arith.addf %247, %250 : vector<16x1xf32>
    %252 = math.rsqrt %251 : vector<16x1xf32>
    %253 = vector.broadcast %252 : vector<16x1xf32> to vector<16x64xf32>
    %254 = arith.mulf %249, %253 : vector<16x64xf32>
    %255 = vector.broadcast %234 : vector<1x64xf32> to vector<16x64xf32>
    %256 = arith.mulf %254, %255 : vector<16x64xf32>
    %257 = vector.broadcast %236 : vector<1x64xf32> to vector<16x64xf32>
    %258 = arith.addf %256, %257 : vector<16x64xf32>
    %259 = arith.truncf %258 : vector<16x64xf32> to vector<16x64xbf16>
    %c1_108 = arith.constant 1 : index
    %c0_109 = arith.constant 0 : index
    %c0_110 = arith.constant 0 : index
    %260 = vector.load %arg11[%c1_108, %c0_109, %c0_110] : memref<2x64x128xbf16, #tpu.memory_space<vmem>>, vector<1x64x128xbf16>
    %261 = vector.shape_cast %260 : vector<1x64x128xbf16> to vector<64x128xbf16>
    %cst_111 = arith.constant dense<0.000000e+00> : vector<16x128xf32>
    %262 = tpu.matmul %259, %261, %cst_111 {dimension_numbers = #tpu.dot_dimension_numbers<[1], [0], [0], [1], [0, 0, 1, 1], [], []>} : vector<16x64xbf16>, vector<64x128xbf16>, vector<16x128xf32> -> vector<16x128xf32>
    %c1_112 = arith.constant 1 : index
    %c0_113 = arith.constant 0 : index
    %c0_114 = arith.constant 0 : index
    %263 = vector.load %arg12[%c1_112, %c0_113, %c0_114] : memref<2x1x128xf32, #tpu.memory_space<vmem>>, vector<1x1x128xf32>
    %264 = vector.shape_cast %263 : vector<1x1x128xf32> to vector<1x128xf32>
    %265 = vector.broadcast %264 : vector<1x128xf32> to vector<16x128xf32>
    %266 = arith.addf %262, %265 : vector<16x128xf32>
    %267 = arith.mulf %266, %266 : vector<16x128xf32>
    %268 = arith.mulf %266, %267 : vector<16x128xf32>
    %cst_115 = arith.constant 4.471500e-02 : f32
    %269 = vector.broadcast %cst_115 : f32 to vector<16x128xf32>
    %270 = arith.mulf %269, %268 : vector<16x128xf32>
    %271 = arith.addf %266, %270 : vector<16x128xf32>
    %cst_116 = arith.constant 0.797884583 : f32
    %272 = vector.broadcast %cst_116 : f32 to vector<16x128xf32>
    %273 = arith.mulf %272, %271 : vector<16x128xf32>
    %274 = math.tanh %273 : vector<16x128xf32>
    %cst_117 = arith.constant 1.000000e+00 : f32
    %275 = vector.broadcast %cst_117 : f32 to vector<16x128xf32>
    %276 = arith.addf %275, %274 : vector<16x128xf32>
    %cst_118 = arith.constant 5.000000e-01 : f32
    %277 = vector.broadcast %cst_118 : f32 to vector<16x128xf32>
    %278 = arith.mulf %277, %276 : vector<16x128xf32>
    %279 = arith.mulf %266, %278 : vector<16x128xf32>
    %280 = arith.truncf %279 : vector<16x128xf32> to vector<16x128xbf16>
    %c1_119 = arith.constant 1 : index
    %c0_120 = arith.constant 0 : index
    %c0_121 = arith.constant 0 : index
    %281 = vector.load %arg13[%c1_119, %c0_120, %c0_121] : memref<2x128x64xbf16, #tpu.memory_space<vmem>>, vector<1x128x64xbf16>
    %282 = vector.shape_cast %281 : vector<1x128x64xbf16> to vector<128x64xbf16>
    %cst_122 = arith.constant dense<0.000000e+00> : vector<16x64xf32>
    %283 = tpu.matmul %280, %282, %cst_122 {dimension_numbers = #tpu.dot_dimension_numbers<[1], [0], [0], [1], [0, 0, 1, 1], [], []>} : vector<16x128xbf16>, vector<128x64xbf16>, vector<16x64xf32> -> vector<16x64xf32>
    %c1_123 = arith.constant 1 : index
    %c0_124 = arith.constant 0 : index
    %c0_125 = arith.constant 0 : index
    %284 = vector.load %arg14[%c1_123, %c0_124, %c0_125] : memref<2x1x64xf32, #tpu.memory_space<vmem>>, vector<1x1x64xf32>
    %285 = vector.shape_cast %284 : vector<1x1x64xf32> to vector<1x64xf32>
    %286 = vector.broadcast %285 : vector<1x64xf32> to vector<16x64xf32>
    %287 = arith.addf %283, %286 : vector<16x64xf32>
    %c1_126 = arith.constant 1 : index
    %c0_127 = arith.constant 0 : index
    %c0_128 = arith.constant 0 : index
    %288 = vector.load %arg15[%c1_126, %c0_127, %c0_128] : memref<2x1x64xf32, #tpu.memory_space<vmem>>, vector<1x1x64xf32>
    %289 = vector.shape_cast %288 : vector<1x1x64xf32> to vector<1x64xf32>
    %290 = vector.broadcast %289 : vector<1x64xf32> to vector<16x64xf32>
    %291 = arith.mulf %287, %290 : vector<16x64xf32>
    %292 = arith.addf %177, %291 : vector<16x64xf32>
    %c0_129 = arith.constant 0 : index
    %c0_130 = arith.constant 0 : index
    %293 = vector.load %arg16[%c0_129, %c0_130] : memref<1x64xf32, #tpu.memory_space<vmem>>, vector<1x64xf32>
    %c0_131 = arith.constant 0 : index
    %c0_132 = arith.constant 0 : index
    %294 = vector.load %arg17[%c0_131, %c0_132] : memref<1x64xf32, #tpu.memory_space<vmem>>, vector<1x64xf32>
    %cst_133 = arith.constant dense<0.000000e+00> : vector<16xf32>
    %295 = vector.multi_reduction <add>, %292, %cst_133 [1] : vector<16x64xf32> to vector<16xf32>
    %296 = vector.shape_cast %295 : vector<16xf32> to vector<16x1xf32>
    %cst_134 = arith.constant 6.400000e+01 : f32
    %297 = vector.broadcast %cst_134 : f32 to vector<16x1xf32>
    %298 = arith.divf %296, %297 : vector<16x1xf32>
    %299 = vector.broadcast %298 : vector<16x1xf32> to vector<16x64xf32>
    %300 = arith.subf %292, %299 : vector<16x64xf32>
    %301 = arith.mulf %300, %300 : vector<16x64xf32>
    %cst_135 = arith.constant dense<0.000000e+00> : vector<16xf32>
    %302 = vector.multi_reduction <add>, %301, %cst_135 [1] : vector<16x64xf32> to vector<16xf32>
    %303 = vector.shape_cast %302 : vector<16xf32> to vector<16x1xf32>
    %cst_136 = arith.constant 6.400000e+01 : f32
    %304 = vector.broadcast %cst_136 : f32 to vector<16x1xf32>
    %305 = arith.divf %303, %304 : vector<16x1xf32>
    %306 = vector.broadcast %298 : vector<16x1xf32> to vector<16x64xf32>
    %307 = arith.subf %292, %306 : vector<16x64xf32>
    %cst_137 = arith.constant 9.99999997E-7 : f32
    %308 = vector.broadcast %cst_137 : f32 to vector<16x1xf32>
    %309 = arith.addf %305, %308 : vector<16x1xf32>
    %310 = math.rsqrt %309 : vector<16x1xf32>
    %311 = vector.broadcast %310 : vector<16x1xf32> to vector<16x64xf32>
    %312 = arith.mulf %307, %311 : vector<16x64xf32>
    %313 = vector.broadcast %293 : vector<1x64xf32> to vector<16x64xf32>
    %314 = arith.mulf %312, %313 : vector<16x64xf32>
    %315 = vector.broadcast %294 : vector<1x64xf32> to vector<16x64xf32>
    %316 = arith.addf %314, %315 : vector<16x64xf32>
    %317 = arith.truncf %316 : vector<16x64xf32> to vector<16x64xbf16>
    %c0_138 = arith.constant 0 : index
    %c0_139 = arith.constant 0 : index
    %318 = vector.load %arg18[%c0_138, %c0_139] : memref<64x18xbf16, #tpu.memory_space<vmem>>, vector<64x18xbf16>
    %cst_140 = arith.constant dense<0.000000e+00> : vector<16x18xf32>
    %319 = tpu.matmul %317, %318, %cst_140 {dimension_numbers = #tpu.dot_dimension_numbers<[1], [0], [0], [1], [0, 0, 1, 1], [], []>} : vector<16x64xbf16>, vector<64x18xbf16>, vector<16x18xf32> -> vector<16x18xf32>
    %c0_141 = arith.constant 0 : index
    %c0_142 = arith.constant 0 : index
    %320 = vector.load %arg19[%c0_141, %c0_142] : memref<1x18xf32, #tpu.memory_space<vmem>>, vector<1x18xf32>
    %321 = vector.broadcast %320 : vector<1x18xf32> to vector<16x18xf32>
    %322 = arith.addf %319, %321 : vector<16x18xf32>
    %323 = vector.extract_strided_slice %322 {offsets = [0, 0], sizes = [16, 9], strides = [1, 1]} : vector<16x18xf32> to vector<16x9xf32>
    %324 = math.exp %323 : vector<16x9xf32>
    %cst_143 = arith.constant 1.000000e+02 : f32
    %325 = vector.broadcast %cst_143 : f32 to vector<16x9xf32>
    %326 = arith.minimumf %324, %325 : vector<16x9xf32>
    %327 = vector.extract_strided_slice %322 {offsets = [0, 9], sizes = [16, 9], strides = [1, 1]} : vector<16x18xf32> to vector<16x9xf32>
    %328 = math.cos %327 : vector<16x9xf32>
    %329 = arith.mulf %326, %328 : vector<16x9xf32>
    %cst_144 = arith.constant 1.57079637 : f32
    %330 = vector.broadcast %cst_144 : f32 to vector<16x9xf32>
    %331 = arith.subf %327, %330 : vector<16x9xf32>
    %332 = math.cos %331 : vector<16x9xf32>
    %333 = arith.mulf %326, %332 : vector<16x9xf32>
    %334 = arith.truncf %329 : vector<16x9xf32> to vector<16x9xbf16>
    %c0_145 = arith.constant 0 : index
    %c0_146 = arith.constant 0 : index
    %335 = vector.load %arg20[%c0_145, %c0_146] : memref<9x16xbf16, #tpu.memory_space<vmem>>, vector<9x16xbf16>
    %cst_147 = arith.constant dense<0.000000e+00> : vector<16x16xf32>
    %336 = tpu.matmul %334, %335, %cst_147 {dimension_numbers = #tpu.dot_dimension_numbers<[1], [0], [0], [1], [0, 0, 1, 1], [], []>} : vector<16x9xbf16>, vector<9x16xbf16>, vector<16x16xf32> -> vector<16x16xf32>
    %337 = arith.truncf %333 : vector<16x9xf32> to vector<16x9xbf16>
    %c0_148 = arith.constant 0 : index
    %c0_149 = arith.constant 0 : index
    %338 = vector.load %arg21[%c0_148, %c0_149] : memref<9x16xbf16, #tpu.memory_space<vmem>>, vector<9x16xbf16>
    %cst_150 = arith.constant dense<0.000000e+00> : vector<16x16xf32>
    %339 = tpu.matmul %337, %338, %cst_150 {dimension_numbers = #tpu.dot_dimension_numbers<[1], [0], [0], [1], [0, 0, 1, 1], [], []>} : vector<16x9xbf16>, vector<9x16xbf16>, vector<16x16xf32> -> vector<16x16xf32>
    %340 = arith.addf %336, %339 : vector<16x16xf32>
    %cst_151 = arith.constant 0.000000e+00 : f32
    %341 = vector.broadcast %cst_151 : f32 to vector<2x44xf32>
    %c0_152 = arith.constant 0 : index
    %c0_153 = arith.constant 0 : index
    %342 = vector.load %arg25[%c0_152, %c0_153] : memref<2x44xf32, #tpu.memory_space<vmem>>, vector<2x44xf32>
    tpu.vector_store %arg25[%c0_152, %c0_153], %341 {strides = array<i32>} : memref<2x44xf32, #tpu.memory_space<vmem>>, vector<2x44xf32>,
    %c0_154 = arith.constant 0 : index
    %c0_155 = arith.constant 0 : index
    %343 = vector.load %arg25[%c0_154, %c0_155] : memref<2x44xf32, #tpu.memory_space<vmem>>, vector<1x16xf32>
    %344 = vector.extract_strided_slice %340 {offsets = [0, 0], sizes = [1, 16], strides = [1, 1]} : vector<16x16xf32> to vector<1x16xf32>
    %345 = arith.addf %343, %344 : vector<1x16xf32>
    %c0_156 = arith.constant 0 : index
    %c0_157 = arith.constant 0 : index
    %346 = vector.load %arg25[%c0_156, %c0_157] : memref<2x44xf32, #tpu.memory_space<vmem>>, vector<1x16xf32>
    tpu.vector_store %arg25[%c0_156, %c0_157], %345 {strides = array<i32>} : memref<2x44xf32, #tpu.memory_space<vmem>>, vector<1x16xf32>,
    %c0_158 = arith.constant 0 : index
    %c4 = arith.constant 4 : index
    %347 = vector.load %arg25[%c0_158, %c4] : memref<2x44xf32, #tpu.memory_space<vmem>>, vector<1x16xf32>
    %348 = vector.extract_strided_slice %340 {offsets = [1, 0], sizes = [1, 16], strides = [1, 1]} : vector<16x16xf32> to vector<1x16xf32>
    %349 = arith.addf %347, %348 : vector<1x16xf32>
    %c0_159 = arith.constant 0 : index
    %c4_160 = arith.constant 4 : index
    %350 = vector.load %arg25[%c0_159, %c4_160] : memref<2x44xf32, #tpu.memory_space<vmem>>, vector<1x16xf32>
    tpu.vector_store %arg25[%c0_159, %c4_160], %349 {strides = array<i32>} : memref<2x44xf32, #tpu.memory_space<vmem>>, vector<1x16xf32>,
    %c0_161 = arith.constant 0 : index
    %c8_162 = arith.constant 8 : index
    %351 = vector.load %arg25[%c0_161, %c8_162] : memref<2x44xf32, #tpu.memory_space<vmem>>, vector<1x16xf32>
    %352 = vector.extract_strided_slice %340 {offsets = [2, 0], sizes = [1, 16], strides = [1, 1]} : vector<16x16xf32> to vector<1x16xf32>
    %353 = arith.addf %351, %352 : vector<1x16xf32>
    %c0_163 = arith.constant 0 : index
    %c8_164 = arith.constant 8 : index
    %354 = vector.load %arg25[%c0_163, %c8_164] : memref<2x44xf32, #tpu.memory_space<vmem>>, vector<1x16xf32>
    tpu.vector_store %arg25[%c0_163, %c8_164], %353 {strides = array<i32>} : memref<2x44xf32, #tpu.memory_space<vmem>>, vector<1x16xf32>,
    %c0_165 = arith.constant 0 : index
    %c12 = arith.constant 12 : index
    %355 = vector.load %arg25[%c0_165, %c12] : memref<2x44xf32, #tpu.memory_space<vmem>>, vector<1x16xf32>
    %356 = vector.extract_strided_slice %340 {offsets = [3, 0], sizes = [1, 16], strides = [1, 1]} : vector<16x16xf32> to vector<1x16xf32>
    %357 = arith.addf %355, %356 : vector<1x16xf32>
    %c0_166 = arith.constant 0 : index
    %c12_167 = arith.constant 12 : index
    %358 = vector.load %arg25[%c0_166, %c12_167] : memref<2x44xf32, #tpu.memory_space<vmem>>, vector<1x16xf32>
    tpu.vector_store %arg25[%c0_166, %c12_167], %357 {strides = array<i32>} : memref<2x44xf32, #tpu.memory_space<vmem>>, vector<1x16xf32>,
    %c0_168 = arith.constant 0 : index
    %c16 = arith.constant 16 : index
    %359 = vector.load %arg25[%c0_168, %c16] : memref<2x44xf32, #tpu.memory_space<vmem>>, vector<1x16xf32>
    %360 = vector.extract_strided_slice %340 {offsets = [4, 0], sizes = [1, 16], strides = [1, 1]} : vector<16x16xf32> to vector<1x16xf32>
    %361 = arith.addf %359, %360 : vector<1x16xf32>
    %c0_169 = arith.constant 0 : index
    %c16_170 = arith.constant 16 : index
    %362 = vector.load %arg25[%c0_169, %c16_170] : memref<2x44xf32, #tpu.memory_space<vmem>>, vector<1x16xf32>
    tpu.vector_store %arg25[%c0_169, %c16_170], %361 {strides = array<i32>} : memref<2x44xf32, #tpu.memory_space<vmem>>, vector<1x16xf32>,
    %c0_171 = arith.constant 0 : index
    %c20 = arith.constant 20 : index
    %363 = vector.load %arg25[%c0_171, %c20] : memref<2x44xf32, #tpu.memory_space<vmem>>, vector<1x16xf32>
    %364 = vector.extract_strided_slice %340 {offsets = [5, 0], sizes = [1, 16], strides = [1, 1]} : vector<16x16xf32> to vector<1x16xf32>
    %365 = arith.addf %363, %364 : vector<1x16xf32>
    %c0_172 = arith.constant 0 : index
    %c20_173 = arith.constant 20 : index
    %366 = vector.load %arg25[%c0_172, %c20_173] : memref<2x44xf32, #tpu.memory_space<vmem>>, vector<1x16xf32>
    tpu.vector_store %arg25[%c0_172, %c20_173], %365 {strides = array<i32>} : memref<2x44xf32, #tpu.memory_space<vmem>>, vector<1x16xf32>,
    %c0_174 = arith.constant 0 : index
    %c24 = arith.constant 24 : index
    %367 = vector.load %arg25[%c0_174, %c24] : memref<2x44xf32, #tpu.memory_space<vmem>>, vector<1x16xf32>
    %368 = vector.extract_strided_slice %340 {offsets = [6, 0], sizes = [1, 16], strides = [1, 1]} : vector<16x16xf32> to vector<1x16xf32>
    %369 = arith.addf %367, %368 : vector<1x16xf32>
    %c0_175 = arith.constant 0 : index
    %c24_176 = arith.constant 24 : index
    %370 = vector.load %arg25[%c0_175, %c24_176] : memref<2x44xf32, #tpu.memory_space<vmem>>, vector<1x16xf32>
    tpu.vector_store %arg25[%c0_175, %c24_176], %369 {strides = array<i32>} : memref<2x44xf32, #tpu.memory_space<vmem>>, vector<1x16xf32>,
    %c0_177 = arith.constant 0 : index
    %c28 = arith.constant 28 : index
    %371 = vector.load %arg25[%c0_177, %c28] : memref<2x44xf32, #tpu.memory_space<vmem>>, vector<1x16xf32>
    %372 = vector.extract_strided_slice %340 {offsets = [7, 0], sizes = [1, 16], strides = [1, 1]} : vector<16x16xf32> to vector<1x16xf32>
    %373 = arith.addf %371, %372 : vector<1x16xf32>
    %c0_178 = arith.constant 0 : index
    %c28_179 = arith.constant 28 : index
    %374 = vector.load %arg25[%c0_178, %c28_179] : memref<2x44xf32, #tpu.memory_space<vmem>>, vector<1x16xf32>
    tpu.vector_store %arg25[%c0_178, %c28_179], %373 {strides = array<i32>} : memref<2x44xf32, #tpu.memory_space<vmem>>, vector<1x16xf32>,
    %c1_180 = arith.constant 1 : index
    %c0_181 = arith.constant 0 : index
    %375 = vector.load %arg25[%c1_180, %c0_181] : memref<2x44xf32, #tpu.memory_space<vmem>>, vector<1x16xf32>
    %376 = vector.extract_strided_slice %340 {offsets = [8, 0], sizes = [1, 16], strides = [1, 1]} : vector<16x16xf32> to vector<1x16xf32>
    %377 = arith.addf %375, %376 : vector<1x16xf32>
    %c1_182 = arith.constant 1 : index
    %c0_183 = arith.constant 0 : index
    %378 = vector.load %arg25[%c1_182, %c0_183] : memref<2x44xf32, #tpu.memory_space<vmem>>, vector<1x16xf32>
    tpu.vector_store %arg25[%c1_182, %c0_183], %377 {strides = array<i32>} : memref<2x44xf32, #tpu.memory_space<vmem>>, vector<1x16xf32>,
    %c1_184 = arith.constant 1 : index
    %c4_185 = arith.constant 4 : index
    %379 = vector.load %arg25[%c1_184, %c4_185] : memref<2x44xf32, #tpu.memory_space<vmem>>, vector<1x16xf32>
    %380 = vector.extract_strided_slice %340 {offsets = [9, 0], sizes = [1, 16], strides = [1, 1]} : vector<16x16xf32> to vector<1x16xf32>
    %381 = arith.addf %379, %380 : vector<1x16xf32>
    %c1_186 = arith.constant 1 : index
    %c4_187 = arith.constant 4 : index
    %382 = vector.load %arg25[%c1_186, %c4_187] : memref<2x44xf32, #tpu.memory_space<vmem>>, vector<1x16xf32>
    tpu.vector_store %arg25[%c1_186, %c4_187], %381 {strides = array<i32>} : memref<2x44xf32, #tpu.memory_space<vmem>>, vector<1x16xf32>,
    %c1_188 = arith.constant 1 : index
    %c8_189 = arith.constant 8 : index
    %383 = vector.load %arg25[%c1_188, %c8_189] : memref<2x44xf32, #tpu.memory_space<vmem>>, vector<1x16xf32>
    %384 = vector.extract_strided_slice %340 {offsets = [10, 0], sizes = [1, 16], strides = [1, 1]} : vector<16x16xf32> to vector<1x16xf32>
    %385 = arith.addf %383, %384 : vector<1x16xf32>
    %c1_190 = arith.constant 1 : index
    %c8_191 = arith.constant 8 : index
    %386 = vector.load %arg25[%c1_190, %c8_191] : memref<2x44xf32, #tpu.memory_space<vmem>>, vector<1x16xf32>
    tpu.vector_store %arg25[%c1_190, %c8_191], %385 {strides = array<i32>} : memref<2x44xf32, #tpu.memory_space<vmem>>, vector<1x16xf32>,
    %c1_192 = arith.constant 1 : index
    %c12_193 = arith.constant 12 : index
    %387 = vector.load %arg25[%c1_192, %c12_193] : memref<2x44xf32, #tpu.memory_space<vmem>>, vector<1x16xf32>
    %388 = vector.extract_strided_slice %340 {offsets = [11, 0], sizes = [1, 16], strides = [1, 1]} : vector<16x16xf32> to vector<1x16xf32>
    %389 = arith.addf %387, %388 : vector<1x16xf32>
    %c1_194 = arith.constant 1 : index
    %c12_195 = arith.constant 12 : index
    %390 = vector.load %arg25[%c1_194, %c12_195] : memref<2x44xf32, #tpu.memory_space<vmem>>, vector<1x16xf32>
    tpu.vector_store %arg25[%c1_194, %c12_195], %389 {strides = array<i32>} : memref<2x44xf32, #tpu.memory_space<vmem>>, vector<1x16xf32>,
    %c1_196 = arith.constant 1 : index
    %c16_197 = arith.constant 16 : index
    %391 = vector.load %arg25[%c1_196, %c16_197] : memref<2x44xf32, #tpu.memory_space<vmem>>, vector<1x16xf32>
    %392 = vector.extract_strided_slice %340 {offsets = [12, 0], sizes = [1, 16], strides = [1, 1]} : vector<16x16xf32> to vector<1x16xf32>
    %393 = arith.addf %391, %392 : vector<1x16xf32>
    %c1_198 = arith.constant 1 : index
    %c16_199 = arith.constant 16 : index
    %394 = vector.load %arg25[%c1_198, %c16_199] : memref<2x44xf32, #tpu.memory_space<vmem>>, vector<1x16xf32>
    tpu.vector_store %arg25[%c1_198, %c16_199], %393 {strides = array<i32>} : memref<2x44xf32, #tpu.memory_space<vmem>>, vector<1x16xf32>,
    %c1_200 = arith.constant 1 : index
    %c20_201 = arith.constant 20 : index
    %395 = vector.load %arg25[%c1_200, %c20_201] : memref<2x44xf32, #tpu.memory_space<vmem>>, vector<1x16xf32>
    %396 = vector.extract_strided_slice %340 {offsets = [13, 0], sizes = [1, 16], strides = [1, 1]} : vector<16x16xf32> to vector<1x16xf32>
    %397 = arith.addf %395, %396 : vector<1x16xf32>
    %c1_202 = arith.constant 1 : index
    %c20_203 = arith.constant 20 : index
    %398 = vector.load %arg25[%c1_202, %c20_203] : memref<2x44xf32, #tpu.memory_space<vmem>>, vector<1x16xf32>
    tpu.vector_store %arg25[%c1_202, %c20_203], %397 {strides = array<i32>} : memref<2x44xf32, #tpu.memory_space<vmem>>, vector<1x16xf32>,
    %c1_204 = arith.constant 1 : index
    %c24_205 = arith.constant 24 : index
    %399 = vector.load %arg25[%c1_204, %c24_205] : memref<2x44xf32, #tpu.memory_space<vmem>>, vector<1x16xf32>
    %400 = vector.extract_strided_slice %340 {offsets = [14, 0], sizes = [1, 16], strides = [1, 1]} : vector<16x16xf32> to vector<1x16xf32>
    %401 = arith.addf %399, %400 : vector<1x16xf32>
    %c1_206 = arith.constant 1 : index
    %c24_207 = arith.constant 24 : index
    %402 = vector.load %arg25[%c1_206, %c24_207] : memref<2x44xf32, #tpu.memory_space<vmem>>, vector<1x16xf32>
    tpu.vector_store %arg25[%c1_206, %c24_207], %401 {strides = array<i32>} : memref<2x44xf32, #tpu.memory_space<vmem>>, vector<1x16xf32>,
    %c1_208 = arith.constant 1 : index
    %c28_209 = arith.constant 28 : index
    %403 = vector.load %arg25[%c1_208, %c28_209] : memref<2x44xf32, #tpu.memory_space<vmem>>, vector<1x16xf32>
    %404 = vector.extract_strided_slice %340 {offsets = [15, 0], sizes = [1, 16], strides = [1, 1]} : vector<16x16xf32> to vector<1x16xf32>
    %405 = arith.addf %403, %404 : vector<1x16xf32>
    %c1_210 = arith.constant 1 : index
    %c28_211 = arith.constant 28 : index
    %406 = vector.load %arg25[%c1_210, %c28_211] : memref<2x44xf32, #tpu.memory_space<vmem>>, vector<1x16xf32>
    tpu.vector_store %arg25[%c1_210, %c28_211], %405 {strides = array<i32>} : memref<2x44xf32, #tpu.memory_space<vmem>>, vector<1x16xf32>,
    %407 = tpu.iota {dimensions = array<i32: 1>} : vector<1x32xi32>
    %c0_212 = arith.constant 0 : index
    %c6_213 = arith.constant 6 : index
    %408 = vector.load %arg25[%c0_212, %c6_213] : memref<2x44xf32, #tpu.memory_space<vmem>>, vector<1x32xf32>
    %c0_214 = arith.constant 0 : index
    %c0_215 = arith.constant 0 : index
    %409 = vector.load %arg22[%c0_214, %c0_215] : memref<1x32xf32, #tpu.memory_space<vmem>>, vector<1x32xf32>
    %410 = arith.mulf %408, %409 : vector<1x32xf32>
    %c0_216 = arith.constant 0 : index
    %411 = memref.load %arg1[%c0_216] : memref<2xi32, #tpu.memory_space<smem>>
    %412 = vector.broadcast %411 : i32 to vector<1x32xi32>
    %413 = arith.cmpi slt, %407, %412 : vector<1x32xi32>
    %cst_217 = arith.constant 0.000000e+00 : f32
    %414 = vector.broadcast %cst_217 : f32 to vector<1x32xf32>
    %415 = arith.select %413, %410, %414 : vector<1x32xi1>, vector<1x32xf32>
    %c0_218 = arith.constant 0 : index
    %c0_219 = arith.constant 0 : index
    %416 = vector.load %arg23[%c0_218, %c0_219] : memref<2x32xf32, #tpu.memory_space<vmem>>, vector<1x32xf32>
    tpu.vector_store %arg23[%c0_218, %c0_219], %415 {strides = array<i32>} : memref<2x32xf32, #tpu.memory_space<vmem>>, vector<1x32xf32>,
    %c1_220 = arith.constant 1 : index
    %c6_221 = arith.constant 6 : index
    %417 = vector.load %arg25[%c1_220, %c6_221] : memref<2x44xf32, #tpu.memory_space<vmem>>, vector<1x32xf32>
    %c0_222 = arith.constant 0 : index
    %c0_223 = arith.constant 0 : index
    %418 = vector.load %arg22[%c0_222, %c0_223] : memref<1x32xf32, #tpu.memory_space<vmem>>, vector<1x32xf32>
    %419 = arith.mulf %417, %418 : vector<1x32xf32>
    %c1_224 = arith.constant 1 : index
    %420 = memref.load %arg1[%c1_224] : memref<2xi32, #tpu.memory_space<smem>>
    %421 = vector.broadcast %420 : i32 to vector<1x32xi32>
    %422 = arith.cmpi slt, %407, %421 : vector<1x32xi32>
    %cst_225 = arith.constant 0.000000e+00 : f32
    %423 = vector.broadcast %cst_225 : f32 to vector<1x32xf32>
    %424 = arith.select %422, %419, %423 : vector<1x32xi1>, vector<1x32xf32>
    %c1_226 = arith.constant 1 : index
    %c0_227 = arith.constant 0 : index
    %425 = vector.load %arg23[%c1_226, %c0_227] : memref<2x32xf32, #tpu.memory_space<vmem>>, vector<1x32xf32>
    tpu.vector_store %arg23[%c1_226, %c0_227], %424 {strides = array<i32>} : memref<2x32xf32, #tpu.memory_space<vmem>>, vector<1x32xf32>,
    return
  }
  func.func @transform_0(%arg0: i32, %arg1: memref<2xi32, #tpu.memory_space<smem>>) -> (i32, i32) {
    %c0_i32 = arith.constant 0 : i32
    %c0_i32_0 = arith.constant 0 : i32
    %c0_i32_1 = arith.constant 0 : i32
    return %c0_i32, %c0_i32_0 : i32, i32
  }
  func.func @transform_1(%arg0: i32, %arg1: memref<2xi32, #tpu.memory_space<smem>>) -> (i32, i32) {
    %c0_i32 = arith.constant 0 : i32
    %c0_i32_0 = arith.constant 0 : i32
    %c0_i32_1 = arith.constant 0 : i32
    return %c0_i32, %c0_i32_0 : i32, i32
  }
  func.func @transform_2(%arg0: i32, %arg1: memref<2xi32, #tpu.memory_space<smem>>) -> (i32, i32) {
    %c0_i32 = arith.constant 0 : i32
    %c0_i32_0 = arith.constant 0 : i32
    %c0_i32_1 = arith.constant 0 : i32
    return %c0_i32, %c0_i32_0 : i32, i32
  }
  func.func @transform_3(%arg0: i32, %arg1: memref<2xi32, #tpu.memory_space<smem>>) -> (i32, i32) {
    %c0_i32 = arith.constant 0 : i32
    %c0_i32_0 = arith.constant 0 : i32
    %c0_i32_1 = arith.constant 0 : i32
    return %c0_i32, %c0_i32_0 : i32, i32
  }
  func.func @transform_4(%arg0: i32, %arg1: memref<2xi32, #tpu.memory_space<smem>>) -> (i32, i32) {
    %c0_i32 = arith.constant 0 : i32
    %c0_i32_0 = arith.constant 0 : i32
    %c0_i32_1 = arith.constant 0 : i32
    return %c0_i32, %c0_i32_0 : i32, i32
  }
  func.func @transform_5(%arg0: i32, %arg1: memref<2xi32, #tpu.memory_space<smem>>) -> (i32, i32, i32) {
    %c0_i32 = arith.constant 0 : i32
    %c0_i32_0 = arith.constant 0 : i32
    %c0_i32_1 = arith.constant 0 : i32
    %c0_i32_2 = arith.constant 0 : i32
    return %c0_i32, %c0_i32_0, %c0_i32_1 : i32, i32, i32
  }
  func.func @transform_6(%arg0: i32, %arg1: memref<2xi32, #tpu.memory_space<smem>>) -> (i32, i32, i32) {
    %c0_i32 = arith.constant 0 : i32
    %c0_i32_0 = arith.constant 0 : i32
    %c0_i32_1 = arith.constant 0 : i32
    %c0_i32_2 = arith.constant 0 : i32
    return %c0_i32, %c0_i32_0, %c0_i32_1 : i32, i32, i32
  }
  func.func @transform_7(%arg0: i32, %arg1: memref<2xi32, #tpu.memory_space<smem>>) -> (i32, i32, i32) {
    %c0_i32 = arith.constant 0 : i32
    %c0_i32_0 = arith.constant 0 : i32
    %c0_i32_1 = arith.constant 0 : i32
    %c0_i32_2 = arith.constant 0 : i32
    return %c0_i32, %c0_i32_0, %c0_i32_1 : i32, i32, i32
  }
  func.func @transform_8(%arg0: i32, %arg1: memref<2xi32, #tpu.memory_space<smem>>) -> (i32, i32, i32) {
    %c0_i32 = arith.constant 0 : i32
    %c0_i32_0 = arith.constant 0 : i32
    %c0_i32_1 = arith.constant 0 : i32
    %c0_i32_2 = arith.constant 0 : i32
    return %c0_i32, %c0_i32_0, %c0_i32_1 : i32, i32, i32
  }
  func.func @transform_9(%arg0: i32, %arg1: memref<2xi32, #tpu.memory_space<smem>>) -> (i32, i32, i32) {
    %c0_i32 = arith.constant 0 : i32
    %c0_i32_0 = arith.constant 0 : i32
    %c0_i32_1 = arith.constant 0 : i32
    %c0_i32_2 = arith.constant 0 : i32
    return %c0_i32, %c0_i32_0, %c0_i32_1 : i32, i32, i32
  }
  func.func @transform_10(%arg0: i32, %arg1: memref<2xi32, #tpu.memory_space<smem>>) -> (i32, i32, i32) {
    %c0_i32 = arith.constant 0 : i32
    %c0_i32_0 = arith.constant 0 : i32
    %c0_i32_1 = arith.constant 0 : i32
    %c0_i32_2 = arith.constant 0 : i32
    return %c0_i32, %c0_i32_0, %c0_i32_1 : i32, i32, i32
  }
  func.func @transform_11(%arg0: i32, %arg1: memref<2xi32, #tpu.memory_space<smem>>) -> (i32, i32, i32) {
    %c0_i32 = arith.constant 0 : i32
    %c0_i32_0 = arith.constant 0 : i32
    %c0_i32_1 = arith.constant 0 : i32
    %c0_i32_2 = arith.constant 0 : i32
    return %c0_i32, %c0_i32_0, %c0_i32_1 : i32, i32, i32
  }
  func.func @transform_12(%arg0: i32, %arg1: memref<2xi32, #tpu.memory_space<smem>>) -> (i32, i32, i32) {
    %c0_i32 = arith.constant 0 : i32
    %c0_i32_0 = arith.constant 0 : i32
    %c0_i32_1 = arith.constant 0 : i32
    %c0_i32_2 = arith.constant 0 : i32
    return %c0_i32, %c0_i32_0, %c0_i32_1 : i32, i32, i32
  }
  func.func @transform_13(%arg0: i32, %arg1: memref<2xi32, #tpu.memory_space<smem>>) -> (i32, i32, i32) {
    %c0_i32 = arith.constant 0 : i32
    %c0_i32_0 = arith.constant 0 : i32
    %c0_i32_1 = arith.constant 0 : i32
    %c0_i32_2 = arith.constant 0 : i32
    return %c0_i32, %c0_i32_0, %c0_i32_1 : i32, i32, i32
  }
  func.func @transform_14(%arg0: i32, %arg1: memref<2xi32, #tpu.memory_space<smem>>) -> (i32, i32) {
    %c0_i32 = arith.constant 0 : i32
    %c0_i32_0 = arith.constant 0 : i32
    %c0_i32_1 = arith.constant 0 : i32
    return %c0_i32, %c0_i32_0 : i32, i32
  }
  func.func @transform_15(%arg0: i32, %arg1: memref<2xi32, #tpu.memory_space<smem>>) -> (i32, i32) {
    %c0_i32 = arith.constant 0 : i32
    %c0_i32_0 = arith.constant 0 : i32
    %c0_i32_1 = arith.constant 0 : i32
    return %c0_i32, %c0_i32_0 : i32, i32
  }
  func.func @transform_16(%arg0: i32, %arg1: memref<2xi32, #tpu.memory_space<smem>>) -> (i32, i32) {
    %c0_i32 = arith.constant 0 : i32
    %c0_i32_0 = arith.constant 0 : i32
    %c0_i32_1 = arith.constant 0 : i32
    return %c0_i32, %c0_i32_0 : i32, i32
  }
  func.func @transform_17(%arg0: i32, %arg1: memref<2xi32, #tpu.memory_space<smem>>) -> (i32, i32) {
    %c0_i32 = arith.constant 0 : i32
    %c0_i32_0 = arith.constant 0 : i32
    %c0_i32_1 = arith.constant 0 : i32
    return %c0_i32, %c0_i32_0 : i32, i32
  }
  func.func @transform_18(%arg0: i32, %arg1: memref<2xi32, #tpu.memory_space<smem>>) -> (i32, i32) {
    %c0_i32 = arith.constant 0 : i32
    %c0_i32_0 = arith.constant 0 : i32
    %c0_i32_1 = arith.constant 0 : i32
    return %c0_i32, %c0_i32_0 : i32, i32
  }
  func.func @transform_19(%arg0: i32, %arg1: memref<2xi32, #tpu.memory_space<smem>>) -> (i32, i32) {
    %c0_i32 = arith.constant 0 : i32
    %c0_i32_0 = arith.constant 0 : i32
    %c0_i32_1 = arith.constant 0 : i32
    return %c0_i32, %c0_i32_0 : i32, i32
  }
  func.func @transform_20(%arg0: i32, %arg1: memref<2xi32, #tpu.memory_space<smem>>) -> (i32, i32) {
    %c0_i32 = arith.constant 0 : i32
    %c0_i32_0 = arith.constant 0 : i32
    %c0_i32_1 = arith.constant 0 : i32
    return %c0_i32, %c0_i32_0 : i32, i32
  }
  func.func @transform_21(%arg0: i32, %arg1: memref<2xi32, #tpu.memory_space<smem>>) -> (i32, i32) {
    %c0_i32 = arith.constant 0 : i32
    %c0_i32_0 = arith.constant 0 : i32
    %c0_i32_1 = arith.constant 0 : i32
    return %c0_i32, %c0_i32_0 : i32, i32
  }
}

</mosaic_0001>

<bundles_post_ra>
// kernel: _lambda_.1
= control target key start
LH: loop header
LB: loop body
LE: loop exit
PB: predicated region body
PF: predicated region fallthrough
CT: control target
= control target key end

     0   :  { %s3154_s0 = inlined_call_operand.vmem [shape: s32[2], index: 0, kind: input, shape index: {}]   ;;  %s3155_s1 = inlined_call_operand.vmem [shape: bf16[16,224], index: 1, kind: input, shape index: {}]   ;;  %s3156_s2 = inlined_call_operand.vmem [shape: bf16[224,64], index: 2, kind: input, shape index: {}]   ;;  %s3157_s3 = inlined_call_operand.vmem [shape: f32[1,64], index: 3, kind: input, shape index: {}]   ;;  %s3158_s4 = inlined_call_operand.vmem [shape: f32[1,64], index: 4, kind: input, shape index: {}, may-alias: {4,15}]   ;;  %s3159_s5 = inlined_call_operand.vmem [shape: f32[1,64], index: 5, kind: input, shape index: {}, may-alias: {5,16}]   ;;  %s3160_s6 = inlined_call_operand.vmem [shape: f32[2,7,64], index: 6, kind: input, shape index: {}]   ;;  %s3161_s7 = inlined_call_operand.vmem [shape: f32[2,1,64], index: 7, kind: input, shape index: {}]   ;;  %s3162_s8 = inlined_call_operand.vmem [shape: f32[2,1,64], index: 8, kind: input, shape index: {}]   ;;  %s3163_s9 = inlined_call_operand.vmem [shape: f32[2,1,64], index: 9, kind: input, shape index: {}]   ;;  %s3164_s10 = inlined_call_operand.vmem [shape: bf16[2,64,128], index: 10, kind: input, shape index: {}]   ;;  %s3165_s11 = inlined_call_operand.vmem [shape: f32[2,1,128], index: 11, kind: input, shape index: {}]   ;;  %s3166_s12 = inlined_call_operand.vmem [shape: bf16[2,128,64], index: 12, kind: input, shape index: {}]   ;;  %s3167_s13 = inlined_call_operand.vmem [shape: f32[2,1,64], index: 13, kind: input, shape index: {}]   ;;  %s3168_s14 = inlined_call_operand.vmem [shape: f32[2,1,64], index: 14, kind: input, shape index: {}]   ;;  %s3169_s15 = inlined_call_operand.vmem [shape: f32[1,64], index: 15, kind: input, shape index: {}, may-alias: {4,15}]   ;;  %s3170_s16 = inlined_call_operand.vmem [shape: f32[1,64], index: 16, kind: input, shape index: {}, may-alias: {5,16}]   ;;  %s3171_s17 = inlined_call_operand.vmem [shape: bf16[64,18], index: 17, kind: input, shape index: {}]   ;;  %s3172_s18 = inlined_call_operand.vmem [shape: f32[1,18], index: 18, kind: input, shape index: {}]   ;;  %s3173_s19 = inlined_call_operand.vmem [shape: bf16[9,16], index: 19, kind: input, shape index: {}]   ;;  %s3174_s20 = inlined_call_operand.vmem [shape: bf16[9,16], index: 20, kind: input, shape index: {}]   ;;  %s3175_s21 = inlined_call_operand.vmem [shape: f32[1,32], index: 21, kind: input, shape index: {}]   ;;  %s3176_s22 = inlined_call_operand.hbm [shape: f32[2,32], index: 22, kind: output, shape index: {}]  }
   0x1   :  { %3180 = sst [smem:[#allocation10_spill]] %s3154_s0 }
   0x2   :  { %3181 = sst [smem:[#allocation11_spill]] %s3155_s1 }
   0x3   :  { %3182 = sst [smem:[#allocation12_spill]] %s3156_s2 }
   0x4   :  { %3183 = sst [smem:[#allocation13_spill]] %s3157_s3 }
   0x5   :  { %3184 = sst [smem:[#allocation14_spill]] %s3158_s4 }
   0x6   :  { %3185 = sst [smem:[#allocation15_spill]] %s3159_s5 }
   0x7   :  { %3186 = sst [smem:[#allocation16_spill]] %s3160_s6 }
   0x8   :  { %3187 = sst [smem:[#allocation17_spill]] %s3170_s16 }
   0x9   :  { %s3188_s29 = sld [smem:[#allocation10_spill]] }
   0xf   :  { %s27_s16 = sshll.u32 %s3188_s29, 4  ;;  %s28_s16 = int_to_ptr.vmem [resolvable:$true] %s27_s16 }
  0x10   :  { %s2308_s30 = scalar_lea.vmem %s28_s16, 16  ;;  %p2313_p1 = scmp.lt.s32.totalorder %s28_s16, %s28_s16 }
  0x11   :  { %p2309_p0 = scmp.ne.s32.totalorder %s28_s16, %s2308_s30  ;;  %p2314_p2 = scmp.lt.s32.totalorder %s2308_s30, %s2308_s30 }
  0x13   :  { %p2315_p3 = por %p2314_p2, %p2313_p1 }
  0x15   :  { %p2316_p4 = pnand %p2315_p3, %p2309_p0 }
  0x17   :  { %2319 = shalt.err (!%p2316_p4)  }
  0x18   :  { %s2344_s4 = smov [#allocation5]  }
  0x19   :  { %30 = dma.vmem_to_smem %s28_s16, 16, %s2344_s4, [#allocation4] }
  0x1a   :  { %2340 = dma.done.wait [#allocation4], 16 }
  0x1b   :  { %2341 = vsyncadd [#allocation4], 4294967280 }
  0x1c   :  { %32 = sfence }
  0x1d   :  { %s3189_s1 = sld [smem:[#allocation12_spill]]  ;;  %v2345_v1 = vmov 0   ;;  %vm207_vm0 = vcmask 785408  }
  0x1e   :  { %211 = vmatprep.subr.bf16.mxu0 %v2345_v1  ;;  %s3190_s29 = sld [smem:[#allocation11_spill]] }
  0x23   :  { %v2217_v0 = vld [vmem:[%s3189_s1 + $0x38] sm:$0xff]   ;;  %v2218_v2 = vld [vmem:[%s3189_s1 + $0x30] sm:$0xff]   ;;  %v2219_v3 = vld [vmem:[%s3189_s1 + $0x28] sm:$0xff]  }
  0x24   :  { %212 = vmatpush1.bf16.msra.mxu0 %v2217_v0  ;;  %v2220_v4 = vld [vmem:[%s3189_s1 + $0x20] sm:$0xff]   ;;  %v2221_v5 = vld [vmem:[%s3189_s1 + $0x18] sm:$0xff]   ;;  %v2222_v7 = vld [vmem:[%s3189_s1 + $0x10] sm:$0xff]  }
  0x25   :  { %213 = vmatprep.subr.bf16.mxu0 %v2345_v1  ;;  %v2233_v6 = vld [vmem:[%s3190_s29 + $0x4] ss:$8 sps:$4 sm:$0xff]  }
  0x26   :  { %1949 = vmatprep.mubr.msk.bf16.mxu0 %vm207_vm0, %v2233_v6  ;;  %v2223_v8 = vld [vmem:[%s3189_s1 + $0x8] sm:$0xff]   ;;  %v2224_v9 = vld [vmem:[%s3189_s1] sm:$0xff]  }
  0x27   :  { %v2225_v10 = vld [vmem:[%s3189_s1 + $0x68] sm:$0xff]   ;;  %v2226_v11 = vld [vmem:[%s3189_s1 + $0x60] sm:$0xff]  }
  0x28   :  { %214 = vmatpush1.bf16.msra.mxu0 %v2218_v2 }
  0x29   :  { %215 = vmatprep.subr.bf16.mxu0 %v2345_v1 }
  0x2c   :  { %216 = vmatpush1.bf16.msra.mxu0 %v2219_v3 }
  0x2d   :  { %217 = vmatprep.subr.bf16.mxu0 %v2345_v1 }
  0x30   :  { %218 = vmatpush1.bf16.msra.mxu0 %v2220_v4 }
  0x31   :  { %219 = vmatprep.subr.bf16.mxu0 %v2345_v1 }
  0x34   :  { %220 = vmatpush1.bf16.msra.mxu0 %v2221_v5 }
  0x35   :  { %221 = vmatprep.subr.bf16.mxu0 %v2345_v1 }
  0x38   :  { %222 = vmatpush1.bf16.msra.mxu0 %v2222_v7 }
  0x39   :  { %223 = vmatprep.subr.bf16.mxu0 %v2345_v1 }
  0x3c   :  { %224 = vmatpush1.bf16.msra.mxu0 %v2223_v8 }
  0x3d   :  { %225 = vmatprep.subr.bf16.mxu0 %v2345_v1 }
  0x40   :  { %226 = vmatpush1.bf16.msra.mxu0 %v2224_v9 }
  0x41   :  { %231 = vmatprep.subr.bf16.mxu0 %v2345_v1 }
  0x44   :  { %232 = vmatpush2.bf16.msra.mxu0 %v2225_v10 }
  0x45   :  { %233 = vmatprep.subr.bf16.mxu0 %v2345_v1 }
  0x46   :  { %33 = vsyncpa [#allocation7], 0  ;;  %v2227_v12 = vld [vmem:[%s3189_s1 + $0x58] sm:$0xff]   ;;  %v2228_v13 = vld [vmem:[%s3189_s1 + $0x50] sm:$0xff]   ;;  %s3191_s16 = sld [smem:[#allocation13_spill]]  ;;  %vm254_vm1 = vcmask 523264   ;;  %v298_v42 = vlaneseq }
  0x47   :  { %v2229_v14 = vld [vmem:[%s3189_s1 + $0x48] sm:$0xff]   ;;  %v2230_v15 = vld [vmem:[%s3189_s1 + $0x40] sm:$0xff]   ;;  %s3192_s26 = sld [smem:[#allocation14_spill]]  ;;  %vm2347_vm14 = vmmov 0   ;;  %s2358_s0 = smov 12  }
  0x48   :  { %234 = vmatpush2.bf16.msra.mxu0 %v2226_v11  ;;  %v2231_v16 = vld [vmem:[%s3190_s29] ss:$8 sps:$4 sm:$0xff]   ;;  %s3193_s3 = sld [smem:[#allocation15_spill]]  ;;  %v2546_v48 = vshrl.u32 %v298_v42, 7  ;;  %s2359_s23 = smov 16  }
  0x49   :  { %235 = vmatprep.subr.bf16.mxu0 %v2345_v1  ;;  %s3194_s4 = sld [smem:[#allocation16_spill]]  ;;  %s2360_s5 = smov 20  }
  0x4a   :  { %v2553_v53 = vand.u32 7, %v2546_v48  ;;  %v348_v54 = vsub.s32 0, %v2546_v48  ;;  %v360_v55 = vsub.s32 1, %v2546_v48  ;;  %v300_v58 = vadd.s32 8, %v2546_v48  ;;  %s2053_s6 = sld [smem:[#allocation5 + $0x1]]  ;;  %s2365_s25 = smov [#allocation6]  }
  0x4b   :  { %v372_v59 = vsub.s32 2, %v2546_v48  ;;  %v382_v60 = vsub.s32 3, %v2546_v48  ;;  %v394_v63 = vsub.s32 4, %v2546_v48  ;;  %v406_v8 = vsub.s32 5, %v2546_v48 }
  0x4c   :  { %236 = vmatpush2.bf16.msra.mxu0 %v2227_v12  ;;  %v1932_v17 = vld [vmem:[%s3191_s16] ss:$0 sm:$0xff]  ;;  %vm303_vm2 = vcmp.ge.s32.totalorder %v2553_v53, 3  ;;  %vm309_vm3 = vcmp.ge.s32.totalorder %v2553_v53, 2  ;;  %vm315_vm4 = vcmp.ge.s32.totalorder %v2553_v53, 1  ;;  %v2575_v0 = vand.u32 7, %v300_v58 }
  0x4d   :  { %237 = vmatprep.subr.bf16.mxu0 %v2345_v1  ;;  %v1950_v44 = vld [vmem:[%s3192_s26] ss:$0 sm:$0xff]  ;;  %vm323_vm5 = vcmp.lt.s32.totalorder %v2553_v53, 7  ;;  %v418_v12 = vsub.s32 6, %v2546_v48  ;;  %vm329_vm6 = vcmp.lt.s32.totalorder %v2553_v53, 6  ;;  %vm335_vm10 = vcmp.lt.s32.totalorder %v2553_v53, 5 }
  0x4e   :  { %v1951_v46 = vld [vmem:[%s3193_s3] ss:$0 sm:$0xff]  ;;  %vm304_vm7 = vcmp.ge.s32.totalorder %v2575_v0, 3  ;;  %vm310_vm8 = vcmp.ge.s32.totalorder %v2575_v0, 2  ;;  %vm316_vm9 = vcmp.ge.s32.totalorder %v2575_v0, 1  ;;  %vm324_vm11 = vcmp.lt.s32.totalorder %v2575_v0, 7 }
  0x4f   :  { %v341_v57 = vld [vmem:[%s3194_s4] sm:$0x7f]  ;;  %vm330_vm12 = vcmp.lt.s32.totalorder %v2575_v0, 6  ;;  %vm336_vm13 = vcmp.lt.s32.totalorder %v2575_v0, 5  ;;  %s3195_s26 = sld [smem:[#allocation17_spill]] }
  0x50   :  { %238 = vmatpush2.bf16.msra.mxu0 %v2228_v13  ;;  %v349_v61 = vrot.slane %v341_v57, %v348_v54  ;;  %v361_v62 = vrot.slane %v341_v57, %v360_v55  ;;  %v373_v4 = vrot.slane %v341_v57, %v372_v59  ;;  %v383_v11 = vrot.slane %v341_v57, %v382_v60 }
  0x51   :  { %239 = vmatprep.subr.bf16.mxu0 %v2345_v1 }
  0x54   :  { %240 = vmatpush2.bf16.msra.mxu0 %v2229_v14  ;;  %v395_v14 = vrot.slane %v341_v57, %v394_v63 }
  0x55   :  { %241 = vmatprep.subr.bf16.mxu0 %v2345_v1 }
  0x58   :  { %242 = vmatpush2.bf16.msra.mxu0 %v2230_v15 }
  0x5b   :  { %244 = vmatmul.mubr.bf16.vlgmr.msra.gmra.mxu0 %v2231_v16 }
 0x11b   :  { %v245_v18 = vpop.f32.mrf.mxu0 }
 0x11c   :  { %v246_v19 = vadd.f32 %v1932_v17, %v245_v18 }
 0x11d   :  { %v247_v20 = vpop.f32.mrf.mxu0 }
 0x11e   :  { %v255_v21 = vsel %vm254_vm1, %v246_v19, 0.0  ;;  %v407_v20 = vrot.slane %v341_v57, %v406_v8 }
 0x11f   :  { %v248_v22 = vpop.f32.mrf.mxu0  ;;  %256 = vadd.xlane.f32.xlu0 %v255_v21 }
 0x120   :  { %v249_v23 = vadd.f32 %v1932_v17, %v248_v22 }
 0x121   :  { %v250_v24 = vpop.f32.mrf.mxu0 }
 0x122   :  { %v258_v25 = vsel %vm254_vm1, %v249_v23, 0.0 }
 0x123   :  { %259 = vadd.xlane.f32.xlu0 %v258_v25 }
 0x1a8   :  { %v257_v26 = vpop.xlane.xlu0 %256 }
 0x1a9   :  { %v262_v27 = vmul.f32 0.015625, %v257_v26 }
 0x1ab   :  { %v264_v28 = vsub.f32 %v246_v19, %v262_v27  ;;  %v419_v27 = vrot.slane %v341_v57, %v418_v12  ;;  %v1952_v57 = vld [vmem:[%s3161_s7] ss:$0 sm:$0xff] }
 0x1ac   :  { %v260_v29 = vpop.xlane.xlu0 %259 }
 0x1ad   :  { %v263_v30 = vmul.f32 0.015625, %v260_v29  ;;  %v266_v31 = vmul.f32 %v264_v28, %v264_v28 }
 0x1af   :  { %v265_v32 = vsub.f32 %v249_v23, %v263_v30  ;;  %v268_v33 = vsel %vm254_vm1, %v266_v31, 0.0 }
 0x1b0   :  { %269 = vadd.xlane.f32.xlu1 %v268_v33 }
 0x1b1   :  { %v267_v34 = vmul.f32 %v265_v32, %v265_v32 }
 0x1b3   :  { %v271_v35 = vsel %vm254_vm1, %v267_v34, 0.0 }
 0x1b4   :  { %272 = vadd.xlane.f32.xlu1 %v271_v35 }
 0x239   :  { %v270_v36 = vpop.xlane.xlu1 %269 }
 0x23a   :  { %v274_v37 = vmul.f32 0.015625, %v270_v36 }
 0x23c   :  { %v276_v38 = vadd.f32 1e-06, %v274_v37 }
 0x23d   :  { %v273_v39 = vpop.xlane.xlu1 %272 }
 0x23e   :  { %2264 = vrsqrt.f32 %v276_v38  ;;  %v275_v40 = vmul.f32 0.015625, %v273_v39 }
 0x240   :  { %v277_v41 = vadd.f32 1e-06, %v275_v40 }
 0x242   :  { %2266 = vrsqrt.f32 %v277_v41 }
 0x24b   :  { %v2265_v43 = vpop.eup %2264 }
 0x24c   :  { %v280_v45 = vmul.f32 %v2265_v43, %v264_v28 }
 0x24e   :  { %v288_v47 = vmul.f32 %v1950_v44, %v280_v45 }
 0x24f   :  { %v2267_v49 = vpop.eup %2266 }
 0x250   :  { %v2548_v50 = vadd.f32 %v1951_v46, %v288_v47  ;;  %v281_v51 = vmul.f32 %v2267_v49, %v265_v32 }
 0x252   :  { %339 = vst.msk [vmem:[#allocation2 + $0x8] sm:$0xff] %vm254_vm1, %v2548_v50  ;;  %v289_v52 = vmul.f32 %v1950_v44, %v281_v51 }
 0x254   :  { %v2557_v56 = vadd.f32 %v1951_v46, %v289_v52 }
 0x256   :  { %340 = vst.msk [vmem:[#allocation2 + $0x10] sm:$0xff] %vm254_vm1, %v2557_v56 }
 0x259   :  { %v342_v1 = vld [vmem:[#allocation2 + $0x5] sm:$0xff] }
 0x25a   :  { %v354_v2 = vld [vmem:[#allocation2 + $0x6] sm:$0xff]  ;;  %v344_v5 = vsel %vm303_vm2, %v342_v1, 0.0 }
 0x25b   :  { %v366_v3 = vld [vmem:[#allocation2 + $0x7] sm:$0xff]  ;;  %v356_v6 = vsel %vm309_vm3, %v354_v2, 0.0  ;;  %v350_v9 = vmul.f32 %v349_v61, %v344_v5 }
 0x25c   :  { %v368_v7 = vsel %vm315_vm4, %v366_v3, 0.0  ;;  %v362_v10 = vmul.f32 %v361_v62, %v356_v6  ;;  %v378_v13 = vld [vmem:[#allocation2 + $0x8] sm:$0xff] }
 0x25d   :  { %v374_v16 = vmul.f32 %v373_v4, %v368_v7  ;;  %v388_v17 = vld [vmem:[#allocation2 + $0x9] sm:$0xff]  ;;  %v384_v25 = vmul.f32 %v383_v11, %v378_v13  ;;  %v389_v36 = vld [vmem:[#allocation2 + $0x11] sm:$0xff] }
 0x25e   :  { %v364_v15 = vadd.f32 %v362_v10, %v350_v9  ;;  %v400_v18 = vld [vmem:[#allocation2 + $0xa] sm:$0xff]  ;;  %v390_v19 = vsel %vm323_vm5, %v388_v17, 0.0  ;;  %v401_v44 = vld [vmem:[#allocation2 + $0x12] sm:$0xff]  ;;  %v391_v45 = vsel %vm324_vm11, %v389_v36, 0.0 }
 0x25f   :  { %v343_v21 = vld [vmem:[#allocation2 + $0xd] sm:$0xff]  ;;  %v402_v28 = vsel %vm329_vm6, %v400_v18, 0.0  ;;  %v396_v33 = vmul.f32 %v395_v14, %v390_v19  ;;  %v403_v58 = vsel %vm330_vm12, %v401_v44, 0.0  ;;  %v397_v1 = vmul.f32 %v395_v14, %v391_v45 }
 0x260   :  { %v355_v22 = vld [vmem:[#allocation2 + $0xe] sm:$0xff]  ;;  %v376_v24 = vadd.f32 %v374_v16, %v364_v15  ;;  %v345_v29 = vsel %vm304_vm7, %v343_v21, 0.0  ;;  %v408_v40 = vmul.f32 %v407_v20, %v402_v28  ;;  %v409_v5 = vmul.f32 %v407_v20, %v403_v58  ;;  %v2237_v28 = vld [vmem:[%s3164_s10] sm:$0xff]  }
 0x261   :  { %v367_v23 = vld [vmem:[#allocation2 + $0xf] sm:$0xff]  ;;  %v357_v30 = vsel %vm310_vm8, %v355_v22, 0.0  ;;  %v351_v34 = vmul.f32 %v349_v61, %v345_v29 }
 0x262   :  { %v412_v26 = vld [vmem:[#allocation2 + $0xb] sm:$0xff]  ;;  %v369_v31 = vsel %vm316_vm9, %v367_v23, 0.0  ;;  %v386_v32 = vadd.f32 %v384_v25, %v376_v24  ;;  %v363_v35 = vmul.f32 %v361_v62, %v357_v30  ;;  %v413_v52 = vld [vmem:[#allocation2 + $0x13] sm:$0xff]  ;;  %v2346_v25 = vmov 0.0  }
 0x263   :  { %v414_v37 = vsel %vm335_vm10, %v412_v26, 0.0  ;;  %v379_v38 = vld [vmem:[#allocation2 + $0x10] sm:$0xff]  ;;  %v375_v43 = vmul.f32 %v373_v4, %v369_v31  ;;  %v415_v2 = vsel %vm336_vm13, %v413_v52, 0.0  ;;  %v2234_v24 = vld [vmem:[%s3164_s10 + $0x18] sm:$0xff]   ;;  %2091 = vmatprep.subr.bf16.mxu1 %v2346_v25  ;;  %2099 = vmatprep.mubr.msk.bf16.mxu1 %vm2347_vm14, %v2346_v25  ;;  %v2241_v52 = vld [vmem:[%s3166_s12 + $0x20] sm:$0xff]  }
 0x264   :  { %v398_v39 = vadd.f32 %v396_v33, %v386_v32  ;;  %v365_v41 = vadd.f32 %v363_v35, %v351_v34  ;;  %v420_v47 = vmul.f32 %v419_v27, %v414_v37  ;;  %v385_v51 = vmul.f32 %v383_v11, %v379_v38  ;;  %2092 = vmatpush3.bf16.msra.mxu1 %v2234_v24  ;;  %v2235_v26 = vld [vmem:[%s3164_s10 + $0x10] sm:$0xff]   ;;  %v1953_v37 = vld [vmem:[%s3162_s8] ss:$0 sm:$0xff] }
 0x265   :  { %v421_v9 = vmul.f32 %v419_v27, %v415_v2  ;;  %2135 = vmatprep.subr.bf16.mxu0 %v2346_v25  ;;  %2093 = vmatprep.subr.bf16.mxu1 %v2346_v25  ;;  %v2236_v27 = vld [vmem:[%s3164_s10 + $0x8] sm:$0xff]   ;;  %v2243_v58 = vld [vmem:[%s3166_s12 + $0x10] sm:$0xff]  }
 0x266   :  { %v410_v46 = vadd.f32 %v408_v40, %v398_v39  ;;  %v377_v49 = vadd.f32 %v375_v43, %v365_v41  ;;  %2151 = vmatprep.mubr.msk.bf16.mxu0 %vm2347_vm14, %v2346_v25  ;;  %v1954_v41 = vld [vmem:[%s3163_s9] ss:$0 sm:$0xff] }
 0x268   :  { %v422_v61 = vadd.f32 %v420_v47, %v410_v46  ;;  %v387_v62 = vadd.f32 %v385_v51, %v377_v49  ;;  %2094 = vmatpush3.bf16.msra.mxu1 %v2235_v26  ;;  %v2238_v47 = vld [vmem:[%s3166_s12 + $0x38] sm:$0xff]   ;;  %v2239_v49 = vld [vmem:[%s3166_s12 + $0x30] sm:$0xff]   ;;  %v2240_v51 = vld [vmem:[%s3166_s12 + $0x28] sm:$0xff]  }
 0x269   :  { %2095 = vmatprep.subr.bf16.mxu1 %v2346_v25 }
 0x26a   :  { %v431_v3 = vadd.f32 %v1952_v57, %v422_v61  ;;  %v399_v4 = vadd.f32 %v397_v1, %v387_v62  ;;  %v2244_v61 = vld [vmem:[%s3166_s12 + $0x8] sm:$0xff]   ;;  %v2245_v62 = vld [vmem:[%s3166_s12] sm:$0xff]  }
 0x26b   :  { %v1955_v1 = vld [vmem:[%s3165_s11] ss:$0 sm:$0xff] }
 0x26c   :  { %v435_v6 = vsel %vm254_vm1, %v431_v3, 0.0  ;;  %v411_v7 = vadd.f32 %v409_v5, %v399_v4  ;;  %2096 = vmatpush3.bf16.msra.mxu1 %v2236_v27 }
 0x26d   :  { %436 = vadd.xlane.f32.xlu0 %v435_v6  ;;  %2097 = vmatprep.subr.bf16.mxu1 %v2346_v25 }
 0x26e   :  { %v423_v10 = vadd.f32 %v421_v9, %v411_v7 }
 0x270   :  { %v432_v11 = vadd.f32 %v1952_v57, %v423_v10  ;;  %2098 = vmatpush3.bf16.msra.mxu1 %v2237_v28  ;;  %v2242_v57 = vld [vmem:[%s3166_s12 + $0x18] sm:$0xff]  }
 0x271   :  { %2103 = vmatprep.subr.bf16.mxu1 %v2346_v25 }
 0x272   :  { %v438_v13 = vsel %vm254_vm1, %v432_v11, 0.0 }
 0x273   :  { %439 = vadd.xlane.f32.xlu1 %v438_v13 }
 0x2f6   :  { %v437_v15 = vpop.xlane.xlu0 %436 }
 0x2f7   :  { %v441_v16 = vmul.f32 0.015625, %v437_v15 }
 0x2f9   :  { %v443_v17 = vsub.f32 %v431_v3, %v441_v16 }
 0x2fb   :  { %v445_v14 = vmul.f32 %v443_v17, %v443_v17 }
 0x2fc   :  { %v440_v18 = vpop.xlane.xlu1 %439 }
 0x2fd   :  { %v442_v19 = vmul.f32 0.015625, %v440_v18  ;;  %v447_v21 = vsel %vm254_vm1, %v445_v14, 0.0 }
 0x2fe   :  { %448 = vadd.xlane.f32.xlu0 %v447_v21 }
 0x2ff   :  { %v444_v20 = vsub.f32 %v432_v11, %v442_v19 }
 0x301   :  { %v446_v22 = vmul.f32 %v444_v20, %v444_v20 }
 0x303   :  { %v450_v23 = vsel %vm254_vm1, %v446_v22, 0.0 }
 0x304   :  { %451 = vadd.xlane.f32.xlu1 %v450_v23 }
 0x387   :  { %v449_v29 = vpop.xlane.xlu0 %448 }
 0x388   :  { %v453_v30 = vmul.f32 0.015625, %v449_v29 }
 0x38a   :  { %v455_v31 = vadd.f32 1e-06, %v453_v30  ;;  %v1961_v30 = vld [vmem:[%s3167_s13] ss:$0 sm:$0xff] }
 0x38c   :  { %2268 = vrsqrt.f32 %v455_v31 }
 0x38d   :  { %v452_v32 = vpop.xlane.xlu1 %451 }
 0x38e   :  { %v454_v33 = vmul.f32 0.015625, %v452_v32  ;;  %v1970_v32 = vld [vmem:[%s3168_s14] ss:$0 sm:$0xff] }
 0x390   :  { %v456_v34 = vadd.f32 1e-06, %v454_v33 }
 0x392   :  { %2270 = vrsqrt.f32 %v456_v34 }
 0x399   :  { %v2269_v35 = vpop.eup %2268 }
 0x39a   :  { %v459_v36 = vmul.f32 %v2269_v35, %v443_v17 }
 0x39c   :  { %v467_v40 = vmul.f32 %v1953_v37, %v459_v36 }
 0x39e   :  { %v475_v44 = vadd.f32 %v1954_v41, %v467_v40 }
 0x39f   :  { %v2271_v38 = vpop.eup %2270 }
 0x3a0   :  { %v460_v39 = vmul.f32 %v2271_v38, %v444_v20 }
 0x3a2   :  { %v468_v43 = vmul.f32 %v1953_v37, %v460_v39 }
 0x3a4   :  { %v476_v45 = vadd.f32 %v1954_v41, %v468_v43  ;;  %v1971_v43 = vld [vmem:[%s3194_s4 + $0x8] sm:$0x7f] }
 0x3a6   :  { %v477_v46 = vpack.c.bf16 %v476_v45, %v475_v44  ;;  %v726_v44 = vrot.slane %v1971_v43, %v360_v55  ;;  %v748_v55 = vrot.slane %v1971_v43, %v382_v60 }
 0x3a8   :  { %2100 = vmatmul.mubr.msk.bf16.vlgmr.msra.gmra.mxu1 %vm254_vm1, %v477_v46 }
 0x3a9   :  { %2119 = vmatprep.mubr.msk.bf16.mxu1 %vm2347_vm14, %v2346_v25  ;;  %2104 = vmatpush3.bf16.msra.mxu1 %v2238_v47 }
 0x3aa   :  { %2105 = vmatprep.subr.bf16.mxu1 %v2346_v25 }
 0x3ad   :  { %2106 = vmatpush3.bf16.msra.mxu1 %v2239_v49 }
 0x3ae   :  { %2107 = vmatprep.subr.bf16.mxu1 %v2346_v25 }
 0x3b1   :  { %2108 = vmatpush3.bf16.msra.mxu1 %v2240_v51 }
 0x3b2   :  { %2109 = vmatprep.subr.bf16.mxu1 %v2346_v25 }
 0x3b5   :  { %2110 = vmatpush3.bf16.msra.mxu1 %v2241_v52 }
 0x3b6   :  { %2111 = vmatprep.subr.bf16.mxu1 %v2346_v25 }
 0x3b9   :  { %2112 = vmatpush3.bf16.msra.mxu1 %v2242_v57 }
 0x3ba   :  { %2113 = vmatprep.subr.bf16.mxu1 %v2346_v25 }
 0x3bd   :  { %2114 = vmatpush3.bf16.msra.mxu1 %v2243_v58 }
 0x3be   :  { %2115 = vmatprep.subr.bf16.mxu1 %v2346_v25 }
 0x3c1   :  { %2116 = vmatpush3.bf16.msra.mxu1 %v2244_v61 }
 0x3c2   :  { %2117 = vmatprep.subr.bf16.mxu1 %v2346_v25 }
 0x3c5   :  { %2118 = vmatpush3.bf16.msra.mxu1 %v2245_v62 }
 0x3c6   :  { %2123 = vmatprep.subr.bf16.mxu1 %v2346_v25 }
 0x468   :  { %v554_v2 = vpop.f32.mrf.mxu1 }
 0x469   :  { %v555_v3 = vadd.f32 %v1955_v1, %v554_v2 }
 0x46a   :  { %v2101_v4 = vpop.f32.mrf.mxu1 }
 0x46b   :  { %v561_v5 = vmul.f32 %v555_v3, %v555_v3 }
 0x46c   :  { %v557_v6 = vpop.f32.mrf.mxu1 }
 0x46d   :  { %v563_v7 = vmul.f32 %v561_v5, %v555_v3  ;;  %v558_v9 = vadd.f32 %v1955_v1, %v557_v6 }
 0x46e   :  { %v2102_v10 = vpop.f32.mrf.mxu1 }
 0x46f   :  { %v565_v11 = vmul.f32 0.044715, %v563_v7  ;;  %v562_v13 = vmul.f32 %v558_v9, %v558_v9  ;;  %v772_v10 = vrot.slane %v1971_v43, %v406_v8 }
 0x471   :  { %v567_v15 = vadd.f32 %v565_v11, %v555_v3  ;;  %v564_v16 = vmul.f32 %v562_v13, %v558_v9  ;;  %v784_v11 = vrot.slane %v1971_v43, %v418_v12 }
 0x473   :  { %v569_v17 = vmul.f32 0.7978846, %v567_v15  ;;  %v566_v14 = vmul.f32 0.044715, %v564_v16 }
 0x475   :  { %2272 = vtanh.f32 %v569_v17  ;;  %v568_v18 = vadd.f32 %v566_v14, %v558_v9 }
 0x477   :  { %v570_v19 = vmul.f32 0.7978846, %v568_v18 }
 0x479   :  { %2274 = vtanh.f32 %v570_v19 }
 0x482   :  { %v2273_v21 = vpop.eup %2272 }
 0x483   :  { %v573_v20 = vadd.f32 1.0, %v2273_v21 }
 0x485   :  { %v575_v23 = vmul.f32 0.5, %v573_v20 }
 0x486   :  { %v2275_v22 = vpop.eup %2274 }
 0x487   :  { %v574_v24 = vadd.f32 1.0, %v2275_v22  ;;  %v577_v27 = vmul.f32 %v575_v23, %v555_v3 }
 0x489   :  { %v576_v26 = vmul.f32 0.5, %v574_v24 }
 0x48b   :  { %v578_v28 = vmul.f32 %v576_v26, %v558_v9 }
 0x48d   :  { %v579_v29 = vpack.c.bf16 %v578_v28, %v577_v27 }
 0x48f   :  { %2120 = vmatmul.mubr.bf16.vlgmr.msra.gmra.mxu1 %v579_v29 }
 0x490   :  { %2131 = vmatprep.mubr.msk.bf16.mxu1 %vm2347_vm14, %v2346_v25 }
 0x54f   :  { %v685_v31 = vpop.f32.mrf.mxu1 }
 0x550   :  { %v686_v33 = vadd.f32 %v1961_v30, %v685_v31 }
 0x551   :  { %v2121_v34 = vpop.f32.mrf.mxu1 }
 0x552   :  { %v699_v35 = vmul.f32 %v1970_v32, %v686_v33 }
 0x553   :  { %v688_v36 = vpop.f32.mrf.mxu1 }
 0x554   :  { %v2704_v37 = vadd.f32 %v699_v35, %v2548_v50  ;;  %v689_v38 = vadd.f32 %v1961_v30, %v688_v36  ;;  %v714_v50 = vrot.slane %v1971_v43, %v348_v54 }
 0x555   :  { %v2122_v39 = vpop.f32.mrf.mxu1 }
 0x556   :  { %703 = vst.msk [vmem:[#allocation2 + $0x8] sm:$0xff] %vm254_vm1, %v2704_v37  ;;  %v700_v40 = vmul.f32 %v1970_v32, %v689_v38  ;;  %v1973_v32 = vld [vmem:[%s3161_s7 + $0x1] ss:$0 sm:$0xff] }
 0x558   :  { %v2709_v41 = vadd.f32 %v700_v40, %v2557_v56  ;;  %v738_v56 = vrot.slane %v1971_v43, %v372_v59  ;;  %v760_v59 = vrot.slane %v1971_v43, %v394_v63 }
 0x55a   :  { %704 = vst.msk [vmem:[#allocation2 + $0x10] sm:$0xff] %vm254_vm1, %v2709_v41 }
 0x55d   :  { %v707_v45 = vld [vmem:[#allocation2 + $0x5] sm:$0xff] }
 0x55e   :  { %v719_v46 = vld [vmem:[#allocation2 + $0x6] sm:$0xff]  ;;  %v709_v49 = vsel %vm303_vm2, %v707_v45, 0.0 }
 0x55f   :  { %v731_v47 = vld [vmem:[#allocation2 + $0x7] sm:$0xff]  ;;  %v721_v51 = vsel %vm309_vm3, %v719_v46, 0.0  ;;  %v715_v57 = vmul.f32 %v714_v50, %v709_v49 }
 0x560   :  { %v733_v52 = vsel %vm315_vm4, %v731_v47, 0.0  ;;  %v727_v54 = vmul.f32 %v726_v44, %v721_v51  ;;  %v743_v58 = vld [vmem:[#allocation2 + $0x8] sm:$0xff] }
 0x561   :  { %v739_v62 = vmul.f32 %v738_v56, %v733_v52  ;;  %v753_v1 = vld [vmem:[#allocation2 + $0x9] sm:$0xff]  ;;  %v749_v9 = vmul.f32 %v748_v55, %v743_v58  ;;  %v754_v19 = vld [vmem:[#allocation2 + $0x11] sm:$0xff] }
 0x562   :  { %v729_v61 = vadd.f32 %v727_v54, %v715_v57  ;;  %v765_v2 = vld [vmem:[#allocation2 + $0xa] sm:$0xff]  ;;  %v755_v3 = vsel %vm323_vm5, %v753_v1, 0.0  ;;  %v766_v24 = vld [vmem:[#allocation2 + $0x12] sm:$0xff]  ;;  %v756_v26 = vsel %vm324_vm11, %v754_v19, 0.0 }
 0x563   :  { %v708_v4 = vld [vmem:[#allocation2 + $0xd] sm:$0xff]  ;;  %v767_v13 = vsel %vm329_vm6, %v765_v2, 0.0  ;;  %v761_v14 = vmul.f32 %v760_v59, %v755_v3  ;;  %v768_v53 = vsel %vm330_vm12, %v766_v24, 0.0  ;;  %v762_v35 = vmul.f32 %v760_v59, %v756_v26  ;;  %v2249_v2 = vld [vmem:[%s3164_s10 + $0x20] sm:$0xff]   ;;  %v2250_v19 = vld [vmem:[%s3166_s12 + $0x78] sm:$0xff]  }
 0x564   :  { %v720_v5 = vld [vmem:[#allocation2 + $0xe] sm:$0xff]  ;;  %v741_v7 = vadd.f32 %v739_v62, %v729_v61  ;;  %v710_v63 = vsel %vm304_vm7, %v708_v4, 0.0  ;;  %v773_v20 = vmul.f32 %v772_v10, %v767_v13  ;;  %v774_v40 = vmul.f32 %v772_v10, %v768_v53  ;;  %v2246_v62 = vld [vmem:[%s3164_s10 + $0x38] sm:$0xff]   ;;  %2136 = vmatpush3.bf16.msra.mxu0 %v2250_v19  ;;  %v2257_v24 = vld [vmem:[%s3166_s12 + $0x40] sm:$0xff]  }
 0x565   :  { %v732_v6 = vld [vmem:[#allocation2 + $0xf] sm:$0xff]  ;;  %v722_v15 = vsel %vm310_vm8, %v720_v5, 0.0  ;;  %v716_v18 = vmul.f32 %v714_v50, %v710_v63  ;;  %2124 = vmatpush3.bf16.msra.mxu1 %v2246_v62  ;;  %2137 = vmatprep.subr.bf16.mxu0 %v2346_v25  ;;  %v1987_v26 = vld [vmem:[%s3165_s11 + $0x1] ss:$0 sm:$0xff]  ;;  %s2361_s11 = smov 24  }
 0x566   :  { %v777_v60 = vld [vmem:[#allocation2 + $0xb] sm:$0xff]  ;;  %v734_v16 = vsel %vm316_vm9, %v732_v6, 0.0  ;;  %v751_v17 = vadd.f32 %v749_v9, %v741_v7  ;;  %v728_v8 = vmul.f32 %v726_v44, %v722_v15  ;;  %v778_v31 = vld [vmem:[#allocation2 + $0x13] sm:$0xff]  ;;  %2125 = vmatprep.subr.bf16.mxu1 %v2346_v25 }
 0x567   :  { %v779_v48 = vsel %vm335_vm10, %v777_v60, 0.0  ;;  %v744_v12 = vld [vmem:[#allocation2 + $0x10] sm:$0xff]  ;;  %v740_v23 = vmul.f32 %v738_v56, %v734_v16  ;;  %v780_v36 = vsel %vm336_vm13, %v778_v31, 0.0  ;;  %v2248_v59 = vld [vmem:[%s3164_s10 + $0x28] sm:$0xff]   ;;  %v1977_v16 = vld [vmem:[%s3163_s9 + $0x1] ss:$0 sm:$0xff] }
 0x568   :  { %v763_v21 = vadd.f32 %v761_v14, %v751_v17  ;;  %v730_v22 = vadd.f32 %v728_v8, %v716_v18  ;;  %v785_v28 = vmul.f32 %v784_v11, %v779_v48  ;;  %v750_v30 = vmul.f32 %v748_v55, %v744_v12  ;;  %v2247_v1 = vld [vmem:[%s3164_s10 + $0x30] sm:$0xff]   ;;  %v2252_v12 = vld [vmem:[%s3166_s12 + $0x68] sm:$0xff]  }
 0x569   :  { %v786_v44 = vmul.f32 %v784_v11, %v780_v36  ;;  %2126 = vmatpush3.bf16.msra.mxu1 %v2247_v1  ;;  %v1976_v11 = vld [vmem:[%s3162_s8 + $0x1] ss:$0 sm:$0xff]  ;;  %v2251_v48 = vld [vmem:[%s3166_s12 + $0x70] sm:$0xff]   ;;  %s1924_s8 = sshll.u32 %s2365_s25, 4  ;;  %s1925_s8 = int_to_ptr.vmem [resolvable:$true] %s1924_s8 }
 0x56a   :  { %v775_v27 = vadd.f32 %v773_v20, %v763_v21  ;;  %v742_v29 = vadd.f32 %v740_v23, %v730_v22  ;;  %2127 = vmatprep.subr.bf16.mxu1 %v2346_v25  ;;  %2138 = vmatpush3.bf16.msra.mxu0 %v2251_v48  ;;  %v2253_v21 = vld [vmem:[%s3166_s12 + $0x60] sm:$0xff]   ;;  %v2254_v20 = vld [vmem:[%s3166_s12 + $0x58] sm:$0xff]   ;;  %v2255_v22 = vld [vmem:[%s3166_s12 + $0x50] sm:$0xff]   ;;  %s2320_s16 = scalar_lea.vmem %s1925_s8, 32  ;;  %p2325_p6 = scmp.lt.s32.totalorder %s1925_s8, %s1925_s8 }
 0x56b   :  { %2139 = vmatprep.subr.bf16.mxu0 %v2346_v25  ;;  %v2256_v23 = vld [vmem:[%s3166_s12 + $0x48] sm:$0xff]   ;;  %s2362_s12 = smov 28   ;;  %p2321_p5 = scmp.ne.s32.totalorder %s1925_s8, %s2320_s16 }
 0x56c   :  { %v787_v33 = vadd.f32 %v785_v28, %v775_v27  ;;  %v752_v34 = vadd.f32 %v750_v30, %v742_v29  ;;  %p2326_p7 = scmp.lt.s32.totalorder %s2320_s16, %s2320_s16 }
 0x56d   :  { %2128 = vmatpush3.bf16.msra.mxu1 %v2248_v59 }
 0x56e   :  { %v797_v38 = vadd.f32 %v1973_v32, %v787_v33  ;;  %v764_v39 = vadd.f32 %v762_v35, %v752_v34  ;;  %2129 = vmatprep.subr.bf16.mxu1 %v2346_v25  ;;  %2140 = vmatpush3.bf16.msra.mxu0 %v2252_v12  ;;  %p2327_p8 = por %p2326_p7, %p2325_p6 }
 0x56f   :  { %2141 = vmatprep.subr.bf16.mxu0 %v2346_v25 }
 0x570   :  { %v803_v43 = vsel %vm254_vm1, %v797_v38, 0.0  ;;  %v776_v50 = vadd.f32 %v774_v40, %v764_v39  ;;  %p2328_p9 = pnand %p2327_p8, %p2321_p5 }
 0x571   :  { %804 = vadd.xlane.f32.xlu0 %v803_v43  ;;  %2130 = vmatpush3.bf16.msra.mxu1 %v2249_v2 }
 0x572   :  { %v788_v45 = vadd.f32 %v786_v44, %v776_v50  ;;  %2155 = vmatprep.subr.bf16.mxu1 %v2346_v25  ;;  %2142 = vmatpush3.bf16.msra.mxu0 %v2253_v21 }
 0x573   :  { %2143 = vmatprep.subr.bf16.mxu0 %v2346_v25 }
 0x574   :  { %v798_v46 = vadd.f32 %v1973_v32, %v788_v45 }
 0x576   :  { %v806_v47 = vsel %vm254_vm1, %v798_v46, 0.0  ;;  %2144 = vmatpush3.bf16.msra.mxu0 %v2254_v20 }
 0x577   :  { %807 = vadd.xlane.f32.xlu1 %v806_v47  ;;  %2145 = vmatprep.subr.bf16.mxu0 %v2346_v25 }
 0x57a   :  { %2146 = vmatpush3.bf16.msra.mxu0 %v2255_v22 }
 0x57b   :  { %2147 = vmatprep.subr.bf16.mxu0 %v2346_v25 }
 0x57e   :  { %2148 = vmatpush3.bf16.msra.mxu0 %v2256_v23 }
 0x57f   :  { %2149 = vmatprep.subr.bf16.mxu0 %v2346_v25 }
 0x582   :  { %2150 = vmatpush3.bf16.msra.mxu0 %v2257_v24 }
 0x583   :  { %2173 = vmatprep.subr.bf16.mxu0 %v2346_v25 }
 0x5fa   :  { %v805_v56 = vpop.xlane.xlu0 %804 }
 0x5fb   :  { %v809_v49 = vmul.f32 0.015625, %v805_v56 }
 0x5fd   :  { %v811_v51 = vsub.f32 %v797_v38, %v809_v49 }
 0x5ff   :  { %v813_v52 = vmul.f32 %v811_v51, %v811_v51 }
 0x600   :  { %v808_v57 = vpop.xlane.xlu1 %807 }
 0x601   :  { %v810_v0 = vmul.f32 0.015625, %v808_v57  ;;  %v815_v54 = vsel %vm254_vm1, %v813_v52, 0.0 }
 0x602   :  { %816 = vadd.xlane.f32.xlu0 %v815_v54 }
 0x603   :  { %v812_v55 = vsub.f32 %v798_v46, %v810_v0  ;;  %v2010_v0 = vld [vmem:[%s3167_s13 + $0x1] ss:$0 sm:$0xff]  ;;  %s2363_s13 = smov 6  }
 0x605   :  { %v814_v58 = vmul.f32 %v812_v55, %v812_v55 }
 0x607   :  { %v818_v61 = vsel %vm254_vm1, %v814_v58, 0.0 }
 0x608   :  { %819 = vadd.xlane.f32.xlu1 %v818_v61 }
 0x68b   :  { %v817_v3 = vpop.xlane.xlu0 %816 }
 0x68c   :  { %v821_v4 = vmul.f32 0.015625, %v817_v3 }
 0x68e   :  { %v823_v5 = vadd.f32 1e-06, %v821_v4 }
 0x690   :  { %2276 = vrsqrt.f32 %v823_v5 }
 0x691   :  { %v820_v6 = vpop.xlane.xlu1 %819 }
 0x692   :  { %v822_v7 = vmul.f32 0.015625, %v820_v6 }
 0x694   :  { %v824_v9 = vadd.f32 1e-06, %v822_v7 }
 0x696   :  { %2278 = vrsqrt.f32 %v824_v9 }
 0x69d   :  { %v2277_v10 = vpop.eup %2276 }
 0x69e   :  { %v827_v60 = vmul.f32 %v2277_v10, %v811_v51 }
 0x6a0   :  { %v835_v15 = vmul.f32 %v1976_v11, %v827_v60 }
 0x6a2   :  { %v843_v14 = vadd.f32 %v1977_v16, %v835_v15 }
 0x6a3   :  { %v2279_v13 = vpop.eup %2278 }
 0x6a4   :  { %v828_v63 = vmul.f32 %v2279_v13, %v812_v55  ;;  %v2020_v55 = vld [vmem:[%s3168_s14 + $0x1] ss:$0 sm:$0xff]  ;;  %s1888_s14 = sld [smem:[#allocation5]] }
 0x6a6   :  { %v836_v17 = vmul.f32 %v1976_v11, %v828_v63 }
 0x6a8   :  { %v844_v18 = vadd.f32 %v1977_v16, %v836_v17 }
 0x6aa   :  { %v845_v8 = vpack.c.bf16 %v844_v18, %v843_v14  ;;  %v2259_v14 = vld [vmem:[%s3171_s17 + $0x10] sm:$0xff]   ;;  %v2260_v18 = vld [vmem:[%s3171_s17 + $0x8] sm:$0xff]  }
 0x6ac   :  { %2132 = vmatmul.mubr.msk.bf16.vlgmr.msra.gmra.mxu1 %vm254_vm1, %v845_v8  ;;  %v2261_v8 = vld [vmem:[%s3171_s17] sm:$0xff]  }
 0x6ad   :  { %2163 = vmatprep.mubr.msk.bf16.mxu1 %vm2347_vm14, %v2346_v25 }
 0x76c   :  { %v924_v27 = vpop.f32.mrf.mxu1 }
 0x76d   :  { %v925_v28 = vadd.f32 %v1987_v26, %v924_v27 }
 0x76e   :  { %v2133_v29 = vpop.f32.mrf.mxu1 }
 0x76f   :  { %v931_v30 = vmul.f32 %v925_v28, %v925_v28 }
 0x770   :  { %v927_v31 = vpop.f32.mrf.mxu1 }
 0x771   :  { %v933_v32 = vmul.f32 %v931_v30, %v925_v28  ;;  %v928_v53 = vadd.f32 %v1987_v26, %v927_v31  ;;  %v2021_v26 = vld [vmem:[%s3169_s15] ss:$0 sm:$0xff]  ;;  %s2354_s15 = smov 119  }
 0x772   :  { %v2134_v33 = vpop.f32.mrf.mxu1  ;;  %v2022_v30 = vld [vmem:[%s3195_s26] ss:$0 sm:$0xff] }
 0x773   :  { %v935_v34 = vmul.f32 0.044715, %v933_v32  ;;  %v932_v35 = vmul.f32 %v928_v53, %v928_v53 }
 0x775   :  { %v937_v36 = vadd.f32 %v935_v34, %v925_v28  ;;  %v934_v38 = vmul.f32 %v932_v35, %v928_v53  ;;  %v2023_v34 = vld [vmem:[%s3172_s18] ss:$0 sm:$0xff] }
 0x777   :  { %v939_v39 = vmul.f32 0.7978846, %v937_v36  ;;  %v936_v40 = vmul.f32 0.044715, %v934_v38 }
 0x779   :  { %2280 = vtanh.f32 %v939_v39  ;;  %v938_v43 = vadd.f32 %v936_v40, %v928_v53 }
 0x77b   :  { %v940_v50 = vmul.f32 0.7978846, %v938_v43 }
 0x77d   :  { %2282 = vtanh.f32 %v940_v50 }
 0x786   :  { %v2281_v44 = vpop.eup %2280 }
 0x787   :  { %v943_v45 = vadd.f32 1.0, %v2281_v44 }
 0x789   :  { %v945_v47 = vmul.f32 0.5, %v943_v45 }
 0x78a   :  { %v2283_v46 = vpop.eup %2282 }
 0x78b   :  { %v944_v56 = vadd.f32 1.0, %v2283_v46  ;;  %v947_v51 = vmul.f32 %v945_v47, %v925_v28 }
 0x78d   :  { %v946_v49 = vmul.f32 0.5, %v944_v56 }
 0x78f   :  { %v948_v52 = vmul.f32 %v946_v49, %v928_v53 }
 0x791   :  { %v949_v57 = vpack.c.bf16 %v948_v52, %v947_v51 }
 0x793   :  { %2152 = vmatmul.mubr.bf16.vlgmr.msra.gmra.mxu0 %v949_v57 }
 0x794   :  { %2175 = vmatprep.mubr.msk.bf16.mxu0 %vm2347_vm14, %v2346_v25 }
 0x853   :  { %v1057_v54 = vpop.f32.mrf.mxu0 }
 0x854   :  { %v1058_v58 = vadd.f32 %v2010_v0, %v1057_v54 }
 0x855   :  { %v2153_v61 = vpop.f32.mrf.mxu0 }
 0x856   :  { %v1072_v62 = vmul.f32 %v2020_v55, %v1058_v58 }
 0x857   :  { %v1060_v1 = vpop.f32.mrf.mxu0 }
 0x858   :  { %v1061_v59 = vadd.f32 %v2010_v0, %v1060_v1  ;;  %v1074_v2 = vadd.f32 %v1072_v62, %v2704_v37 }
 0x859   :  { %v2154_v3 = vpop.f32.mrf.mxu0 }
 0x85a   :  { %v1073_v4 = vmul.f32 %v2020_v55, %v1061_v59  ;;  %v1078_v5 = vsel %vm254_vm1, %v1074_v2, 0.0 }
 0x85b   :  { %1079 = vadd.xlane.f32.xlu0 %v1078_v5 }
 0x85c   :  { %v1075_v6 = vadd.f32 %v1073_v4, %v2709_v41  ;;  %v2258_v41 = vld [vmem:[%s3171_s17 + $0x18] sm:$0xff]  }
 0x85d   :  { %2156 = vmatpush3.bf16.msra.mxu1 %v2258_v41 }
 0x85e   :  { %v1081_v7 = vsel %vm254_vm1, %v1075_v6, 0.0  ;;  %2157 = vmatprep.subr.bf16.mxu1 %v2346_v25 }
 0x85f   :  { %1082 = vadd.xlane.f32.xlu1 %v1081_v7 }
 0x861   :  { %2158 = vmatpush3.bf16.msra.mxu1 %v2259_v14  ;;  %v2352_v14 = vmov 920167782  }
 0x862   :  { %2159 = vmatprep.subr.bf16.mxu1 %v2346_v25 }
 0x865   :  { %2160 = vmatpush3.bf16.msra.mxu1 %v2260_v18 }
 0x866   :  { %2161 = vmatprep.subr.bf16.mxu1 %v2346_v25 }
 0x869   :  { %2162 = vmatpush3.bf16.msra.mxu1 %v2261_v8 }
 0x86a   :  { %2167 = vmatprep.subr.bf16.mxu1 %v2346_v25 }
 0x8e4   :  { %v1080_v9 = vpop.xlane.xlu0 %1079 }
 0x8e5   :  { %v1084_v10 = vmul.f32 0.015625, %v1080_v9 }
 0x8e7   :  { %v1086_v60 = vsub.f32 %v1074_v2, %v1084_v10 }
 0x8e8   :  { %v1083_v11 = vpop.xlane.xlu1 %1082 }
 0x8e9   :  { %v1085_v13 = vmul.f32 0.015625, %v1083_v11  ;;  %v1088_v63 = vmul.f32 %v1086_v60, %v1086_v60 }
 0x8eb   :  { %v1087_v15 = vsub.f32 %v1075_v6, %v1085_v13  ;;  %v1090_v16 = vsel %vm254_vm1, %v1088_v63, 0.0  ;;  %v2349_v13 = vmov 2475754826  }
 0x8ec   :  { %1091 = vadd.xlane.f32.xlu0 %v1090_v16  ;;  %v2350_v16 = vmov 2131351028  }
 0x8ed   :  { %v1089_v37 = vmul.f32 %v1087_v15, %v1087_v15 }
 0x8ef   :  { %v1093_v17 = vsel %vm254_vm1, %v1089_v37, 0.0 }
 0x8f0   :  { %1094 = vadd.xlane.f32.xlu1 %v1093_v17  ;;  %v2351_v17 = vmov 2102212464  }
 0x975   :  { %v1092_v19 = vpop.xlane.xlu0 %1091 }
 0x976   :  { %v1096_v48 = vmul.f32 0.015625, %v1092_v19 }
 0x978   :  { %v1098_v12 = vadd.f32 1e-06, %v1096_v48 }
 0x979   :  { %v1095_v21 = vpop.xlane.xlu1 %1094 }
 0x97a   :  { %2284 = vrsqrt.f32 %v1098_v12  ;;  %v1097_v20 = vmul.f32 0.015625, %v1095_v21  ;;  %v2353_v12 = vmov 1326507024  }
 0x97c   :  { %v1099_v22 = vadd.f32 1e-06, %v1097_v20 }
 0x97e   :  { %2286 = vrsqrt.f32 %v1099_v22 }
 0x987   :  { %v2285_v23 = vpop.eup %2284 }
 0x988   :  { %v1102_v24 = vmul.f32 %v2285_v23, %v1086_v60  ;;  %v2348_v60 = vmov 683565275  }
 0x98a   :  { %v1110_v29 = vmul.f32 %v2021_v26, %v1102_v24 }
 0x98b   :  { %v2287_v27 = vpop.eup %2286 }
 0x98c   :  { %v1103_v28 = vmul.f32 %v2287_v27, %v1087_v15  ;;  %v1118_v32 = vadd.f32 %v2022_v30, %v1110_v29 }
 0x98e   :  { %v1111_v31 = vmul.f32 %v2021_v26, %v1103_v28 }
 0x990   :  { %v1119_v53 = vadd.f32 %v2022_v30, %v1111_v31 }
 0x992   :  { %v1120_v33 = vpack.c.bf16 %v1119_v53, %v1118_v32 }
 0x994   :  { %2164 = vmatmul.mubr.msk.bf16.vlgmr.msra.gmra.mxu1 %vm254_vm1, %v1120_v33 }
 0x995   :  { %2169 = vmatprep.mubr.msk.bf16.mxu1 %vm2347_vm14, %v2346_v25 }
 0xa54   :  { %v1197_v35 = vpop.f32.mrf.mxu1 }
 0xa55   :  { %v2863_v36 = vadd.f32 %v2023_v34, %v1197_v35 }
 0xa56   :  { %v2165_v38 = vpop.f32.mrf.mxu1 }
 0xa57   :  { %v1213_v39 = vand.u32 2139095040, %v2863_v36  ;;  %v1210_v40 = vand.u32 2147483647, %v2863_v36  ;;  %v2868_v50 = vadd.f32 -1.5707964, %v2863_v36 }
 0xa58   :  { %v1200_v43 = vpop.f32.mrf.mxu1 }
 0xa59   :  { %v1214_v44 = vshrl.u32 %v1213_v39, 23  ;;  %v2870_v45 = vadd.f32 %v2023_v34, %v1200_v43  ;;  %v1217_v47 = vand.u32 8388607, %v1210_v40  ;;  %v1431_v56 = vand.u32 2139095040, %v2868_v50 }
 0xa5a   :  { %v2166_v46 = vpop.f32.mrf.mxu1  ;;  %v1428_v52 = vand.u32 2147483647, %v2868_v50 }
 0xa5b   :  { %v2029_v49 = vadd.s32 4294967169, %v1214_v44  ;;  %v1316_v51 = vand.u32 2139095040, %v2870_v45  ;;  %v1432_v57 = vshrl.u32 %v1431_v56, 23  ;;  %v1218_v55 = vor.u32 8388608, %v1217_v47 }
 0xa5c   :  { %v1435_v62 = vand.u32 8388607, %v1428_v52  ;;  %v1313_v5 = vand.u32 2147483647, %v2870_v45 }
 0xa5d   :  { %v1220_v0 = vadd.s32 1, %v2029_v49  ;;  %v1317_v54 = vshrl.u32 %v1316_v51, 23  ;;  %v2039_v58 = vadd.s32 4294967169, %v1432_v57  ;;  %v2879_v4 = vshll.u32 %v1218_v55, 8 }
 0xa5e   :  { %v1436_v9 = vor.u32 8388608, %v1435_v62 }
 0xa5f   :  { %vm1221_vm15 = vcmp.gt.s32.totalorder %v1220_v0, 0  ;;  %v2033_v61 = vadd.s32 4294967169, %v1317_v54  ;;  %v1438_v59 = vadd.s32 1, %v2039_v58 }
 0xa60   :  { %v1222_v1 = vsel %vm1221_vm15, %v1220_v0, 0  ;;  %v2898_v24 = vshll.u32 %v1436_v9, 8 }
 0xa61   :  { %v1224_v2 = vand.u32 31, %v1222_v1  ;;  %v1323_v3 = vadd.s32 1, %v2033_v61  ;;  %v1223_v6 = vshrl.u32 %v1222_v1, 5  ;;  %vm1439_vm1 = vcmp.gt.s32.totalorder %v1438_v59, 0 }
 0xa62   :  { %v1440_v30 = vsel %vm1439_vm1, %v1438_v59, 0 }
 0xa63   :  { %vm1324_vm0 = vcmp.gt.s32.totalorder %v1323_v3, 0  ;;  %v1225_v7 = vsub.s32 32, %v1224_v2  ;;  %v1227_v11 = vshll.u32 %v2348_v60, %v1224_v2  ;;  %v1230_v63 = vshll.u32 %v2349_v13, %v1224_v2 }
 0xa64   :  { %v2882_v10 = vsel %vm1324_vm0, %v1323_v3, 0  ;;  %v1233_v37 = vshll.u32 %v2350_v16, %v1224_v2  ;;  %v1236_v41 = vshll.u32 %v2351_v17, %v1224_v2  ;;  %v1239_v18 = vshll.u32 %v2352_v14, %v1224_v2 }
 0xa65   :  { %v1228_v15 = vshrl.u32 %v2349_v13, %v1225_v7  ;;  %v1231_v8 = vshrl.u32 %v2350_v16, %v1225_v7  ;;  %v1234_v19 = vshrl.u32 %v2351_v17, %v1225_v7  ;;  %v1237_v48 = vshrl.u32 %v2352_v14, %v1225_v7 }
 0xa66   :  { %v1240_v21 = vshrl.u32 %v2353_v12, %v1225_v7  ;;  %v2895_v20 = vand.u32 31, %v2882_v10  ;;  %v1226_v22 = vshrl.u32 %v2348_v60, %v1225_v7  ;;  %vm1242_vm2 = vcmp.lt.s32.totalorder %v1223_v6, 1 }
 0xa67   :  { %v1229_v23 = vor.u32 %v1228_v15, %v1227_v11  ;;  %v1232_v26 = vor.u32 %v1231_v8, %v1230_v63  ;;  %v1235_v27 = vor.u32 %v1234_v19, %v1233_v37  ;;  %v1238_v28 = vor.u32 %v1237_v48, %v1236_v41 }
 0xa68   :  { %v1241_v29 = vor.u32 %v1240_v21, %v1239_v18  ;;  %vm1244_vm3 = vcmp.lt.s32.totalorder %v1223_v6, 3  ;;  %vm1245_vm4 = vcmp.lt.s32.totalorder %v1223_v6, 4  ;;  %vm1243_vm5 = vcmp.lt.s32.totalorder %v1223_v6, 2 }
 0xa69   :  { %v1247_v31 = vsel %vm1245_vm4, %v1235_v27, 2102212464  ;;  %v1250_v32 = vsel %vm1242_vm2, %v1229_v23, %v1232_v26  ;;  %v1251_v53 = vsel %vm1245_vm4, %v1238_v28, 920167782  ;;  %v1254_v33 = vsel %vm1242_vm2, %v1232_v26, %v1235_v27 }
 0xa6a   :  { %v1246_v34 = vsel %vm1242_vm2, %v1226_v22, %v1229_v23  ;;  %v1252_v35 = vsel %vm1244_vm3, %v1235_v27, %v1251_v53  ;;  %v1255_v38 = vsel %vm1245_vm4, %v1241_v29, 1326507024  ;;  %v1248_v39 = vsel %vm1244_vm3, %v1232_v26, %v1247_v31 }
 0xa6b   :  { %v1253_v43 = vsel %vm1243_vm5, %v1250_v32, %v1252_v35  ;;  %v1256_v44 = vsel %vm1244_vm3, %v1238_v28, %v1255_v38  ;;  %v1442_v46 = vand.u32 31, %v1440_v30  ;;  %v2907_v51 = vsub.s32 32, %v2895_v20 }
 0xa6c   :  { %v1257_v47 = vsel %vm1243_vm5, %v1254_v33, %v1256_v44  ;;  %v2902_v56 = vmul.u32.u64.low %v2879_v4, %v1253_v43  ;;  %v2903_v49 = vmul.u32.u64.high %v2879_v4, %v1253_v43, %v2902_v56  ;;  %v1441_v54 = vshrl.u32 %v1440_v30, 5 }
 0xa6d   :  { %v2910_v57 = vmul.u32.u64.low %v2879_v4, %v1257_v47  ;;  %v2911_v0 = vmul.u32.u64.high %v2879_v4, %v1257_v47, %v2910_v57  ;;  %v1443_v55 = vsub.s32 32, %v1442_v46  ;;  %v1249_v58 = vsel %vm1243_vm5, %v1246_v34, %v1248_v39 }
 0xa6e   :  { %v1445_v61 = vshll.u32 %v2348_v60, %v1442_v46  ;;  %v1448_v62 = vshll.u32 %v2349_v13, %v1442_v46  ;;  %v1451_v1 = vshll.u32 %v2350_v16, %v1442_v46  ;;  %v1454_v6 = vshll.u32 %v2351_v17, %v1442_v46 }
 0xa6f   :  { %v1446_v59 = vshrl.u32 %v2349_v13, %v1443_v55  ;;  %v1449_v2 = vshrl.u32 %v2350_v16, %v1443_v55  ;;  %v1452_v3 = vshrl.u32 %v2351_v17, %v1443_v55  ;;  %v1268_v7 = vadd.s32 1, %v2903_v49 }
 0xa70   :  { %v1455_v9 = vshrl.u32 %v2352_v14, %v1443_v55  ;;  %v1457_v11 = vshll.u32 %v2352_v14, %v1442_v46  ;;  %v1458_v63 = vshrl.u32 %v2353_v12, %v1443_v55  ;;  %v1265_v15 = vmul.u32 %v2879_v4, %v1249_v58 }
 0xa71   :  { %vm1267_vm6 = vc.u32 %v2911_v0, %v2902_v56  ;;  %v1447_v37 = vor.u32 %v1446_v59, %v1445_v61  ;;  %v1450_v41 = vor.u32 %v1449_v2, %v1448_v62  ;;  %v1453_v8 = vor.u32 %v1452_v3, %v1451_v1 }
 0xa72   :  { %v1269_v18 = vsel %vm1267_vm6, %v1268_v7, %v2903_v49  ;;  %v1456_v19 = vor.u32 %v1455_v9, %v1454_v6  ;;  %v1459_v48 = vor.u32 %v1458_v63, %v1457_v11  ;;  %v1444_v22 = vshrl.u32 %v2348_v60, %v1443_v55 }
 0xa73   :  { %v1270_v21 = vadd.s32 %v1269_v18, %v1265_v15  ;;  %vm1460_vm7 = vcmp.lt.s32.totalorder %v1441_v54, 1  ;;  %vm1463_vm8 = vcmp.lt.s32.totalorder %v1441_v54, 4  ;;  %vm1462_vm9 = vcmp.lt.s32.totalorder %v1441_v54, 3 }
 0xa74   :  { %v1465_v23 = vsel %vm1463_vm8, %v1453_v8, 2102212464  ;;  %v1468_v26 = vsel %vm1460_vm7, %v1447_v37, %v1450_v41  ;;  %v1469_v27 = vsel %vm1463_vm8, %v1456_v19, 920167782  ;;  %vm1461_vm10 = vcmp.lt.s32.totalorder %v1441_v54, 2 }
 0xa75   :  { %v1271_v4 = vadd.s32 536870912, %v1270_v21  ;;  %v1470_v28 = vsel %vm1462_vm9, %v1453_v8, %v1469_v27  ;;  %v1472_v29 = vsel %vm1460_vm7, %v1450_v41, %v1453_v8  ;;  %v1464_v30 = vsel %vm1460_vm7, %v1444_v22, %v1447_v37 }
 0xa76   :  { %v1466_v31 = vsel %vm1462_vm9, %v1450_v41, %v1465_v23  ;;  %v1471_v32 = vsel %vm1461_vm10, %v1468_v26, %v1470_v28  ;;  %v1473_v53 = vsel %vm1463_vm8, %v1459_v48, 1326507024  ;;  %v1320_v43 = vand.u32 8388607, %v1313_v5 }
 0xa77   :  { %v2929_v33 = vshrl.u32 %v1271_v4, 30  ;;  %v1474_v34 = vsel %vm1462_vm9, %v1456_v19, %v1473_v53  ;;  %v2932_v35 = vmul.u32.u64.low %v2898_v24, %v1471_v32  ;;  %v2933_v38 = vmul.u32.u64.high %v2898_v24, %v1471_v32, %v2932_v35 }
 0xa78   :  { %v1475_v39 = vsel %vm1461_vm10, %v1472_v29, %v1474_v34  ;;  %v1467_v49 = vsel %vm1461_vm10, %v1464_v30, %v1466_v31  ;;  %v2944_v57 = vadd.f32 -1.5707964, %v2870_v45  ;;  %v1334_v58 = vshrl.u32 %v2350_v16, %v2907_v51 }
 0xa79   :  { %v1273_v44 = vshll.u32 %v2929_v33, 30  ;;  %v2940_v46 = vmul.u32.u64.low %v2898_v24, %v1475_v39  ;;  %v2941_v47 = vmul.u32.u64.high %v2898_v24, %v1475_v39, %v2940_v46  ;;  %v1486_v55 = vadd.s32 1, %v2933_v38 }
 0xa7a   :  { %v1337_v61 = vshrl.u32 %v2351_v17, %v2907_v51  ;;  %v1321_v62 = vor.u32 8388608, %v1320_v43  ;;  %v1331_v1 = vshrl.u32 %v2349_v13, %v2907_v51  ;;  %v1333_v59 = vshll.u32 %v2349_v13, %v2895_v20 }
 0xa7b   :  { %v2946_v54 = vsub.s32 %v1270_v21, %v1273_v44  ;;  %v1340_v2 = vshrl.u32 %v2352_v14, %v2907_v51  ;;  %vm1485_vm11 = vc.u32 %v2941_v47, %v2932_v35  ;;  %v1336_v6 = vshll.u32 %v2350_v16, %v2895_v20 }
 0xa7c   :  { %v1339_v7 = vshll.u32 %v2351_v17, %v2895_v20  ;;  %v1326_v9 = vshrl.u32 %v2882_v10, 5  ;;  %v1483_v11 = vmul.u32 %v2898_v24, %v1467_v49  ;;  %v1487_v63 = vsel %vm1485_vm11, %v1486_v55, %v2933_v38 }
 0xa7d   :  { %v1276_v3 = vsub.s32 0, %v2946_v54  ;;  %v1330_v15 = vshll.u32 %v2348_v60, %v2895_v20  ;;  %v1335_v41 = vor.u32 %v1334_v58, %v1333_v59  ;;  %v1338_v18 = vor.u32 %v1337_v61, %v1336_v6 }
 0xa7e   :  { %v1341_v8 = vor.u32 %v1340_v2, %v1339_v7  ;;  %v1488_v19 = vadd.s32 %v1487_v63, %v1483_v11  ;;  %v1342_v21 = vshll.u32 %v2352_v14, %v2895_v20  ;;  %v1343_v10 = vshrl.u32 %v2353_v12, %v2907_v51 }
 0xa7f   :  { %v2030_v37 = vmin.u32 %v1276_v3, %v2946_v54  ;;  %v1332_v48 = vor.u32 %v1331_v1, %v1330_v15  ;;  %v1329_v24 = vshrl.u32 %v2348_v60, %v2907_v51  ;;  %v1361_v23 = vshll.u32 %v1321_v62, 8 }
 0xa80   :  { %v1534_v26 = vand.u32 2139095040, %v2944_v57  ;;  %v1489_v27 = vadd.s32 536870912, %v1488_v19  ;;  %v1344_v4 = vor.u32 %v1343_v10, %v1342_v21  ;;  %vm1345_vm12 = vcmp.lt.s32.totalorder %v1326_v9, 1 }
 0xa81   :  { %v1278_v22 = vclz %v2030_v37  ;;  %vm1348_vm13 = vcmp.lt.s32.totalorder %v1326_v9, 4  ;;  %vm1347_vm14 = vcmp.lt.s32.totalorder %v1326_v9, 3  ;;  %v1357_v30 = vsel %vm1345_vm12, %v1335_v41, %v1338_v18 }
 0xa82   :  { %v1354_v29 = vsel %vm1348_vm13, %v1341_v8, 920167782  ;;  %v2980_v20 = vshrl.u32 %v1489_v27, 30  ;;  %v1353_v31 = vsel %vm1345_vm12, %v1332_v48, %v1335_v41  ;;  %v1358_v53 = vsel %vm1348_vm13, %v1344_v4, 1326507024 }
 0xa83   :  { %v2031_v28 = vadd.s32 4294967294, %v1278_v22  ;;  %v1355_v32 = vsel %vm1347_vm14, %v1338_v18, %v1354_v29  ;;  %vm1346_vm0 = vcmp.lt.s32.totalorder %v1326_v9, 2  ;;  %v1350_v51 = vsel %vm1348_vm13, %v1338_v18, 2102212464 }
 0xa84   :  { %v1359_v34 = vsel %vm1347_vm14, %v1341_v8, %v1358_v53  ;;  %v1266_v38 = vadd.s32 %v2902_v56, %v2911_v0  ;;  %v1491_v43 = vshll.u32 %v2980_v20, 30  ;;  %v1349_v55 = vsel %vm1345_vm12, %v1329_v24, %v1332_v48 }
 0xa85   :  { %vm2032_vm15 = vcmp.lt.s32.totalorder %v2031_v28, 0  ;;  %v1360_v44 = vsel %vm1346_vm0, %v1357_v30, %v1359_v34  ;;  %v1356_v58 = vsel %vm1346_vm0, %v1353_v31, %v1355_v32  ;;  %v1351_v62 = vsel %vm1347_vm14, %v1335_v41, %v1350_v51 }
 0xa86   :  { %v1281_v39 = vsel %vm2032_vm15, 0, %v2031_v28  ;;  %v1492_v61 = vsub.s32 %v1488_v19, %v1491_v43  ;;  %v2992_v1 = vmul.u32.u64.low %v1361_v23, %v1360_v44  ;;  %v2993_v59 = vmul.u32.u64.high %v1361_v23, %v1360_v44, %v2992_v1 }
 0xa87   :  { %v1282_v46 = vsub.s32 32, %v1281_v39  ;;  %v1286_v49 = vsub.s32 4294967266, %v1281_v39  ;;  %v1283_v2 = vshll.u32 %v2946_v54, %v1281_v39  ;;  %v1535_v3 = vshrl.u32 %v1534_v26, 23 }
 0xa88   :  { %v1494_v6 = vsub.s32 0, %v1492_v61  ;;  %v2996_v7 = vmul.u32.u64.low %v1361_v23, %v1356_v58  ;;  %v2997_v11 = vmul.u32.u64.high %v1361_v23, %v1356_v58, %v2996_v7  ;;  %v1296_v18 = vsub.s32 4, %v2929_v33 }
 0xa89   :  { %v1284_v56 = vshrl.u32 %v1266_v38, %v1282_v46  ;;  %v1287_v0 = vadd.s32 127, %v1286_v49  ;;  %v2043_v37 = vadd.s32 4294967169, %v1535_v3  ;;  %v1352_v41 = vsel %vm1346_vm0, %v1349_v55, %v1351_v62 }
 0xa8a   :  { %v2040_v8 = vmin.u32 %v1494_v6, %v1492_v61  ;;  %vm1370_vm1 = vc.u32 %v2993_v59, %v2996_v7  ;;  %vm1212_vm2 = vcmp.lt.s32.totalorder %v2863_v36, 0  ;;  %v1371_v48 = vadd.s32 1, %v2997_v11 }
 0xa8b   :  { %v1285_v63 = vor.u32 %v1284_v56, %v1283_v2  ;;  %v1288_v15 = vshll.u32 %v1287_v0, 23  ;;  %v1541_v21 = vadd.s32 1, %v2043_v37  ;;  %v1368_v24 = vmul.u32 %v1361_v23, %v1352_v41 }
 0xa8c   :  { %v1496_v54 = vclz %v2040_v8  ;;  %v1531_v26 = vand.u32 2147483647, %v2944_v57  ;;  %v1297_v9 = vsel %vm1212_vm2, %v1296_v18, %v2929_v33  ;;  %v1372_v4 = vsel %vm1370_vm1, %v1371_v48, %v2997_v11 }
 0xa8d   :  { %v1289_v19 = vor.u32 4788187, %v1288_v15  ;;  %v1292_v22 = vcvt.s32.f32 %v1285_v63  ;;  %vm1542_vm3 = vcmp.gt.s32.totalorder %v1541_v21, 0  ;;  %v1373_v29 = vadd.s32 %v1372_v4, %v1368_v24 }
 0xa8e   :  { %v2041_v27 = vadd.s32 4294967294, %v1496_v54  ;;  %v1543_v30 = vsel %vm1542_vm3, %v1541_v21, 0  ;;  %vm3013_vm4 = vcmp.le.f32.partialorder %v1210_v40, 0.7853982  ;;  %v1484_v34 = vadd.s32 %v2932_v35, %v2941_v47 }
 0xa8f   :  { %v1290_v10 = vand.u32 2147483647, %v1289_v19  ;;  %v1545_v23 = vand.u32 31, %v1543_v30  ;;  %v1299_v53 = vsel %vm3013_vm4, 0, %v1297_v9  ;;  %v1374_v51 = vadd.s32 536870912, %v1373_v29 }
 0xa90   :  { %vm2042_vm5 = vcmp.lt.s32.totalorder %v2041_v27, 0  ;;  %v1538_v43 = vand.u32 8388607, %v1531_v26  ;;  %v3030_v35 = vand.u32 3, %v1299_v53  ;;  %vm1430_vm6 = vcmp.lt.s32.totalorder %v2868_v50, 0 }
 0xa91   :  { %v1293_v28 = vmul.f32 %v1292_v22, %v1290_v10  ;;  %v1499_v33 = vsel %vm2042_vm5, 0, %v2041_v27  ;;  %v3025_v44 = vshrl.u32 %v1374_v51, 30  ;;  %v1546_v46 = vsub.s32 32, %v1545_v23 }
 0xa92   :  { %v1500_v38 = vsub.s32 32, %v1499_v33  ;;  %v1504_v39 = vsub.s32 4294967266, %v1499_v33  ;;  %v1501_v55 = vshll.u32 %v1492_v61, %v1499_v33  ;;  %v1539_v56 = vor.u32 8388608, %v1538_v43 }
 0xa93   :  { %v1294_v32 = vxor.u32 2147483648, %v1293_v28  ;;  %v1376_v47 = vshll.u32 %v3025_v44, 30  ;;  %v3036_v3 = vshrl.u32 %v1543_v30, 5  ;;  %v1549_v6 = vshrl.u32 %v2349_v13, %v1546_v46 }
 0xa94   :  { %v1502_v58 = vshrl.u32 %v1484_v34, %v1500_v38  ;;  %v1505_v62 = vadd.s32 127, %v1504_v39  ;;  %v1552_v61 = vshrl.u32 %v2350_v16, %v1546_v46  ;;  %vm3042_vm7 = vcmp.le.f32.partialorder %v1428_v52, 0.7853982 }
 0xa95   :  { %v1295_v40 = vsel %vm1212_vm2, %v1294_v32, %v1293_v28  ;;  %v3034_v0 = vsub.s32 %v1373_v29, %v1376_v47  ;;  %v1548_v15 = vshll.u32 %v2348_v60, %v1545_v23  ;;  %v1551_v37 = vshll.u32 %v2349_v13, %v1545_v23 }
 0xa96   :  { %v1298_v49 = vsel %vm3013_vm4, %v2863_v36, %v1295_v40  ;;  %v1503_v1 = vor.u32 %v1502_v58, %v1501_v55  ;;  %v1506_v2 = vshll.u32 %v1505_v62, 23  ;;  %v1554_v18 = vshll.u32 %v2350_v16, %v1545_v23 }
 0xa97   :  { %2288 = vcosq.f32 %v1298_v49  ;;  %v1379_v41 = vsub.s32 0, %v3034_v0  ;;  %v1555_v19 = vshrl.u32 %v2351_v17, %v1546_v46  ;;  %v1557_v54 = vshll.u32 %v2351_v17, %v1545_v23 }
 0xa98   :  { %2290 = vsinq.f32 %v1298_v49  ;;  %v1507_v63 = vor.u32 4788187, %v1506_v2  ;;  %v1510_v8 = vcvt.s32.f32 %v1503_v1  ;;  %v1558_v52 = vshrl.u32 %v2352_v14, %v1546_v46 }
 0xa99   :  { %v1560_v21 = vshll.u32 %v2352_v14, %v1545_v23  ;;  %v1561_v10 = vshrl.u32 %v2353_v12, %v1546_v46  ;;  %v1514_v22 = vsub.s32 4, %v2980_v20  ;;  %v2034_v13 = vmin.u32 %v1379_v41, %v3034_v0 }
 0xa9a   :  { %v1508_v48 = vand.u32 2147483647, %v1507_v63  ;;  %v1550_v24 = vor.u32 %v1549_v6, %v1548_v15  ;;  %v1553_v16 = vor.u32 %v1552_v61, %v1551_v37  ;;  %vm1308_vm8 = vcmp.eq.s32.totalorder %v3030_v35, 2 }
 0xa9b   :  { %v1556_v27 = vor.u32 %v1555_v19, %v1554_v18  ;;  %v1559_v4 = vor.u32 %v1558_v52, %v1557_v54  ;;  %v1562_v28 = vor.u32 %v1561_v10, %v1560_v21  ;;  %vm1305_vm9 = vcmp.eq.s32.totalorder %v3030_v35, 0 }
 0xa9c   :  { %v1511_v9 = vmul.f32 %v1510_v8, %v1508_v48  ;;  %v1369_v17 = vadd.s32 %v2996_v7, %v2993_v59  ;;  %v1381_v14 = vclz %v2034_v13  ;;  %v1547_v12 = vshrl.u32 %v2348_v60, %v1546_v46 }
 0xa9d   :  { %v1579_v29 = vshll.u32 %v1539_v56, 8  ;;  %vm1304_vm10 = vcmp.lt.s32.totalorder %v3030_v35, 2  ;;  %vm1563_vm11 = vcmp.lt.s32.totalorder %v3036_v3, 1  ;;  %vm1564_vm12 = vcmp.lt.s32.totalorder %v3036_v3, 2 }
 0xa9e   :  { %v1512_v30 = vxor.u32 2147483648, %v1511_v9  ;;  %vm1566_vm13 = vcmp.lt.s32.totalorder %v3036_v3, 4  ;;  %v2035_v31 = vadd.s32 4294967294, %v1381_v14  ;;  %vm1565_vm14 = vcmp.lt.s32.totalorder %v3036_v3, 3 }
 0xa9f   :  { %v1568_v23 = vsel %vm1566_vm13, %v1556_v27, 2102212464  ;;  %v1572_v32 = vsel %vm1566_vm13, %v1559_v4, 920167782  ;;  %v1571_v7 = vsel %vm1563_vm11, %v1550_v24, %v1553_v16  ;;  %v1576_v53 = vsel %vm1566_vm13, %v1562_v28, 1326507024 }
 0xaa0   :  { %v1513_v59 = vsel %vm1430_vm6, %v1512_v30, %v1511_v9  ;;  %v1573_v60 = vsel %vm1565_vm14, %v1556_v27, %v1572_v32  ;;  %vm2036_vm15 = vcmp.lt.s32.totalorder %v2035_v31, 0  ;;  %v1567_v51 = vsel %vm1563_vm11, %v1547_v12, %v1550_v24 }
 0xaa1   :  { %v1516_v33 = vsel %vm3042_vm7, %v2868_v50, %v1513_v59  ;;  %v1575_v34 = vsel %vm1563_vm11, %v1553_v16, %v1556_v27  ;;  %v1384_v39 = vsel %vm2036_vm15, 0, %v2035_v31  ;;  %v1569_v43 = vsel %vm1565_vm14, %v1553_v16, %v1568_v23 }
 0xaa2   :  { %2292 = vcosq.f32 %v1516_v33  ;;  %v1577_v40 = vsel %vm1565_vm14, %v1559_v4, %v1576_v53  ;;  %v1385_v55 = vsub.s32 32, %v1384_v39  ;;  %v1574_v58 = vsel %vm1564_vm12, %v1571_v7, %v1573_v60 }
 0xaa3   :  { %2294 = vsinq.f32 %v1516_v33  ;;  %v1386_v47 = vshll.u32 %v3034_v0, %v1384_v39  ;;  %v1389_v1 = vsub.s32 4294967266, %v1384_v39  ;;  %v1578_v2 = vsel %vm1564_vm12, %v1575_v34, %v1577_v40 }
 0xaa4   :  { %v2289_v38 = vpop.eup %2288  ;;  %v1387_v6 = vshrl.u32 %v1369_v17, %v1385_v55  ;;  %v3079_v61 = vmul.u32.u64.low %v1579_v29, %v1578_v2  ;;  %v3080_v63 = vmul.u32.u64.high %v1579_v29, %v1578_v2, %v3079_v61  ;;  %vm1302_vm0 = vweird.f32 %v2863_v36  ;;  %v2263_v55 = vld [vmem:[%s3173_s19] sm:$0x1f]   ;;  %s2356_s19 = smov 4  }
 0xaa5   :  { %v2291_v46 = vpop.eup %2290  ;;  %v1309_v49 = vxor.u32 2147483648, %v2289_v38  ;;  %v1390_v37 = vadd.s32 127, %v1389_v1  ;;  %v3084_v18 = vmul.u32.u64.low %v1579_v29, %v1574_v58  ;;  %v3085_v8 = vmul.u32.u64.high %v1579_v29, %v1574_v58, %v3084_v18 }
 0xaa6   :  { %v1306_v62 = vxor.u32 2147483648, %v2291_v46  ;;  %v1515_v41 = vsel %vm1430_vm6, %v1514_v22, %v2980_v20  ;;  %v1388_v54 = vor.u32 %v1387_v6, %v1386_v47  ;;  %v1570_v52 = vsel %vm1564_vm12, %v1567_v51, %v1569_v43  ;;  %v2262_v43 = vld [vmem:[%s3174_s20] sm:$0x1f]   ;;  %s2357_s20 = smov 8  }
 0xaa7   :  { %v1310_v56 = vsel %vm1308_vm8, %v1309_v49, %v2291_v46  ;;  %v1391_v48 = vshll.u32 %v1390_v37, 23  ;;  %vm1588_vm1 = vc.u32 %v3080_v63, %v3084_v18  ;;  %v1517_v35 = vsel %vm3042_vm7, 0, %v1515_v41 }
 0xaa8   :  { %v1307_v15 = vsel %vm1305_vm9, %v2289_v38, %v1306_v62  ;;  %v1589_v10 = vadd.s32 1, %v3085_v8  ;;  %v1586_v13 = vmul.u32 %v1579_v29, %v1570_v52  ;;  %v1395_v22 = vcvt.s32.f32 %v1388_v54 }
 0xaa9   :  { %v1311_v0 = vsel %vm1304_vm10, %v1307_v15, %v1310_v56  ;;  %v1392_v21 = vor.u32 4788187, %v1391_v48  ;;  %v1521_v16 = vand.u32 3, %v1517_v35  ;;  %vm1315_vm3 = vcmp.lt.s32.totalorder %v2870_v45, 0 }
 0xaaa   :  { %v1312_v19 = vsel %vm1302_vm0, nan, %v1311_v0  ;;  %v1590_v24 = vsel %vm1588_vm1, %v1589_v10, %v3085_v8  ;;  %vm3108_vm5 = vcmp.le.f32.partialorder %v1313_v5, 0.7853982  ;;  %vm1520_vm7 = vweird.f32 %v2868_v50 }
 0xaab   :  { %1418 = vrot.lane.b32.xlu0 %v1312_v19, %s2354_s15  ;;  %v1393_v20 = vand.u32 2147483647, %v1392_v21  ;;  %v1591_v3 = vadd.s32 %v1590_v24, %v1586_v13  ;;  %vm1526_vm2 = vcmp.eq.s32.totalorder %v1521_v16, 2  ;;  %vm1523_vm4 = vcmp.eq.s32.totalorder %v1521_v16, 0 }
 0xaac   :  { %vm1522_vm6 = vcmp.lt.s32.totalorder %v1521_v16, 2  ;;  %v1399_v60 = vsub.s32 4, %v3025_v44  ;;  %vm1659_vm8 = vcmask 1043456   ;;  %vm1660_vm9 = vcmask 1044480  }
 0xaad   :  { %v1396_v9 = vmul.f32 %v1395_v22, %v1393_v20  ;;  %v1592_v4 = vadd.s32 536870912, %v1591_v3  ;;  %v2355_v46 = vmov 65535   ;;  %v1587_v2 = vadd.s32 %v3084_v18, %v3080_v63 }
 0xaae   :  { %v1400_v51 = vsel %vm1315_vm3, %v1399_v60, %v3025_v44  ;;  %v1661_v49 = vsel %vm1659_vm8, 4294967295, %v2355_v46  ;;  %vm1405_vm14 = vweird.f32 %v2870_v45  ;;  %vm1533_vm15 = vcmp.lt.s32.totalorder %v2944_v57, 0 }
 0xaaf   :  { %v2293_v27 = vpop.eup %2292  ;;  %v1397_v14 = vxor.u32 2147483648, %v1396_v9  ;;  %v3104_v11 = vshrl.u32 %v1592_v4, 30  ;;  %v1402_v38 = vsel %vm3108_vm5, 0, %v1400_v51  ;;  %v1662_v44 = vsel %vm1660_vm9, %v1661_v49, 0 }
 0xab0   :  { %v2295_v28 = vpop.eup %2294  ;;  %v1527_v17 = vxor.u32 2147483648, %v2293_v27  ;;  %v1406_v40 = vand.u32 3, %v1402_v38  ;;  %v1664_v62 = vand.u32 %v2262_v43, %v1662_v44  ;;  %v1716_v47 = vand.u32 %v2263_v55, %v1662_v44 }
 0xab1   :  { %v1524_v12 = vxor.u32 2147483648, %v2295_v28  ;;  %v1398_v31 = vsel %vm1315_vm3, %v1397_v14, %v1396_v9  ;;  %v1594_v59 = vshll.u32 %v3104_v11, 30  ;;  %vm1532_vm0 = vcmp.le.f32.partialorder %v1531_v26, 0.7853982 }
 0xab2   :  { %v1528_v29 = vsel %vm1526_vm2, %v1527_v17, %v2295_v28  ;;  %v1401_v32 = vsel %vm3108_vm5, %v2870_v45, %v1398_v31  ;;  %vm1411_vm11 = vcmp.eq.s32.totalorder %v1406_v40, 2  ;;  %2168 = vmatpush3.bf16.msra.mxu1 %v1664_v62  ;;  %2174 = vmatpush3.bf16.msra.mxu0 %v1716_v47  ;;  %vm1408_vm12 = vcmp.eq.s32.totalorder %v1406_v40, 0 }
 0xab3   :  { %v1525_v23 = vsel %vm1523_vm4, %v2293_v27, %v1524_v12  ;;  %2296 = vcosq.f32 %v1401_v32  ;;  %v1595_v53 = vsub.s32 %v1591_v3, %v1594_v59  ;;  %vm1407_vm13 = vcmp.lt.s32.totalorder %v1406_v40, 2 }
 0xab4   :  { %v1529_v7 = vsel %vm1522_vm6, %v1525_v23, %v1528_v29  ;;  %2298 = vsinq.f32 %v1401_v32  ;;  %v1617_v16 = vsub.s32 4, %v3104_v11  ;;  %vm1623_vm4 = vweird.f32 %v2944_v57 }
 0xab5   :  { %v1530_v5 = vsel %vm1520_vm7, nan, %v1529_v7  ;;  %v1597_v33 = vsub.s32 0, %v1595_v53  ;;  %v1204_v31 = vmul.f32 1.442695, %v2863_v36  ;;  %vm1655_vm5 = vcmask 72704  }
 0xab6   :  { %1636 = vrot.lane.b32.xlu1 %v1530_v5, %s2354_s15  ;;  %v1618_v3 = vsel %vm1533_vm15, %v1617_v16, %v3104_v11  ;;  %v1206_v11 = vmul.f32 1.442695, %v2870_v45  ;;  %vm1759_vm6 = vcmask 353280   ;;  %vm1763_vm7 = vcmask 122880  }
 0xab7   :  { %v2044_v34 = vmin.u32 %v1597_v33, %v1595_v53  ;;  %v1620_v9 = vsel %vm1532_vm0, 0, %v1618_v3  ;;  %1760 = vst.msk [vmem:[#allocation3] sm:$0x3] %vm1759_vm6, %v2346_v25  ;;  %vm1772_vm8 = vcmask 155680   ;;  %vm1780_vm9 = vcmask 188480  }
 0xab8   :  { %v1624_v27 = vand.u32 3, %v1620_v9 }
 0xab9   :  { %v1599_v39 = vclz %v2044_v34 }
 0xaba   :  { %vm1629_vm1 = vcmp.eq.s32.totalorder %v1624_v27, 2  ;;  %vm1626_vm2 = vcmp.eq.s32.totalorder %v1624_v27, 0  ;;  %vm1625_vm3 = vcmp.lt.s32.totalorder %v1624_v27, 2 }
 0xabb   :  { %v2045_v50 = vadd.s32 4294967294, %v1599_v39 }
 0xabd   :  { %vm2046_vm10 = vcmp.lt.s32.totalorder %v2045_v50, 0 }
 0xabe   :  { %v1602_v58 = vsel %vm2046_vm10, 0, %v2045_v50  ;;  %v1761_v55 = vld [vmem:[#allocation3] sm:$0x1]  ;;  %vm1788_vm10 = vcmask 221280  }
 0xabf   :  { %v1603_v56 = vsub.s32 32, %v1602_v58  ;;  %v1607_v6 = vsub.s32 4294967266, %v1602_v58  ;;  %v1604_v8 = vshll.u32 %v1595_v53, %v1602_v58 }
 0xac0   :  { %v2297_v1 = vpop.eup %2296 }
 0xac1   :  { %v2299_v61 = vpop.eup %2298  ;;  %v1412_v15 = vxor.u32 2147483648, %v2297_v1  ;;  %v1605_v0 = vshrl.u32 %v1587_v2, %v1603_v56  ;;  %v1608_v41 = vadd.s32 127, %v1607_v6  ;;  %v1822_v2 = vld [vmem:[#allocation3 + $0x1] sm:$0x1] }
 0xac2   :  { %v1409_v37 = vxor.u32 2147483648, %v2299_v61 }
 0xac3   :  { %v1413_v19 = vsel %vm1411_vm11, %v1412_v15, %v2299_v61  ;;  %v1606_v48 = vor.u32 %v1605_v0, %v1604_v8  ;;  %v1609_v52 = vshll.u32 %v1608_v41, 23  ;;  %vm1796_vm11 = vcmask 254080  }
 0xac4   :  { %v1410_v54 = vsel %vm1408_vm12, %v2297_v1, %v1409_v37  ;;  %vm1804_vm12 = vcmask 286880  }
 0xac5   :  { %v1414_v63 = vsel %vm1407_vm13, %v1410_v54, %v1413_v19  ;;  %v1610_v35 = vor.u32 4788187, %v1609_v52  ;;  %v1613_v10 = vcvt.s32.f32 %v1606_v48  ;;  %vm1812_vm13 = vcmask 319680  }
 0xac6   :  { %v1415_v18 = vsel %vm1405_vm14, nan, %v1414_v63  ;;  %vm1820_vm14 = vcmask 352480  }
 0xac7   :  { %1420 = vrot.lane.b32.xlu1 %v1415_v18, %s2354_s15  ;;  %v1611_v21 = vand.u32 2147483647, %v1610_v35  ;;  %v2051_v18 = vld [vmem:[%s3175_s21] ss:$0 sm:$0xff]  ;;  %s2364_s21 = smov 122  }
 0xac9   :  { %v1614_v13 = vmul.f32 %v1613_v10, %v1611_v21 }
 0xacb   :  { %v1615_v20 = vxor.u32 2147483648, %v1614_v13 }
 0xacd   :  { %v1616_v22 = vsel %vm1533_vm15, %v1615_v20, %v1614_v13 }
 0xace   :  { %v1619_v24 = vsel %vm1532_vm0, %v2944_v57, %v1616_v22  ;;  %vm1896_vm0 = vcmask 253952  }
 0xacf   :  { %2300 = vcosq.f32 %v1619_v24 }
 0xad0   :  { %2302 = vsinq.f32 %v1619_v24 }
 0xad1   :  { %2304 = vpow2.f32 %v1204_v31 }
 0xad2   :  { %2306 = vpow2.f32 %v1206_v11 }
 0xadc   :  { %v2301_v4 = vpop.eup %2300 }
 0xadd   :  { %v2303_v28 = vpop.eup %2302  ;;  %v1630_v17 = vxor.u32 2147483648, %v2301_v4 }
 0xade   :  { %v1627_v14 = vxor.u32 2147483648, %v2303_v28  ;;  %v2305_v32 = vpop.eup %2304 }
 0xadf   :  { %v1631_v12 = vsel %vm1629_vm1, %v1630_v17, %v2303_v28  ;;  %v2307_v59 = vpop.eup %2306  ;;  %v1208_v60 = vmin.f32 %v2305_v32, 100.0 }
 0xae0   :  { %v1628_v26 = vsel %vm1626_vm2, %v2301_v4, %v1627_v14  ;;  %v1209_v5 = vmin.f32 %v2307_v59, 100.0 }
 0xae1   :  { %v1632_v29 = vsel %vm1625_vm3, %v1628_v26, %v1631_v12 }
 0xae2   :  { %v1633_v30 = vsel %vm1623_vm4, nan, %v1632_v29 }
 0xae3   :  { %1638 = vrot.lane.b32.xlu1 %v1633_v30, %s2354_s15 }
 0xb1d   :  { %v1419_v7 = vpop.permute.xlu0 %1418 }
 0xb1e   :  { %v1424_v33 = vmul.f32 %v1419_v7, %v1208_v60 }
 0xb28   :  { %v1637_v23 = vpop.permute.xlu1 %1636 }
 0xb29   :  { %v1642_v38 = vmul.f32 %v1637_v23, %v1208_v60 }
 0xb39   :  { %v1421_v53 = vpop.permute.xlu1 %1420 }
 0xb3a   :  { %v1425_v51 = vmul.f32 %v1421_v53, %v1209_v5 }
 0xb3c   :  { %v1644_v57 = vpack.c.bf16 %v1425_v51, %v1424_v33 }
 0xb3e   :  { %2176 = vmatmul.mubr.msk.bf16.vlgmr.msra.gmra.mxu0 %vm1655_vm5, %v1644_v57 }
 0xb55   :  { %v1639_v34 = vpop.permute.xlu1 %1638 }
 0xb56   :  { %v1643_v39 = vmul.f32 %v1639_v34, %v1209_v5 }
 0xb58   :  { %v1647_v36 = vpack.c.bf16 %v1643_v39, %v1642_v38 }
 0xb5a   :  { %2170 = vmatmul.mubr.msk.bf16.vlgmr.msra.gmra.mxu1 %vm1655_vm5, %v1647_v36 }
 0xbfe   :  { %v1752_v45 = vpop.f32.mrf.mxu0 }
 0xc00   :  { %v2177_v50 = vpop.f32.mrf.mxu0 }
 0xc02   :  { %v1755_v43 = vpop.f32.mrf.mxu0 }
 0xc04   :  { %v2178_v40 = vpop.f32.mrf.mxu0 }
 0xc1a   :  { %v1700_v46 = vpop.f32.mrf.mxu1 }
 0xc1b   :  { %v1753_v49 = vadd.f32 %v1752_v45, %v1700_v46 }
 0xc1c   :  { %v2171_v44 = vpop.f32.mrf.mxu1 }
 0xc1d   :  { %v1767_v58 = vrot.slane %v1753_v49, 1  ;;  %v1762_v47 = vadd.f32 %v1761_v55, %v1753_v49  ;;  %v1775_v6 = vrot.slane %v1753_v49, 2  ;;  %v1783_v15 = vrot.slane %v1753_v49, 3 }
 0xc1e   :  { %v1703_v62 = vpop.f32.mrf.mxu1  ;;  %v1791_v8 = vrot.slane %v1753_v49, 4  ;;  %v1799_v41 = vrot.slane %v1753_v49, 5  ;;  %v1807_v54 = vrot.slane %v1753_v49, 6  ;;  %v1815_v52 = vrot.slane %v1753_v49, 7 }
 0xc1f   :  { %v1756_v1 = vadd.f32 %v1755_v43, %v1703_v62  ;;  %1768 = vrot.lane.b32.xlu0 %v1767_v58, %s2356_s19  ;;  %1764 = vst.msk [vmem:[#allocation3] sm:$0x1] %vm1763_vm7, %v1762_v47 }
 0xc20   :  { %v2172_v56 = vpop.f32.mrf.mxu1 }
 0xc21   :  { %v1827_v25 = vrot.slane %v1756_v1, 1  ;;  %v1823_v61 = vadd.f32 %v1822_v2, %v1756_v1  ;;  %v1834_v37 = vrot.slane %v1756_v1, 2  ;;  %v1841_v0 = vrot.slane %v1756_v1, 3 }
 0xc22   :  { %v1848_v19 = vrot.slane %v1756_v1, 4  ;;  %v1855_v48 = vrot.slane %v1756_v1, 5  ;;  %v1862_v63 = vrot.slane %v1756_v1, 6  ;;  %v1869_v35 = vrot.slane %v1756_v1, 7 }
 0xc23   :  { %1776 = vrot.lane.b32.xlu0 %v1775_v6, %s2357_s20  ;;  %1828 = vrot.lane.b32.xlu1 %v1827_v25, %s2356_s19  ;;  %1824 = vst.msk [vmem:[#allocation3 + $0x1] sm:$0x1] %vm1763_vm7, %v1823_v61  ;;  %v1876_v6 = vand.u32 127, %v298_v42  ;;  %v1889_v25 = vstv %s1888_s14  ;;  %v1910_v61 = vstv %s2053_s6 }
 0xc25   :  { %vm1890_vm15 = vcmp.lt.s32.totalorder %v1876_v6, %v1889_v25  ;;  %vm1911_vm1 = vcmp.lt.s32.totalorder %v1876_v6, %v1910_v61 }
 0xc26   :  { %v1765_v10 = vld [vmem:[#allocation3] sm:$0x1] }
 0xc27   :  { %1784 = vrot.lane.b32.xlu0 %v1783_v15, %s2358_s0  ;;  %1835 = vrot.lane.b32.xlu1 %v1834_v37, %s2357_s20 }
 0xc2a   :  { %v1825_v22 = vld [vmem:[#allocation3 + $0x1] sm:$0x1] }
 0xc2b   :  { %1792 = vrot.lane.b32.xlu0 %v1791_v8, %s2359_s23  ;;  %1842 = vrot.lane.b32.xlu1 %v1841_v0, %s2358_s0 }
 0xc2f   :  { %1800 = vrot.lane.b32.xlu0 %v1799_v41, %s2360_s5  ;;  %1849 = vrot.lane.b32.xlu1 %v1848_v19, %s2359_s23 }
 0xc33   :  { %1808 = vrot.lane.b32.xlu0 %v1807_v54, %s2361_s11  ;;  %1856 = vrot.lane.b32.xlu1 %v1855_v48, %s2360_s5 }
 0xc37   :  { %1816 = vrot.lane.b32.xlu0 %v1815_v52, %s2362_s12  ;;  %1863 = vrot.lane.b32.xlu1 %v1862_v63, %s2361_s11 }
 0xc3b   :  { %1870 = vrot.lane.b32.xlu1 %v1869_v35, %s2362_s12  ;;  %1884 = vrot.lane.b32.xlu0 %v2051_v18, %s2363_s13 }
 0xc3f   :  { %1905 = vrot.lane.b32.xlu1 %v2051_v18, %s2363_s13 }
 0xc91   :  { %v1769_v21 = vpop.permute.xlu0 %1768 }
 0xc92   :  { %v1771_v13 = vadd.f32 %v1769_v21, %v1765_v10 }
 0xc94   :  { %1773 = vst.msk [vmem:[#allocation3] sm:$0x1] %vm1772_vm8, %v1771_v13 }
 0xc95   :  { %v1829_v20 = vpop.permute.xlu1 %1828  ;;  %v1777_v16 = vpop.permute.xlu0 %1776 }
 0xc96   :  { %v1831_v24 = vadd.f32 %v1829_v20, %v1825_v22 }
 0xc98   :  { %1832 = vst.msk [vmem:[#allocation3 + $0x1] sm:$0x1] %vm1772_vm8, %v1831_v24 }
 0xc99   :  { %v1836_v27 = vpop.permute.xlu1 %1835  ;;  %v1785_v17 = vpop.permute.xlu0 %1784 }
 0xc9b   :  { %v1774_v3 = vld [vmem:[#allocation3] sm:$0x1] }
 0xc9c   :  { %v1779_v9 = vadd.f32 %v1777_v16, %v1774_v3 }
 0xc9d   :  { %v1843_v26 = vpop.permute.xlu1 %1842  ;;  %v1793_v31 = vpop.permute.xlu0 %1792 }
 0xc9e   :  { %1781 = vst.msk [vmem:[#allocation3] sm:$0x1] %vm1780_vm9, %v1779_v9 }
 0xc9f   :  { %v1833_v4 = vld [vmem:[#allocation3 + $0x1] sm:$0x1] }
 0xca0   :  { %v1838_v28 = vadd.f32 %v1836_v27, %v1833_v4 }
 0xca1   :  { %v1850_v32 = vpop.permute.xlu1 %1849  ;;  %v1801_v60 = vpop.permute.xlu0 %1800 }
 0xca2   :  { %1839 = vst.msk [vmem:[#allocation3 + $0x1] sm:$0x1] %vm1780_vm9, %v1838_v28 }
 0xca5   :  { %v1782_v14 = vld [vmem:[#allocation3] sm:$0x1]  ;;  %v1857_v33 = vpop.permute.xlu1 %1856  ;;  %v1809_v34 = vpop.permute.xlu0 %1808 }
 0xca6   :  { %v1787_v12 = vadd.f32 %v1785_v17, %v1782_v14 }
 0xca8   :  { %1789 = vst.msk [vmem:[#allocation3] sm:$0x1] %vm1788_vm10, %v1787_v12 }
 0xca9   :  { %v1840_v29 = vld [vmem:[#allocation3 + $0x1] sm:$0x1]  ;;  %v1864_v36 = vpop.permute.xlu1 %1863  ;;  %v1817_v43 = vpop.permute.xlu0 %1816 }
 0xcaa   :  { %v1845_v30 = vadd.f32 %v1843_v26, %v1840_v29 }
 0xcac   :  { %1846 = vst.msk [vmem:[#allocation3 + $0x1] sm:$0x1] %vm1788_vm10, %v1845_v30 }
 0xcad   :  { %v1871_v49 = vpop.permute.xlu1 %1870  ;;  %v1885_v58 = vpop.permute.xlu0 %1884 }
 0xcaf   :  { %v1790_v11 = vld [vmem:[#allocation3] sm:$0x1] }
 0xcb0   :  { %v1795_v23 = vadd.f32 %v1793_v31, %v1790_v11 }
 0xcb1   :  { %v1906_v1 = vpop.permute.xlu1 %1905 }
 0xcb2   :  { %1797 = vst.msk [vmem:[#allocation3] sm:$0x1] %vm1796_vm11, %v1795_v23 }
 0xcb3   :  { %v1847_v59 = vld [vmem:[#allocation3 + $0x1] sm:$0x1] }
 0xcb4   :  { %v1852_v7 = vadd.f32 %v1850_v32, %v1847_v59 }
 0xcb6   :  { %1853 = vst.msk [vmem:[#allocation3 + $0x1] sm:$0x1] %vm1796_vm11, %v1852_v7 }
 0xcb9   :  { %v1798_v5 = vld [vmem:[#allocation3] sm:$0x1] }
 0xcba   :  { %v1803_v53 = vadd.f32 %v1801_v60, %v1798_v5 }
 0xcbc   :  { %1805 = vst.msk [vmem:[#allocation3] sm:$0x1] %vm1804_vm12, %v1803_v53 }
 0xcbd   :  { %v1854_v51 = vld [vmem:[#allocation3 + $0x1] sm:$0x1] }
 0xcbe   :  { %v1859_v57 = vadd.f32 %v1857_v33, %v1854_v51 }
 0xcc0   :  { %1860 = vst.msk [vmem:[#allocation3 + $0x1] sm:$0x1] %vm1804_vm12, %v1859_v57 }
 0xcc3   :  { %v1806_v38 = vld [vmem:[#allocation3] sm:$0x1] }
 0xcc4   :  { %v1811_v39 = vadd.f32 %v1809_v34, %v1806_v38 }
 0xcc6   :  { %1813 = vst.msk [vmem:[#allocation3] sm:$0x1] %vm1812_vm13, %v1811_v39 }
 0xcc7   :  { %v1861_v45 = vld [vmem:[#allocation3 + $0x1] sm:$0x1] }
 0xcc8   :  { %v1866_v50 = vadd.f32 %v1864_v36, %v1861_v45 }
 0xcca   :  { %1867 = vst.msk [vmem:[#allocation3 + $0x1] sm:$0x1] %vm1812_vm13, %v1866_v50 }
 0xccd   :  { %v1814_v40 = vld [vmem:[#allocation3] sm:$0x1] }
 0xcce   :  { %v1819_v46 = vadd.f32 %v1817_v43, %v1814_v40 }
 0xcd0   :  { %1821 = vst.msk [vmem:[#allocation3] sm:$0x1] %vm1820_vm14, %v1819_v46 }
 0xcd1   :  { %v1868_v55 = vld [vmem:[#allocation3 + $0x1] sm:$0x1] }
 0xcd2   :  { %v1873_v44 = vadd.f32 %v1871_v49, %v1868_v55 }
 0xcd4   :  { %1874 = vst.msk [vmem:[#allocation3 + $0x1] sm:$0x1] %vm1820_vm14, %v1873_v44 }
 0xcd7   :  { %v1877_v62 = vld [vmem:[#allocation3] sm:$0x1] }
 0xcd8   :  { %v1887_v47 = vmul.f32 %v1885_v58, %v1877_v62 }
 0xcda   :  { %1892 = vrot.lane.b32.xlu0 %v1887_v47, %s2364_s21 }
 0xcdb   :  { %v1898_v2 = vld [vmem:[#allocation3 + $0x1] sm:$0x1] }
 0xcdc   :  { %v1908_v56 = vmul.f32 %v1906_v1, %v1898_v2 }
 0xcde   :  { %1913 = vrot.lane.b32.xlu1 %v1908_v56, %s2364_s21 }
 0xd4c   :  { %v1893_v15 = vpop.permute.xlu0 %1892 }
 0xd4d   :  { %v1895_v37 = vsel %vm1890_vm15, %v1893_v15, 0.0 }
 0xd4e   :  { %1897 = vst.msk [vmem:[#allocation6] sm:$0x1] %vm1896_vm0, %v1895_v37 }
 0xd50   :  { %v1914_v8 = vpop.permute.xlu1 %1913 }
 0xd51   :  { %v1916_v0 = vsel %vm1911_vm1, %v1914_v8, 0.0 }
 0xd52   :  { %1917 = vst.msk [vmem:[#allocation6 + $0x1] sm:$0x1] %vm1896_vm0, %v1916_v0 }
 0xd53   :  { %2331 = shalt.err (!%p2328_p9)
}
 0xd54   :  { %1927 = dma.vmem_to_hbm [thread:$0]  %s1925_s8, 32, %s3176_s22, [#allocation7]  }
 0xd55   :  { %2342 = dma.done.wait [#allocation7], 32  }
 0xd56   :  { %2343 = vsyncadd [#allocation7], 4294967264 }
 0xd57   :  { %1931 = vsyncpa [#allocation7], 1 }

</bundles_post_ra>
